<compile_context>
chip_gen: v6e
topology: v6e:2x2x1
jax: 0.10.0
libtpu: 0.0.40
codegen_flags: <defaults>
</compile_context>

<pallas_src>
import jax
import jax.numpy as jnp
import numpy as np
from jax import lax
from jax.experimental import pallas as pl
from jax.experimental.pallas import tpu as pltpu

EPS = 1e-5
VMEM_LIMIT_BYTES = 64 * 1024 * 1024  # raise toward ~96 MiB on v5e/v6e; v7x has 64 MiB physical


# ---------------------------------------------------------------------------
# value-level helpers (no scratch Refs, no full-buffer zeroing)
# ---------------------------------------------------------------------------
def _pad_hw(x):
    """Zero-pad an (H, W, C) value by 1 on each spatial side; only halo bytes produced."""
    H, W, C = x.shape
    zr = jnp.zeros((1, W, C), x.dtype)
    x = jnp.concatenate([zr, x, zr], axis=0)           # (H+2, W, C)
    zc = jnp.zeros((H + 2, 1, C), x.dtype)
    return jnp.concatenate([zc, x, zc], axis=1)        # (H+2, W+2, C)


def _patches(xpad, H, W, C):
    """im2col as a VALUE: (H*W, 9*C), tap order (kh*3+kw)*C + c (matches weight slab)."""
    cols = jnp.concatenate(
        [xpad[kh:kh + H, kw:kw + W, :] for kh in range(3) for kw in range(3)],
        axis=-1)                                        # (H, W, 9*C)
    return cols.reshape(H * W, 9 * C)


def _moments(y_bf, st_ref):
    """Per-tile partial sums (sum, sum of squares) over rows, written as (2, Cout)."""
    yf = y_bf.astype(jnp.float32)
    st_ref[0] = jnp.concatenate(
        [jnp.sum(yf, axis=0, keepdims=True),
         jnp.sum(yf * yf, axis=0, keepdims=True)], axis=0)


# ---------------------------------------------------------------------------
# kernels
# ---------------------------------------------------------------------------
def conv1_stats_kernel(x_ref, w1_ref, y1_ref, st1_ref):
    """conv1 (single K=9*Cin MXU matmul) + per-image BN1 partial statistics."""
    _, H, W, Cin = x_ref.shape
    Cout = y1_ref.shape[-1]
    p = _patches(_pad_hw(x_ref[0]), H, W, Cin)                      # (H*W, 9*Cin) bf16
    acc = jnp.dot(p, w1_ref[...], preferred_element_type=jnp.float32)
    # conv bias omitted: exactly cancelled by the batch-statistic BN that follows.
    y_bf = acc.astype(jnp.bfloat16)
    y1_ref[0] = y_bf.reshape(H, W, Cout)
    _moments(y_bf, st1_ref)


def bn1_conv2_stats_kernel(y1_ref, s1_ref, t1_ref, w2_ref, y2_ref, st2_ref):
    """BN1 (folded FMA) + ReLU + conv2 (single K=9*Cout matmul) + BN2 partial stats."""
    _, H, W, C = y1_ref.shape
    Cout = y2_ref.shape[-1]
    h1 = jnp.maximum(y1_ref[0].astype(jnp.float32) * s1_ref[...] + t1_ref[...], 0.0)
    p = _patches(_pad_hw(h1.astype(jnp.bfloat16)), H, W, C)         # (H*W, 9*C) bf16
    acc = jnp.dot(p, w2_ref[...], preferred_element_type=jnp.float32)
    y_bf = acc.astype(jnp.bfloat16)
    y2_ref[0] = y_bf.reshape(H, W, Cout)
    _moments(y_bf, st2_ref)


def bn2_relu_kernel(y2_ref, s2_ref, t2_ref, out_ref):
    """BN2 (folded FMA) + ReLU."""
    out_ref[0] = jnp.maximum(
        y2_ref[0].astype(jnp.float32) * s2_ref[...] + t2_ref[...], 0.0
    ).astype(out_ref.dtype)


# ---------------------------------------------------------------------------
# wrapper
# ---------------------------------------------------------------------------
def double_conv_pallas_nhwc(x_nhwc, params):
    """x_nhwc: [N, H, W, Cin] f32 -> [N, H, W, Cout] f32 (NHWC end-to-end)."""
    w1, b1, g1, be1, w2, b2, g2, be2 = params
    del b1, b2  # cancelled exactly by the batch-statistic BatchNorm (see kernel comment)
    N, H, W, Cin = x_nhwc.shape
    Cout = w1.shape[-1]
    cnt = float(N * H * W)

    x = x_nhwc.astype(jnp.bfloat16)
    # im2col weight slabs, row order (kh*3+kw)*C + c — matches _patches().
    w1m = w1.reshape(9 * Cin, Cout).astype(jnp.bfloat16)
    w2m = w2.reshape(9 * Cout, Cout).astype(jnp.bfloat16)

    cp = pltpu.CompilerParams(dimension_semantics=("parallel",),
                              vmem_limit_bytes=VMEM_LIMIT_BYTES)

    img_in = pl.BlockSpec((1, H, W, Cin), lambda n: (n, 0, 0, 0))
    img_mid = pl.BlockSpec((1, H, W, Cout), lambda n: (n, 0, 0, 0))
    stat_out = pl.BlockSpec((1, 2, Cout), lambda n: (n, 0, 0))
    w1_res = pl.BlockSpec((9 * Cin, Cout), lambda n: (0, 0))     # VMEM-resident
    w2_res = pl.BlockSpec((9 * Cout, Cout), lambda n: (0, 0))    # VMEM-resident
    vec_res = pl.BlockSpec((1, Cout), lambda n: (0, 0))          # VMEM-resident

    # ---- pass A: conv1 + BN1 partial stats (grid over N, auto-pipelined) ----
    y1, st1 = pl.pallas_call(
        conv1_stats_kernel,
        out_shape=(jax.ShapeDtypeStruct((N, H, W, Cout), jnp.bfloat16),
                   jax.ShapeDtypeStruct((N, 2, Cout), jnp.float32)),
        grid_spec=pltpu.PrefetchScalarGridSpec(
            num_scalar_prefetch=0, grid=(N,),
            in_specs=[img_in, w1_res],
            out_specs=[img_mid, stat_out]),
        compiler_params=cp,
    )(x, w1m)

    def fold_bn(st, g, be):
        s = jnp.sum(st, axis=0)                                  # (2, Cout)
        mean = s[0:1] / cnt
        var = jnp.maximum(s[1:2] / cnt - mean * mean, 0.0)       # biased variance
        scale = g * lax.rsqrt(var + EPS)                         # (1, Cout)
        shift = be - mean * scale
        return scale, shift

    s1, t1 = fold_bn(st1, g1, be1)

    # ---- pass B: BN1+ReLU (one FMA) + conv2 + BN2 partial stats ----
    y2, st2 = pl.pallas_call(
        bn1_conv2_stats_kernel,
        out_shape=(jax.ShapeDtypeStruct((N, H, W, Cout), jnp.bfloat16),
                   jax.ShapeDtypeStruct((N, 2, Cout), jnp.float32)),
        grid_spec=pltpu.PrefetchScalarGridSpec(
            num_scalar_prefetch=0, grid=(N,),
            in_specs=[img_mid, vec_res, vec_res, w2_res],
            out_specs=[img_mid, stat_out]),
        compiler_params=cp,
    )(y1, s1, t1, w2m)

    s2, t2 = fold_bn(st2, g2, be2)

    # ---- pass C: BN2+ReLU (one FMA) ----
    out = pl.pallas_call(
        bn2_relu_kernel,
        out_shape=jax.ShapeDtypeStruct((N, H, W, Cout), jnp.float32),
        grid_spec=pltpu.PrefetchScalarGridSpec(
            num_scalar_prefetch=0, grid=(N,),
            in_specs=[img_mid, vec_res, vec_res],
            out_specs=pl.BlockSpec((1, H, W, Cout), lambda n: (n, 0, 0, 0))),
        compiler_params=cp,
    )(y2, s2, t2)
    return out


@jax.jit
def double_conv_pallas(x_nchw, params):
    """PyTorch-layout adapter: [N, Cin, H, W] f32 -> [N, Cout, H, W] f32."""
    x = jnp.transpose(x_nchw, (0, 2, 3, 1))
    y = double_conv_pallas_nhwc(x, params)
    return jnp.transpose(y, (0, 3, 1, 2))


# ---------------------------------------------------------------------------
# pure-JAX reference (PyTorch semantics, matched bf16-operand / f32-accum precision)
# ---------------------------------------------------------------------------
def reference_double_conv(x_nchw, params):
    w1, b1, g1, be1, w2, b2, g2, be2 = params
    x = jnp.transpose(x_nchw, (0, 2, 3, 1))

    def conv_bn_relu(h, w, b, g, be):
        y = lax.conv_general_dilated(
            h.astype(jnp.bfloat16), w.astype(jnp.bfloat16),
            window_strides=(1, 1), padding=((1, 1), (1, 1)),
            dimension_numbers=("NHWC", "HWIO", "NHWC"),
            preferred_element_type=jnp.float32)
        y = y + b.reshape(1, 1, 1, -1)                 # bias (cancelled by BN below)
        y = y.astype(jnp.bfloat16).astype(jnp.float32)  # kernel keeps pre-BN conv in bf16
        m = jnp.mean(y, axis=(0, 1, 2), keepdims=True)
        v = jnp.mean((y - m) ** 2, axis=(0, 1, 2), keepdims=True)
        y = (y - m) * lax.rsqrt(v + EPS) * g.reshape(1, 1, 1, -1) + be.reshape(1, 1, 1, -1)
        return jnp.maximum(y, 0.0)

    h = conv_bn_relu(x, w1, b1, g1, be1)
    h = conv_bn_relu(h, w2, b2, g2, be2)
    return jnp.transpose(h, (0, 3, 1, 2))


def init_params(key, in_channels, out_channels):
    ks = jax.random.split(key, 8)
    w1 = 0.1 * jax.random.normal(ks[0], (3, 3, in_channels, out_channels), jnp.float32)
    b1 = 0.1 * jax.random.normal(ks[1], (1, out_channels), jnp.float32)
    g1 = 1.0 + 0.1 * jax.random.normal(ks[2], (1, out_channels), jnp.float32)
    be1 = 0.1 * jax.random.normal(ks[3], (1, out_channels), jnp.float32)
    w2 = 0.1 * jax.random.normal(ks[4], (3, 3, out_channels, out_channels), jnp.float32)
    b2 = 0.1 * jax.random.normal(ks[5], (1, out_channels), jnp.float32)
    g2 = 1.0 + 0.1 * jax.random.normal(ks[6], (1, out_channels), jnp.float32)
    be2 = 0.1 * jax.random.normal(ks[7], (1, out_channels), jnp.float32)
    return (w1, b1, g1, be1, w2, b2, g2, be2)


if __name__ == "__main__":
    key = jax.random.PRNGKey(0)
    k_x, k_p = jax.random.split(key)

    N, Cin, Cout, H, W = 2, 4, 8, 16, 16
    x = jax.random.normal(k_x, (N, Cin, H, W), jnp.float32)      # NCHW, like PyTorch
    params = init_params(k_p, Cin, Cout)

    y = jax.block_until_ready(double_conv_pallas(x, params))
    y_ref = jax.block_until_ready(reference_double_conv(x, params))

    # bf16-operand tolerance at demo scale.
    np.testing.assert_allclose(np.asarray(y), np.asarray(y_ref), rtol=3e-2, atol=3e-2)
    assert y.shape == (N, Cout, H, W)
    print("KERNEL_OK")
</pallas_src>

<mosaic_0001>
module attributes {stable_mosaic.version = 11 : i64} {
  func.func @bn2_relu_kernel(%arg0: i32, %arg1: memref<1x16x16x8xbf16, #tpu.memory_space<vmem>>, %arg2: memref<1x8xf32, #tpu.memory_space<vmem>>, %arg3: memref<1x8xf32, #tpu.memory_space<vmem>>, %arg4: memref<1x16x16x8xf32, #tpu.memory_space<vmem>>) attributes {dimension_semantics = [#tpu.dimension_semantics<parallel>], iteration_bounds = array<i64: 2>, scalar_prefetch = 0 : i64, scratch_operands = 0 : i64, tpu.core_type = #tpu.core_type<tc>, window_params = [{transform_indices = @transform_0, window_bounds = array<i64: 1, 16, 16, 8>}, {pipeline_mode = #tpu.pipeline_mode<synchronous>, transform_indices = @transform_1, window_bounds = array<i64: 1, 8>}, {pipeline_mode = #tpu.pipeline_mode<synchronous>, transform_indices = @transform_2, window_bounds = array<i64: 1, 8>}, {transform_indices = @transform_3, window_bounds = array<i64: 1, 16, 16, 8>}]} {
    %c0 = arith.constant 0 : index
    %c0_0 = arith.constant 0 : index
    %c0_1 = arith.constant 0 : index
    %c0_2 = arith.constant 0 : index
    %0 = vector.load %arg1[%c0, %c0_0, %c0_1, %c0_2] : memref<1x16x16x8xbf16, #tpu.memory_space<vmem>>, vector<1x16x16x8xbf16>
    %1 = vector.shape_cast %0 : vector<1x16x16x8xbf16> to vector<16x16x8xbf16>
    %2 = arith.extf %1 : vector<16x16x8xbf16> to vector<16x16x8xf32>
    %c0_3 = arith.constant 0 : index
    %c0_4 = arith.constant 0 : index
    %3 = vector.load %arg2[%c0_3, %c0_4] : memref<1x8xf32, #tpu.memory_space<vmem>>, vector<1x8xf32>
    %4 = vector.shape_cast %3 : vector<1x8xf32> to vector<1x1x8xf32>
    %5 = vector.broadcast %4 : vector<1x1x8xf32> to vector<16x16x8xf32>
    %6 = arith.mulf %2, %5 : vector<16x16x8xf32>
    %c0_5 = arith.constant 0 : index
    %c0_6 = arith.constant 0 : index
    %7 = vector.load %arg3[%c0_5, %c0_6] : memref<1x8xf32, #tpu.memory_space<vmem>>, vector<1x8xf32>
    %8 = vector.shape_cast %7 : vector<1x8xf32> to vector<1x1x8xf32>
    %9 = vector.broadcast %8 : vector<1x1x8xf32> to vector<16x16x8xf32>
    %10 = arith.addf %6, %9 : vector<16x16x8xf32>
    %cst = arith.constant 0.000000e+00 : f32
    %11 = vector.broadcast %cst : f32 to vector<16x16x8xf32>
    %12 = arith.maximumf %10, %11 : vector<16x16x8xf32>
    %c0_7 = arith.constant 0 : index
    %c0_8 = arith.constant 0 : index
    %c0_9 = arith.constant 0 : index
    %c0_10 = arith.constant 0 : index
    %13 = vector.load %arg4[%c0_7, %c0_8, %c0_9, %c0_10] : memref<1x16x16x8xf32, #tpu.memory_space<vmem>>, vector<1x16x16x8xf32>
    %14 = vector.shape_cast %13 : vector<1x16x16x8xf32> to vector<16x16x8xf32>
    %15 = vector.shape_cast %12 : vector<16x16x8xf32> to vector<1x16x16x8xf32>
    tpu.vector_store %arg4[%c0_7, %c0_8, %c0_9, %c0_10], %15 {strides = array<i32>} : memref<1x16x16x8xf32, #tpu.memory_space<vmem>>, vector<1x16x16x8xf32>,
    return
  }
  func.func @transform_0(%arg0: i32) -> (i32, i32, i32, i32) {
    %c0_i32 = arith.constant 0 : i32
    %c0_i32_0 = arith.constant 0 : i32
    %c0_i32_1 = arith.constant 0 : i32
    %c0_i32_2 = arith.constant 0 : i32
    return %arg0, %c0_i32, %c0_i32_0, %c0_i32_1 : i32, i32, i32, i32
  }
  func.func @transform_1(%arg0: i32) -> (i32, i32) {
    %c0_i32 = arith.constant 0 : i32
    %c0_i32_0 = arith.constant 0 : i32
    %c0_i32_1 = arith.constant 0 : i32
    return %c0_i32, %c0_i32_0 : i32, i32
  }
  func.func @transform_2(%arg0: i32) -> (i32, i32) {
    %c0_i32 = arith.constant 0 : i32
    %c0_i32_0 = arith.constant 0 : i32
    %c0_i32_1 = arith.constant 0 : i32
    return %c0_i32, %c0_i32_0 : i32, i32
  }
  func.func @transform_3(%arg0: i32) -> (i32, i32, i32, i32) {
    %c0_i32 = arith.constant 0 : i32
    %c0_i32_0 = arith.constant 0 : i32
    %c0_i32_1 = arith.constant 0 : i32
    %c0_i32_2 = arith.constant 0 : i32
    return %arg0, %c0_i32, %c0_i32_0, %c0_i32_1 : i32, i32, i32, i32
  }
}

module attributes {stable_mosaic.version = 11 : i64} {
  func.func @bn1_conv2_stats_kernel(%arg0: i32, %arg1: memref<1x16x16x8xbf16, #tpu.memory_space<vmem>>, %arg2: memref<1x8xf32, #tpu.memory_space<vmem>>, %arg3: memref<1x8xf32, #tpu.memory_space<vmem>>, %arg4: memref<72x8xbf16, #tpu.memory_space<vmem>>, %arg5: memref<1x16x16x8xbf16, #tpu.memory_space<vmem>>, %arg6: memref<1x2x8xf32, #tpu.memory_space<vmem>>) attributes {dimension_semantics = [#tpu.dimension_semantics<parallel>], iteration_bounds = array<i64: 2>, scalar_prefetch = 0 : i64, scratch_operands = 0 : i64, tpu.core_type = #tpu.core_type<tc>, window_params = [{transform_indices = @transform_0, window_bounds = array<i64: 1, 16, 16, 8>}, {pipeline_mode = #tpu.pipeline_mode<synchronous>, transform_indices = @transform_1, window_bounds = array<i64: 1, 8>}, {pipeline_mode = #tpu.pipeline_mode<synchronous>, transform_indices = @transform_2, window_bounds = array<i64: 1, 8>}, {pipeline_mode = #tpu.pipeline_mode<synchronous>, transform_indices = @transform_3, window_bounds = array<i64: 72, 8>}, {transform_indices = @transform_4, window_bounds = array<i64: 1, 16, 16, 8>}, {transform_indices = @transform_5, window_bounds = array<i64: 1, 2, 8>}]} {
    %c0 = arith.constant 0 : index
    %c0_0 = arith.constant 0 : index
    %c0_1 = arith.constant 0 : index
    %c0_2 = arith.constant 0 : index
    %0 = vector.load %arg1[%c0, %c0_0, %c0_1, %c0_2] : memref<1x16x16x8xbf16, #tpu.memory_space<vmem>>, vector<1x16x16x8xbf16>
    %1 = vector.shape_cast %0 : vector<1x16x16x8xbf16> to vector<16x16x8xbf16>
    %2 = arith.extf %1 : vector<16x16x8xbf16> to vector<16x16x8xf32>
    %c0_3 = arith.constant 0 : index
    %c0_4 = arith.constant 0 : index
    %3 = vector.load %arg2[%c0_3, %c0_4] : memref<1x8xf32, #tpu.memory_space<vmem>>, vector<1x8xf32>
    %4 = vector.shape_cast %3 : vector<1x8xf32> to vector<1x1x8xf32>
    %5 = vector.broadcast %4 : vector<1x1x8xf32> to vector<16x16x8xf32>
    %6 = arith.mulf %2, %5 : vector<16x16x8xf32>
    %c0_5 = arith.constant 0 : index
    %c0_6 = arith.constant 0 : index
    %7 = vector.load %arg3[%c0_5, %c0_6] : memref<1x8xf32, #tpu.memory_space<vmem>>, vector<1x8xf32>
    %8 = vector.shape_cast %7 : vector<1x8xf32> to vector<1x1x8xf32>
    %9 = vector.broadcast %8 : vector<1x1x8xf32> to vector<16x16x8xf32>
    %10 = arith.addf %6, %9 : vector<16x16x8xf32>
    %cst = arith.constant 0.000000e+00 : f32
    %11 = vector.broadcast %cst : f32 to vector<16x16x8xf32>
    %12 = arith.maximumf %10, %11 : vector<16x16x8xf32>
    %13 = arith.truncf %12 : vector<16x16x8xf32> to vector<16x16x8xbf16>
    %cst_7 = arith.constant 0.000000e+00 : bf16
    %14 = vector.broadcast %cst_7 : bf16 to vector<1x16x8xbf16>
    %15 = tpu.concatenate %14, %13, %14 in 0 : vector<1x16x8xbf16>, vector<16x16x8xbf16>, vector<1x16x8xbf16> -> vector<18x16x8xbf16>
    %cst_8 = arith.constant 0.000000e+00 : bf16
    %16 = vector.broadcast %cst_8 : bf16 to vector<18x1x8xbf16>
    %17 = tpu.concatenate %16, %15, %16 in 1 : vector<18x1x8xbf16>, vector<18x16x8xbf16>, vector<18x1x8xbf16> -> vector<18x18x8xbf16>
    %18 = vector.extract_strided_slice %17 {offsets = [0, 0, 0], sizes = [16, 16, 8], strides = [1, 1, 1]} : vector<18x18x8xbf16> to vector<16x16x8xbf16>
    %19 = vector.extract_strided_slice %17 {offsets = [0, 1, 0], sizes = [16, 16, 8], strides = [1, 1, 1]} : vector<18x18x8xbf16> to vector<16x16x8xbf16>
    %20 = vector.extract_strided_slice %17 {offsets = [0, 2, 0], sizes = [16, 16, 8], strides = [1, 1, 1]} : vector<18x18x8xbf16> to vector<16x16x8xbf16>
    %21 = vector.extract_strided_slice %17 {offsets = [1, 0, 0], sizes = [16, 16, 8], strides = [1, 1, 1]} : vector<18x18x8xbf16> to vector<16x16x8xbf16>
    %22 = vector.extract_strided_slice %17 {offsets = [1, 1, 0], sizes = [16, 16, 8], strides = [1, 1, 1]} : vector<18x18x8xbf16> to vector<16x16x8xbf16>
    %23 = vector.extract_strided_slice %17 {offsets = [1, 2, 0], sizes = [16, 16, 8], strides = [1, 1, 1]} : vector<18x18x8xbf16> to vector<16x16x8xbf16>
    %24 = vector.extract_strided_slice %17 {offsets = [2, 0, 0], sizes = [16, 16, 8], strides = [1, 1, 1]} : vector<18x18x8xbf16> to vector<16x16x8xbf16>
    %25 = vector.extract_strided_slice %17 {offsets = [2, 1, 0], sizes = [16, 16, 8], strides = [1, 1, 1]} : vector<18x18x8xbf16> to vector<16x16x8xbf16>
    %26 = vector.extract_strided_slice %17 {offsets = [2, 2, 0], sizes = [16, 16, 8], strides = [1, 1, 1]} : vector<18x18x8xbf16> to vector<16x16x8xbf16>
    %27 = tpu.concatenate %18, %19, %20, %21, %22, %23, %24, %25, %26 in 2 : vector<16x16x8xbf16>, vector<16x16x8xbf16>, vector<16x16x8xbf16>, vector<16x16x8xbf16>, vector<16x16x8xbf16>, vector<16x16x8xbf16>, vector<16x16x8xbf16>, vector<16x16x8xbf16>, vector<16x16x8xbf16> -> vector<16x16x72xbf16>
    %28 = vector.shape_cast %27 : vector<16x16x72xbf16> to vector<256x72xbf16>
    %c0_9 = arith.constant 0 : index
    %c0_10 = arith.constant 0 : index
    %29 = vector.load %arg4[%c0_9, %c0_10] : memref<72x8xbf16, #tpu.memory_space<vmem>>, vector<72x8xbf16>
    %cst_11 = arith.constant dense<0.000000e+00> : vector<256x8xf32>
    %30 = tpu.matmul %28, %29, %cst_11 {dimension_numbers = #tpu.dot_dimension_numbers<[1], [0], [0], [1], [0, 0, 1, 1], [], []>} : vector<256x72xbf16>, vector<72x8xbf16>, vector<256x8xf32> -> vector<256x8xf32>
    %31 = arith.truncf %30 : vector<256x8xf32> to vector<256x8xbf16>
    %32 = vector.shape_cast %31 : vector<256x8xbf16> to vector<16x16x8xbf16>
    %c0_12 = arith.constant 0 : index
    %c0_13 = arith.constant 0 : index
    %c0_14 = arith.constant 0 : index
    %c0_15 = arith.constant 0 : index
    %33 = vector.load %arg5[%c0_12, %c0_13, %c0_14, %c0_15] : memref<1x16x16x8xbf16, #tpu.memory_space<vmem>>, vector<1x16x16x8xbf16>
    %34 = vector.shape_cast %33 : vector<1x16x16x8xbf16> to vector<16x16x8xbf16>
    %35 = vector.shape_cast %32 : vector<16x16x8xbf16> to vector<1x16x16x8xbf16>
    tpu.vector_store %arg5[%c0_12, %c0_13, %c0_14, %c0_15], %35 {strides = array<i32>} : memref<1x16x16x8xbf16, #tpu.memory_space<vmem>>, vector<1x16x16x8xbf16>,
    %36 = arith.extf %31 : vector<256x8xbf16> to vector<256x8xf32>
    %cst_16 = arith.constant dense<0.000000e+00> : vector<8xf32>
    %37 = vector.multi_reduction <add>, %36, %cst_16 [0] : vector<256x8xf32> to vector<8xf32>
    %38 = vector.shape_cast %37 : vector<8xf32> to vector<1x8xf32>
    %39 = arith.mulf %36, %36 : vector<256x8xf32>
    %cst_17 = arith.constant dense<0.000000e+00> : vector<8xf32>
    %40 = vector.multi_reduction <add>, %39, %cst_17 [0] : vector<256x8xf32> to vector<8xf32>
    %41 = vector.shape_cast %40 : vector<8xf32> to vector<1x8xf32>
    %42 = tpu.concatenate %38, %41 in 0 : vector<1x8xf32>, vector<1x8xf32> -> vector<2x8xf32>
    %c0_18 = arith.constant 0 : index
    %c0_19 = arith.constant 0 : index
    %c0_20 = arith.constant 0 : index
    %43 = vector.load %arg6[%c0_18, %c0_19, %c0_20] : memref<1x2x8xf32, #tpu.memory_space<vmem>>, vector<1x2x8xf32>
    %44 = vector.shape_cast %43 : vector<1x2x8xf32> to vector<2x8xf32>
    %45 = vector.shape_cast %42 : vector<2x8xf32> to vector<1x2x8xf32>
    tpu.vector_store %arg6[%c0_18, %c0_19, %c0_20], %45 {strides = array<i32>} : memref<1x2x8xf32, #tpu.memory_space<vmem>>, vector<1x2x8xf32>,
    return
  }
  func.func @transform_0(%arg0: i32) -> (i32, i32, i32, i32) {
    %c0_i32 = arith.constant 0 : i32
    %c0_i32_0 = arith.constant 0 : i32
    %c0_i32_1 = arith.constant 0 : i32
    %c0_i32_2 = arith.constant 0 : i32
    return %arg0, %c0_i32, %c0_i32_0, %c0_i32_1 : i32, i32, i32, i32
  }
  func.func @transform_1(%arg0: i32) -> (i32, i32) {
    %c0_i32 = arith.constant 0 : i32
    %c0_i32_0 = arith.constant 0 : i32
    %c0_i32_1 = arith.constant 0 : i32
    return %c0_i32, %c0_i32_0 : i32, i32
  }
  func.func @transform_2(%arg0: i32) -> (i32, i32) {
    %c0_i32 = arith.constant 0 : i32
    %c0_i32_0 = arith.constant 0 : i32
    %c0_i32_1 = arith.constant 0 : i32
    return %c0_i32, %c0_i32_0 : i32, i32
  }
  func.func @transform_3(%arg0: i32) -> (i32, i32) {
    %c0_i32 = arith.constant 0 : i32
    %c0_i32_0 = arith.constant 0 : i32
    %c0_i32_1 = arith.constant 0 : i32
    return %c0_i32, %c0_i32_0 : i32, i32
  }
  func.func @transform_4(%arg0: i32) -> (i32, i32, i32, i32) {
    %c0_i32 = arith.constant 0 : i32
    %c0_i32_0 = arith.constant 0 : i32
    %c0_i32_1 = arith.constant 0 : i32
    %c0_i32_2 = arith.constant 0 : i32
    return %arg0, %c0_i32, %c0_i32_0, %c0_i32_1 : i32, i32, i32, i32
  }
  func.func @transform_5(%arg0: i32) -> (i32, i32, i32) {
    %c0_i32 = arith.constant 0 : i32
    %c0_i32_0 = arith.constant 0 : i32
    %c0_i32_1 = arith.constant 0 : i32
    return %arg0, %c0_i32, %c0_i32_0 : i32, i32, i32
  }
}

module attributes {stable_mosaic.version = 11 : i64} {
  func.func @conv1_stats_kernel(%arg0: i32, %arg1: memref<1x16x16x4xbf16, #tpu.memory_space<vmem>>, %arg2: memref<36x8xbf16, #tpu.memory_space<vmem>>, %arg3: memref<1x16x16x8xbf16, #tpu.memory_space<vmem>>, %arg4: memref<1x2x8xf32, #tpu.memory_space<vmem>>) attributes {dimension_semantics = [#tpu.dimension_semantics<parallel>], iteration_bounds = array<i64: 2>, scalar_prefetch = 0 : i64, scratch_operands = 0 : i64, tpu.core_type = #tpu.core_type<tc>, window_params = [{transform_indices = @transform_0, window_bounds = array<i64: 1, 16, 16, 4>}, {pipeline_mode = #tpu.pipeline_mode<synchronous>, transform_indices = @transform_1, window_bounds = array<i64: 36, 8>}, {transform_indices = @transform_2, window_bounds = array<i64: 1, 16, 16, 8>}, {transform_indices = @transform_3, window_bounds = array<i64: 1, 2, 8>}]} {
    %c0 = arith.constant 0 : index
    %c0_0 = arith.constant 0 : index
    %c0_1 = arith.constant 0 : index
    %c0_2 = arith.constant 0 : index
    %0 = vector.load %arg1[%c0, %c0_0, %c0_1, %c0_2] : memref<1x16x16x4xbf16, #tpu.memory_space<vmem>>, vector<1x16x16x4xbf16>
    %1 = vector.shape_cast %0 : vector<1x16x16x4xbf16> to vector<16x16x4xbf16>
    %cst = arith.constant 0.000000e+00 : bf16
    %2 = vector.broadcast %cst : bf16 to vector<1x16x4xbf16>
    %3 = tpu.concatenate %2, %1, %2 in 0 : vector<1x16x4xbf16>, vector<16x16x4xbf16>, vector<1x16x4xbf16> -> vector<18x16x4xbf16>
    %cst_3 = arith.constant 0.000000e+00 : bf16
    %4 = vector.broadcast %cst_3 : bf16 to vector<18x1x4xbf16>
    %5 = tpu.concatenate %4, %3, %4 in 1 : vector<18x1x4xbf16>, vector<18x16x4xbf16>, vector<18x1x4xbf16> -> vector<18x18x4xbf16>
    %6 = vector.extract_strided_slice %5 {offsets = [0, 0, 0], sizes = [16, 16, 4], strides = [1, 1, 1]} : vector<18x18x4xbf16> to vector<16x16x4xbf16>
    %7 = vector.extract_strided_slice %5 {offsets = [0, 1, 0], sizes = [16, 16, 4], strides = [1, 1, 1]} : vector<18x18x4xbf16> to vector<16x16x4xbf16>
    %8 = vector.extract_strided_slice %5 {offsets = [0, 2, 0], sizes = [16, 16, 4], strides = [1, 1, 1]} : vector<18x18x4xbf16> to vector<16x16x4xbf16>
    %9 = vector.extract_strided_slice %5 {offsets = [1, 0, 0], sizes = [16, 16, 4], strides = [1, 1, 1]} : vector<18x18x4xbf16> to vector<16x16x4xbf16>
    %10 = vector.extract_strided_slice %5 {offsets = [1, 1, 0], sizes = [16, 16, 4], strides = [1, 1, 1]} : vector<18x18x4xbf16> to vector<16x16x4xbf16>
    %11 = vector.extract_strided_slice %5 {offsets = [1, 2, 0], sizes = [16, 16, 4], strides = [1, 1, 1]} : vector<18x18x4xbf16> to vector<16x16x4xbf16>
    %12 = vector.extract_strided_slice %5 {offsets = [2, 0, 0], sizes = [16, 16, 4], strides = [1, 1, 1]} : vector<18x18x4xbf16> to vector<16x16x4xbf16>
    %13 = vector.extract_strided_slice %5 {offsets = [2, 1, 0], sizes = [16, 16, 4], strides = [1, 1, 1]} : vector<18x18x4xbf16> to vector<16x16x4xbf16>
    %14 = vector.extract_strided_slice %5 {offsets = [2, 2, 0], sizes = [16, 16, 4], strides = [1, 1, 1]} : vector<18x18x4xbf16> to vector<16x16x4xbf16>
    %15 = tpu.concatenate %6, %7, %8, %9, %10, %11, %12, %13, %14 in 2 : vector<16x16x4xbf16>, vector<16x16x4xbf16>, vector<16x16x4xbf16>, vector<16x16x4xbf16>, vector<16x16x4xbf16>, vector<16x16x4xbf16>, vector<16x16x4xbf16>, vector<16x16x4xbf16>, vector<16x16x4xbf16> -> vector<16x16x36xbf16>
    %16 = vector.shape_cast %15 : vector<16x16x36xbf16> to vector<256x36xbf16>
    %c0_4 = arith.constant 0 : index
    %c0_5 = arith.constant 0 : index
    %17 = vector.load %arg2[%c0_4, %c0_5] : memref<36x8xbf16, #tpu.memory_space<vmem>>, vector<36x8xbf16>
    %cst_6 = arith.constant dense<0.000000e+00> : vector<256x8xf32>
    %18 = tpu.matmul %16, %17, %cst_6 {dimension_numbers = #tpu.dot_dimension_numbers<[1], [0], [0], [1], [0, 0, 1, 1], [], []>} : vector<256x36xbf16>, vector<36x8xbf16>, vector<256x8xf32> -> vector<256x8xf32>
    %19 = arith.truncf %18 : vector<256x8xf32> to vector<256x8xbf16>
    %20 = vector.shape_cast %19 : vector<256x8xbf16> to vector<16x16x8xbf16>
    %c0_7 = arith.constant 0 : index
    %c0_8 = arith.constant 0 : index
    %c0_9 = arith.constant 0 : index
    %c0_10 = arith.constant 0 : index
    %21 = vector.load %arg3[%c0_7, %c0_8, %c0_9, %c0_10] : memref<1x16x16x8xbf16, #tpu.memory_space<vmem>>, vector<1x16x16x8xbf16>
    %22 = vector.shape_cast %21 : vector<1x16x16x8xbf16> to vector<16x16x8xbf16>
    %23 = vector.shape_cast %20 : vector<16x16x8xbf16> to vector<1x16x16x8xbf16>
    tpu.vector_store %arg3[%c0_7, %c0_8, %c0_9, %c0_10], %23 {strides = array<i32>} : memref<1x16x16x8xbf16, #tpu.memory_space<vmem>>, vector<1x16x16x8xbf16>,
    %24 = arith.extf %19 : vector<256x8xbf16> to vector<256x8xf32>
    %cst_11 = arith.constant dense<0.000000e+00> : vector<8xf32>
    %25 = vector.multi_reduction <add>, %24, %cst_11 [0] : vector<256x8xf32> to vector<8xf32>
    %26 = vector.shape_cast %25 : vector<8xf32> to vector<1x8xf32>
    %27 = arith.mulf %24, %24 : vector<256x8xf32>
    %cst_12 = arith.constant dense<0.000000e+00> : vector<8xf32>
    %28 = vector.multi_reduction <add>, %27, %cst_12 [0] : vector<256x8xf32> to vector<8xf32>
    %29 = vector.shape_cast %28 : vector<8xf32> to vector<1x8xf32>
    %30 = tpu.concatenate %26, %29 in 0 : vector<1x8xf32>, vector<1x8xf32> -> vector<2x8xf32>
    %c0_13 = arith.constant 0 : index
    %c0_14 = arith.constant 0 : index
    %c0_15 = arith.constant 0 : index
    %31 = vector.load %arg4[%c0_13, %c0_14, %c0_15] : memref<1x2x8xf32, #tpu.memory_space<vmem>>, vector<1x2x8xf32>
    %32 = vector.shape_cast %31 : vector<1x2x8xf32> to vector<2x8xf32>
    %33 = vector.shape_cast %30 : vector<2x8xf32> to vector<1x2x8xf32>
    tpu.vector_store %arg4[%c0_13, %c0_14, %c0_15], %33 {strides = array<i32>} : memref<1x2x8xf32, #tpu.memory_space<vmem>>, vector<1x2x8xf32>,
    return
  }
  func.func @transform_0(%arg0: i32) -> (i32, i32, i32, i32) {
    %c0_i32 = arith.constant 0 : i32
    %c0_i32_0 = arith.constant 0 : i32
    %c0_i32_1 = arith.constant 0 : i32
    %c0_i32_2 = arith.constant 0 : i32
    return %arg0, %c0_i32, %c0_i32_0, %c0_i32_1 : i32, i32, i32, i32
  }
  func.func @transform_1(%arg0: i32) -> (i32, i32) {
    %c0_i32 = arith.constant 0 : i32
    %c0_i32_0 = arith.constant 0 : i32
    %c0_i32_1 = arith.constant 0 : i32
    return %c0_i32, %c0_i32_0 : i32, i32
  }
  func.func @transform_2(%arg0: i32) -> (i32, i32, i32, i32) {
    %c0_i32 = arith.constant 0 : i32
    %c0_i32_0 = arith.constant 0 : i32
    %c0_i32_1 = arith.constant 0 : i32
    %c0_i32_2 = arith.constant 0 : i32
    return %arg0, %c0_i32, %c0_i32_0, %c0_i32_1 : i32, i32, i32, i32
  }
  func.func @transform_3(%arg0: i32) -> (i32, i32, i32) {
    %c0_i32 = arith.constant 0 : i32
    %c0_i32_0 = arith.constant 0 : i32
    %c0_i32_1 = arith.constant 0 : i32
    return %arg0, %c0_i32, %c0_i32_0 : i32, i32, i32
  }
}

</mosaic_0001>

<bundles_post_ra>
// kernel: double_conv_pallas.5
= control target key start
LH: loop header
LB: loop body
LE: loop exit
PB: predicated region body
PF: predicated region fallthrough
CT: control target
= control target key end

     0   :  { %s563_s12 = smov 0   ;;  %s742_s0 = inlined_call_operand.vmem [shape: bf16[2,16,16,8], index: 0, kind: input, shape index: {}]   ;;  %s743_s1 = inlined_call_operand.vmem [shape: f32[1,8], index: 1, kind: input, shape index: {}]   ;;  %s744_s2 = inlined_call_operand.vmem [shape: f32[1,8], index: 2, kind: input, shape index: {}]   ;;  %s745_s3 = inlined_call_operand.vmem [shape: f32[2,16,16,8], index: 3, kind: output, shape index: {}]  }
   0x1 LB: > { %s433_s13 = sadd.s32 4294967295, %s541_s12   ;;  %p437_p0 = scmp.ge.s32.totalorder %s541_s12, 1  ;;  %s541_s12 = sphi %s563_s12, %s13_s12  }
   0x2   : > { %p137_p1 = scmp.lt.s32.totalorder %s541_s12, 3 }
   0x4   : > { %p138_p2 = pnand %p437_p0, %p137_p1 }
   0x5   : > { %p161_p3 = scmp.lt.s32.totalorder (!%p138_p2), %s433_s13, 1 }
   0x6   : > { %141 = sbr.rel (%p138_p2) target bundleno = 51 (0x33), region = 32 }
   0xb   : > { %s747_s13 = smov (!%p161_p3, %s433_s13), 1  ;;  %v582_v0 = vld [vmem:[%s743_s1] ss:$0 sm:$0xff]  ;;  %vm345_vm0 = vcmask 64512  }
   0xc   : > { %s446_s14 = sshll.u32 %s747_s13, 7  ;;  %v591_v9 = vld [vmem:[%s744_s2] ss:$0 sm:$0xff]  ;;  %s447_s22 = sshll.u32 %s747_s13, 8 }
   0xd   : > { %s577_s17 = scalar_lea.vmem %s742_s0, %s446_s14  ;;  %s609_s25 = scalar_lea.vmem %s745_s3, %s447_s22 }
   0xe   : > { %v449_v1 = vld [vmem:[%s577_s17] sm:$0xff]   ;;  %v512_v2 = vld [vmem:[%s577_s17 + $0x8] sm:$0xff]   ;;  %v513_v3 = vld [vmem:[%s577_s17 + $0x10] sm:$0xff]  }
   0xf   : > { %v450_v4 = vunpack.c.l.bf16 %v449_v1  ;;  %v451_v5 = vunpack.c.h.bf16 %v449_v1  ;;  %v454_v6 = vunpack.c.l.bf16 %v512_v2  ;;  %v455_v7 = vunpack.c.h.bf16 %v512_v2  ;;  %v514_v8 = vld [vmem:[%s577_s17 + $0x18] sm:$0xff]   ;;  %v515_v30 = vld [vmem:[%s577_s17 + $0x20] sm:$0xff]   ;;  %v516_v31 = vld [vmem:[%s577_s17 + $0x28] sm:$0xff]  }
  0x10   : > { %v458_v10 = vunpack.c.l.bf16 %v513_v3  ;;  %v459_v11 = vunpack.c.h.bf16 %v513_v3  ;;  %v462_v12 = vunpack.c.l.bf16 %v514_v8  ;;  %v463_v13 = vunpack.c.h.bf16 %v514_v8  ;;  %v517_v36 = vld [vmem:[%s577_s17 + $0x30] sm:$0xff]   ;;  %v518_v37 = vld [vmem:[%s577_s17 + $0x38] sm:$0xff]   ;;  %v519_v3 = vld [vmem:[%s577_s17 + $0x40] sm:$0xff]  }
  0x11   : > { %v242_v14 = vmul.f32 %v450_v4, %v582_v0  ;;  %v243_v15 = vmul.f32 %v451_v5, %v582_v0  ;;  %v244_v16 = vmul.f32 %v454_v6, %v582_v0  ;;  %v245_v17 = vmul.f32 %v455_v7, %v582_v0  ;;  %v520_v4 = vld [vmem:[%s577_s17 + $0x48] sm:$0xff]  }
  0x12   : > { %v246_v18 = vmul.f32 %v458_v10, %v582_v0  ;;  %v247_v19 = vmul.f32 %v459_v11, %v582_v0  ;;  %v248_v20 = vmul.f32 %v462_v12, %v582_v0  ;;  %v249_v21 = vmul.f32 %v463_v13, %v582_v0  ;;  %v521_v10 = vld [vmem:[%s577_s17 + $0x50] sm:$0xff]   ;;  %v522_v11 = vld [vmem:[%s577_s17 + $0x58] sm:$0xff]  }
  0x13   : > { %v281_v22 = vadd.f32 %v591_v9, %v242_v14  ;;  %v282_v23 = vadd.f32 %v591_v9, %v243_v15  ;;  %v283_v24 = vadd.f32 %v591_v9, %v244_v16  ;;  %v284_v25 = vadd.f32 %v591_v9, %v245_v17 }
  0x14   : > { %v285_v26 = vadd.f32 %v591_v9, %v246_v18  ;;  %v286_v27 = vadd.f32 %v591_v9, %v247_v19  ;;  %v287_v28 = vadd.f32 %v591_v9, %v248_v20  ;;  %v288_v29 = vadd.f32 %v591_v9, %v249_v21 }
  0x15   : > { %v313_v32 = vmax.f32 %v281_v22, 0.0  ;;  %v314_v33 = vmax.f32 %v282_v23, 0.0  ;;  %v315_v34 = vmax.f32 %v283_v24, 0.0  ;;  %v316_v35 = vmax.f32 %v284_v25, 0.0 }
  0x16   : > { %v317_v38 = vmax.f32 %v285_v26, 0.0  ;;  %v318_v39 = vmax.f32 %v286_v27, 0.0  ;;  %v319_v40 = vmax.f32 %v287_v28, 0.0  ;;  %v320_v41 = vmax.f32 %v288_v29, 0.0 }
  0x17   : > { %346 = vst.msk [vmem:[%s609_s25] sm:$0xff] %vm345_vm0, %v313_v32  ;;  %347 = vst.msk [vmem:[%s609_s25 + $0x8] sm:$0xff] %vm345_vm0, %v314_v33  ;;  %v466_v42 = vunpack.c.l.bf16 %v515_v30  ;;  %v467_v43 = vunpack.c.h.bf16 %v515_v30  ;;  %v470_v44 = vunpack.c.l.bf16 %v516_v31  ;;  %v471_v45 = vunpack.c.h.bf16 %v516_v31 }
  0x18   : > { %348 = vst.msk [vmem:[%s609_s25 + $0x10] sm:$0xff] %vm345_vm0, %v315_v34  ;;  %349 = vst.msk [vmem:[%s609_s25 + $0x18] sm:$0xff] %vm345_vm0, %v316_v35  ;;  %v474_v46 = vunpack.c.l.bf16 %v517_v36  ;;  %v475_v47 = vunpack.c.h.bf16 %v517_v36  ;;  %v478_v48 = vunpack.c.l.bf16 %v518_v37  ;;  %v479_v49 = vunpack.c.h.bf16 %v518_v37 }
  0x19   : > { %350 = vst.msk [vmem:[%s609_s25 + $0x20] sm:$0xff] %vm345_vm0, %v317_v38  ;;  %351 = vst.msk [vmem:[%s609_s25 + $0x28] sm:$0xff] %vm345_vm0, %v318_v39  ;;  %v250_v50 = vmul.f32 %v466_v42, %v582_v0  ;;  %v251_v51 = vmul.f32 %v467_v43, %v582_v0  ;;  %v252_v52 = vmul.f32 %v470_v44, %v582_v0  ;;  %v482_v16 = vunpack.c.l.bf16 %v519_v3 }
  0x1a   : > { %352 = vst.msk [vmem:[%s609_s25 + $0x30] sm:$0xff] %vm345_vm0, %v319_v40  ;;  %353 = vst.msk [vmem:[%s609_s25 + $0x38] sm:$0xff] %vm345_vm0, %v320_v41  ;;  %v253_v53 = vmul.f32 %v471_v45, %v582_v0  ;;  %v254_v54 = vmul.f32 %v474_v46, %v582_v0  ;;  %v255_v55 = vmul.f32 %v475_v47, %v582_v0  ;;  %v483_v17 = vunpack.c.h.bf16 %v519_v3  ;;  %v523_v40 = vld [vmem:[%s577_s17 + $0x60] sm:$0xff]   ;;  %v524_v41 = vld [vmem:[%s577_s17 + $0x68] sm:$0xff]  }
  0x1b   : > { %v256_v56 = vmul.f32 %v478_v48, %v582_v0  ;;  %v257_v57 = vmul.f32 %v479_v49, %v582_v0  ;;  %v289_v58 = vadd.f32 %v591_v9, %v250_v50  ;;  %v290_v59 = vadd.f32 %v591_v9, %v251_v51  ;;  %v525_v46 = vld [vmem:[%s577_s17 + $0x70] sm:$0xff]   ;;  %v526_v47 = vld [vmem:[%s577_s17 + $0x78] sm:$0xff]  }
  0x1c   : > { %v291_v60 = vadd.f32 %v591_v9, %v252_v52  ;;  %v292_v61 = vadd.f32 %v591_v9, %v253_v53  ;;  %v293_v62 = vadd.f32 %v591_v9, %v254_v54  ;;  %v294_v63 = vadd.f32 %v591_v9, %v255_v55 }
  0x1d   : > { %v295_v1 = vadd.f32 %v591_v9, %v256_v56  ;;  %v296_v2 = vadd.f32 %v591_v9, %v257_v57  ;;  %v321_v5 = vmax.f32 %v289_v58, 0.0  ;;  %v322_v6 = vmax.f32 %v290_v59, 0.0 }
  0x1e   : > { %v323_v7 = vmax.f32 %v291_v60, 0.0  ;;  %v324_v8 = vmax.f32 %v292_v61, 0.0  ;;  %v325_v12 = vmax.f32 %v293_v62, 0.0  ;;  %v326_v13 = vmax.f32 %v294_v63, 0.0 }
  0x1f   : > { %v327_v14 = vmax.f32 %v295_v1, 0.0  ;;  %v328_v15 = vmax.f32 %v296_v2, 0.0  ;;  %354 = vst.msk [vmem:[%s609_s25 + $0x40] sm:$0xff] %vm345_vm0, %v321_v5  ;;  %355 = vst.msk [vmem:[%s609_s25 + $0x48] sm:$0xff] %vm345_vm0, %v322_v6  ;;  %v486_v18 = vunpack.c.l.bf16 %v520_v4  ;;  %v487_v19 = vunpack.c.h.bf16 %v520_v4 }
  0x20   : > { %356 = vst.msk [vmem:[%s609_s25 + $0x50] sm:$0xff] %vm345_vm0, %v323_v7  ;;  %357 = vst.msk [vmem:[%s609_s25 + $0x58] sm:$0xff] %vm345_vm0, %v324_v8  ;;  %v490_v20 = vunpack.c.l.bf16 %v521_v10  ;;  %v491_v21 = vunpack.c.h.bf16 %v521_v10  ;;  %v494_v22 = vunpack.c.l.bf16 %v522_v11  ;;  %v495_v23 = vunpack.c.h.bf16 %v522_v11 }
  0x21   : > { %358 = vst.msk [vmem:[%s609_s25 + $0x60] sm:$0xff] %vm345_vm0, %v325_v12  ;;  %359 = vst.msk [vmem:[%s609_s25 + $0x68] sm:$0xff] %vm345_vm0, %v326_v13  ;;  %v258_v24 = vmul.f32 %v482_v16, %v582_v0  ;;  %v259_v25 = vmul.f32 %v483_v17, %v582_v0  ;;  %v260_v26 = vmul.f32 %v486_v18, %v582_v0  ;;  %v498_v52 = vunpack.c.l.bf16 %v523_v40 }
  0x22   : > { %360 = vst.msk [vmem:[%s609_s25 + $0x70] sm:$0xff] %vm345_vm0, %v327_v14  ;;  %361 = vst.msk [vmem:[%s609_s25 + $0x78] sm:$0xff] %vm345_vm0, %v328_v15  ;;  %v261_v27 = vmul.f32 %v487_v19, %v582_v0  ;;  %v262_v28 = vmul.f32 %v490_v20, %v582_v0  ;;  %v263_v29 = vmul.f32 %v491_v21, %v582_v0  ;;  %v499_v53 = vunpack.c.h.bf16 %v523_v40 }
  0x23   : > { %v264_v30 = vmul.f32 %v494_v22, %v582_v0  ;;  %v265_v31 = vmul.f32 %v495_v23, %v582_v0  ;;  %v297_v32 = vadd.f32 %v591_v9, %v258_v24  ;;  %v298_v33 = vadd.f32 %v591_v9, %v259_v25 }
  0x24   : > { %v299_v34 = vadd.f32 %v591_v9, %v260_v26  ;;  %v300_v35 = vadd.f32 %v591_v9, %v261_v27  ;;  %v301_v36 = vadd.f32 %v591_v9, %v262_v28  ;;  %v302_v37 = vadd.f32 %v591_v9, %v263_v29 }
  0x25   : > { %v303_v38 = vadd.f32 %v591_v9, %v264_v30  ;;  %v304_v39 = vadd.f32 %v591_v9, %v265_v31  ;;  %v329_v42 = vmax.f32 %v297_v32, 0.0  ;;  %v330_v43 = vmax.f32 %v298_v33, 0.0 }
  0x26   : > { %v331_v44 = vmax.f32 %v299_v34, 0.0  ;;  %v332_v45 = vmax.f32 %v300_v35, 0.0  ;;  %v333_v48 = vmax.f32 %v301_v36, 0.0  ;;  %v334_v49 = vmax.f32 %v302_v37, 0.0 }
  0x27   : > { %v335_v50 = vmax.f32 %v303_v38, 0.0  ;;  %v336_v51 = vmax.f32 %v304_v39, 0.0  ;;  %362 = vst.msk [vmem:[%s609_s25 + $0x80] sm:$0xff] %vm345_vm0, %v329_v42  ;;  %363 = vst.msk [vmem:[%s609_s25 + $0x88] sm:$0xff] %vm345_vm0, %v330_v43  ;;  %v502_v54 = vunpack.c.l.bf16 %v524_v41  ;;  %v503_v55 = vunpack.c.h.bf16 %v524_v41 }
  0x28   : > { %364 = vst.msk [vmem:[%s609_s25 + $0x90] sm:$0xff] %vm345_vm0, %v331_v44  ;;  %365 = vst.msk [vmem:[%s609_s25 + $0x98] sm:$0xff] %vm345_vm0, %v332_v45  ;;  %v506_v56 = vunpack.c.l.bf16 %v525_v46  ;;  %v507_v57 = vunpack.c.h.bf16 %v525_v46  ;;  %v510_v58 = vunpack.c.l.bf16 %v526_v47  ;;  %v511_v59 = vunpack.c.h.bf16 %v526_v47 }
  0x29   : > { %366 = vst.msk [vmem:[%s609_s25 + $0xa0] sm:$0xff] %vm345_vm0, %v333_v48  ;;  %367 = vst.msk [vmem:[%s609_s25 + $0xa8] sm:$0xff] %vm345_vm0, %v334_v49  ;;  %v266_v60 = vmul.f32 %v498_v52, %v582_v0  ;;  %v267_v61 = vmul.f32 %v499_v53, %v582_v0  ;;  %v268_v62 = vmul.f32 %v502_v54, %v582_v0 }
  0x2a   : > { %368 = vst.msk [vmem:[%s609_s25 + $0xb0] sm:$0xff] %vm345_vm0, %v335_v50  ;;  %369 = vst.msk [vmem:[%s609_s25 + $0xb8] sm:$0xff] %vm345_vm0, %v336_v51  ;;  %v269_v63 = vmul.f32 %v503_v55, %v582_v0  ;;  %v270_v1 = vmul.f32 %v506_v56, %v582_v0  ;;  %v271_v2 = vmul.f32 %v507_v57, %v582_v0 }
  0x2b   : > { %v272_v3 = vmul.f32 %v510_v58, %v582_v0  ;;  %v273_v4 = vmul.f32 %v511_v59, %v582_v0  ;;  %v305_v5 = vadd.f32 %v591_v9, %v266_v60  ;;  %v306_v6 = vadd.f32 %v591_v9, %v267_v61 }
  0x2c   : > { %v307_v7 = vadd.f32 %v591_v9, %v268_v62  ;;  %v308_v8 = vadd.f32 %v591_v9, %v269_v63  ;;  %v309_v10 = vadd.f32 %v591_v9, %v270_v1  ;;  %v310_v11 = vadd.f32 %v591_v9, %v271_v2 }
  0x2d   : > { %v311_v0 = vadd.f32 %v591_v9, %v272_v3  ;;  %v312_v12 = vadd.f32 %v591_v9, %v273_v4  ;;  %v337_v13 = vmax.f32 %v305_v5, 0.0  ;;  %v338_v14 = vmax.f32 %v306_v6, 0.0 }
  0x2e   : > { %v339_v15 = vmax.f32 %v307_v7, 0.0  ;;  %v340_v16 = vmax.f32 %v308_v8, 0.0  ;;  %v341_v17 = vmax.f32 %v309_v10, 0.0  ;;  %v342_v18 = vmax.f32 %v310_v11, 0.0 }
  0x2f   : > { %v343_v19 = vmax.f32 %v311_v0, 0.0  ;;  %v344_v20 = vmax.f32 %v312_v12, 0.0  ;;  %370 = vst.msk [vmem:[%s609_s25 + $0xc0] sm:$0xff] %vm345_vm0, %v337_v13  ;;  %371 = vst.msk [vmem:[%s609_s25 + $0xc8] sm:$0xff] %vm345_vm0, %v338_v14 }
  0x30   : > { %372 = vst.msk [vmem:[%s609_s25 + $0xd0] sm:$0xff] %vm345_vm0, %v339_v15  ;;  %373 = vst.msk [vmem:[%s609_s25 + $0xd8] sm:$0xff] %vm345_vm0, %v340_v16 }
  0x31   : > { %374 = vst.msk [vmem:[%s609_s25 + $0xe0] sm:$0xff] %vm345_vm0, %v341_v17  ;;  %375 = vst.msk [vmem:[%s609_s25 + $0xe8] sm:$0xff] %vm345_vm0, %v342_v18 }
  0x32   : > { %376 = vst.msk [vmem:[%s609_s25 + $0xf0] sm:$0xff] %vm345_vm0, %v343_v19  ;;  %377 = vst.msk [vmem:[%s609_s25 + $0xf8] sm:$0xff] %vm345_vm0, %v344_v20 }
  0x33 PF: > { %s13_s12 = sadd.s32 1, %s541_s12  }
  0x34   : > { %p10_p4 = scmp.ge.s32.totalorder %s13_s12, 4  }
  0x36   :  { %12 = sbr.rel (!%p10_p4) target bundleno = 1 (0x1), region = 62 }

// kernel: double_conv_pallas.4
= control target key start
LH: loop header
LB: loop body
LE: loop exit
PB: predicated region body
PF: predicated region fallthrough
CT: control target
= control target key end

     0   :  { %s2441_s18 = smov 0   ;;  %s3328_s0 = inlined_call_operand.vmem [shape: bf16[2,16,16,8], index: 0, kind: input, shape index: {}]   ;;  %s3329_s1 = inlined_call_operand.vmem [shape: f32[1,8], index: 1, kind: input, shape index: {}]   ;;  %s3330_s2 = inlined_call_operand.vmem [shape: f32[1,8], index: 2, kind: input, shape index: {}]   ;;  %s3331_s3 = inlined_call_operand.vmem [shape: bf16[72,8], index: 3, kind: input, shape index: {}]   ;;  %s3332_s4 = inlined_call_operand.vmem [shape: bf16[2,16,16,8], index: 4, kind: output, shape index: {0}]   ;;  %s3333_s5 = inlined_call_operand.vmem [shape: f32[2,2,8], index: 5, kind: output, shape index: {1}]  }
   0x1 LB: > { %s2115_s19 = sadd.s32 4294967295, %s2400_s18   ;;  %p2119_p0 = scmp.ge.s32.totalorder %s2400_s18, 1  ;;  %s2400_s18 = sphi %s2441_s18, %s16_s18  }
   0x2   : > { %p190_p1 = scmp.lt.s32.totalorder %s2400_s18, 3 }
   0x4   : > { %p191_p2 = pnand %p2119_p0, %p190_p1 }
   0x5   : > { %p222_p3 = scmp.lt.s32.totalorder (!%p191_p2), %s2115_s19, 1  ;;  %s2403_s26 = smov (!%p191_p2), 16  }
   0x6   : > { %194 = sbr.rel (%p191_p2) target bundleno = 627 (0x273), region = 36  ;;  %s2404_s29 = smov (!%p191_p2), 8  }
   0x7   : > { %s2405_s30 = smov (!%p191_p2), 24   ;;  %s2406_s6 = smov (!%p191_p2), 48  }
   0x8   : > { %s2407_s7 = smov (!%p191_p2), 40   ;;  %s2408_s8 = smov (!%p191_p2), 64  }
   0x9   : > { %s2409_s9 = smov (!%p191_p2), 32   ;;  %s2410_s10 = smov (!%p191_p2), 56  }
   0xb   : > { %vm580_vm0 = vcmask 1040384   ;;  %vm581_vm1 = vsmask.f32 256  ;;  %v2402_v0 = vmov 0   ;;  %vm874_vm3 = vcmask 1046528   ;;  %s3337_s19 = smov (!%p222_p3, %s2115_s19), 1 }
   0xc   : > { %v430_v1 = vrot.slane %v2402_v0, 7  ;;  %vm2450_vm2 = vmand %vm580_vm0, %vm581_vm1  ;;  %s2182_s20 = sshll.u32 %s3337_s19, 7  ;;  %v2469_v10 = vld [vmem:[%s3329_s1] ss:$0 sm:$0xff]  ;;  %vm617_vm4 = vsmask.f32 7424 }
   0xd   : > { %s2479_s25 = scalar_lea.vmem %s3328_s0, %s2182_s20  ;;  %v2489_v21 = vld [vmem:[%s3330_s2] ss:$0 sm:$0xff]  ;;  %vm1497_vm5 = vcmask 1043456   ;;  %vm1164_vm6 = vcmask 64512   ;;  %vm1197_vm7 = vcmask 130048   ;;  %vm1230_vm8 = vcmask 195584  }
   0xe   : > { %v2456_v3 = vsel %vm2450_vm2, 0, %v430_v1  ;;  %v600_v4 = vsel %vm2450_vm2, %v430_v1, 0  ;;  %v2280_v14 = vld [vmem:[%s2479_s25 + $0x8] sm:$0xff]   ;;  %v2217_v15 = vld [vmem:[%s2479_s25] sm:$0xff]   ;;  %v2281_v16 = vld [vmem:[%s2479_s25 + $0x10] sm:$0xff]   ;;  %vm1263_vm9 = vcmask 261120  }
   0xf   : > { %v875_v5 = vrot.slane %v2456_v3, 1  ;;  %v876_v6 = vrot.slane %v600_v4, 1  ;;  %v619_v7 = vshrl.u32 %v2456_v3, 16  ;;  %v621_v8 = vshll.u32 %v2456_v3, 16  ;;  %v2282_v25 = vld [vmem:[%s2479_s25 + $0x18] sm:$0xff]   ;;  %v2283_v63 = vld [vmem:[%s2479_s25 + $0x20] sm:$0xff]  }
  0x10   : > { %v626_v9 = vshll.u32 %v600_v4, 16  ;;  %v2222_v18 = vunpack.c.l.bf16 %v2280_v14  ;;  %v2223_v19 = vunpack.c.h.bf16 %v2280_v14  ;;  %v2218_v20 = vunpack.c.l.bf16 %v2217_v15 }
  0x11   : > { %v2472_v11 = vsel %vm874_vm3, %v875_v5, %v876_v6  ;;  %v623_v12 = vrot.slane %v621_v8, 1  ;;  %v2219_v22 = vunpack.c.h.bf16 %v2217_v15  ;;  %v2226_v23 = vunpack.c.l.bf16 %v2281_v16 }
  0x12   : > { %923 = vrot.lane.b32.xlu1 %v2472_v11, %s2403_s26  ;;  %v628_v13 = vrot.slane %v626_v9, 1  ;;  %v2227_v24 = vunpack.c.h.bf16 %v2281_v16  ;;  %v310_v27 = vmul.f32 %v2222_v18, %v2469_v10  ;;  %v311_v28 = vmul.f32 %v2223_v19, %v2469_v10 }
  0x13   : > { %v624_v17 = vor.u32 %v623_v12, %v619_v7  ;;  %v308_v29 = vmul.f32 %v2218_v20, %v2469_v10  ;;  %v309_v30 = vmul.f32 %v2219_v22, %v2469_v10  ;;  %v312_v31 = vmul.f32 %v2226_v23, %v2469_v10 }
  0x14   : > { %v313_v32 = vmul.f32 %v2227_v24, %v2469_v10  ;;  %v349_v33 = vadd.f32 %v2489_v21, %v310_v27  ;;  %v350_v34 = vadd.f32 %v2489_v21, %v311_v28  ;;  %v2230_v36 = vunpack.c.l.bf16 %v2282_v25 }
  0x15   : > { %v2493_v26 = vsel %vm617_vm4, %v624_v17, %v628_v13  ;;  %v347_v35 = vadd.f32 %v2489_v21, %v308_v29  ;;  %v348_v37 = vadd.f32 %v2489_v21, %v309_v30  ;;  %v351_v38 = vadd.f32 %v2489_v21, %v312_v31 }
  0x16   : > { %810 = vrot.lane.b32.xlu0 %v2493_v26, %s2404_s29  ;;  %v352_v39 = vadd.f32 %v2489_v21, %v313_v32  ;;  %v2231_v40 = vunpack.c.h.bf16 %v2282_v25  ;;  %v381_v41 = vmax.f32 %v349_v33, 0.0  ;;  %v382_v42 = vmax.f32 %v350_v34, 0.0 }
  0x17   : > { %v379_v43 = vmax.f32 %v347_v35, 0.0  ;;  %v380_v44 = vmax.f32 %v348_v37, 0.0  ;;  %v383_v45 = vmax.f32 %v351_v38, 0.0  ;;  %v314_v50 = vmul.f32 %v2230_v36, %v2469_v10 }
  0x18   : > { %v384_v46 = vmax.f32 %v352_v39, 0.0  ;;  %v412_v47 = vpack.c.bf16 %v382_v42, %v381_v41  ;;  %v315_v51 = vmul.f32 %v2231_v40, %v2469_v10  ;;  %v2234_v7 = vunpack.c.l.bf16 %v2283_v63 }
  0x19   : > { %v411_v48 = vpack.c.bf16 %v380_v44, %v379_v43  ;;  %v353_v61 = vadd.f32 %v2489_v21, %v314_v50  ;;  %v2235_v8 = vunpack.c.h.bf16 %v2283_v63  ;;  %vm1296_vm10 = vcmask 326656  }
  0x1a   : > { %v413_v49 = vpack.c.bf16 %v384_v46, %v383_v45  ;;  %v442_v52 = vshrl.u32 %v412_v47, 16  ;;  %v445_v53 = vshll.u32 %v412_v47, 16  ;;  %v354_v62 = vadd.f32 %v2489_v21, %v315_v51 }
  0x1b   : > { %v435_v54 = vshrl.u32 %v411_v48, 16  ;;  %v438_v55 = vshll.u32 %v411_v48, 16  ;;  %v385_v13 = vmax.f32 %v353_v61, 0.0  ;;  %v316_v20 = vmul.f32 %v2234_v7, %v2469_v10 }
  0x1c   : > { %v449_v56 = vshrl.u32 %v413_v49, 16  ;;  %v452_v57 = vshll.u32 %v413_v49, 16  ;;  %v444_v58 = vrot.slane %v442_v52, 7  ;;  %v386_v14 = vmax.f32 %v354_v62, 0.0 }
  0x1d   : > { %v437_v59 = vrot.slane %v435_v54, 7  ;;  %v317_v22 = vmul.f32 %v2235_v8, %v2469_v10  ;;  %v355_v38 = vadd.f32 %v2489_v21, %v316_v20  ;;  %vm1329_vm11 = vcmask 392192  }
  0x1e   : > { %v451_v60 = vrot.slane %v449_v56, 7  ;;  %v447_v0 = vor.u32 %v445_v53, %v444_v58  ;;  %v602_v12 = vsel %vm2450_vm2, %v444_v58, 0  ;;  %v414_v27 = vpack.c.bf16 %v386_v14, %v385_v13  ;;  %v2284_v58 = vld [vmem:[%s2479_s25 + $0x28] sm:$0xff]  }
  0x1f   : > { %v440_v1 = vor.u32 %v438_v55, %v437_v59  ;;  %v601_v5 = vsel %vm2450_vm2, %v437_v59, 0  ;;  %v882_v24 = vrot.slane %v602_v12, 1  ;;  %v650_v25 = vshll.u32 %v602_v12, 16 }
  0x20   : > { %v454_v4 = vor.u32 %v452_v57, %v451_v60  ;;  %v2518_v6 = vsel %vm2450_vm2, 0, %v447_v0  ;;  %v879_v17 = vrot.slane %v601_v5, 1  ;;  %v638_v34 = vshll.u32 %v601_v5, 16 }
  0x21   : > { %958 = vrot.lane.b32.xlu1 %v2518_v6, %s2405_s30  ;;  %v2524_v9 = vsel %vm2450_vm2, 0, %v440_v1  ;;  %v645_v18 = vshll.u32 %v2518_v6, 16  ;;  %v881_v23 = vrot.slane %v2518_v6, 1  ;;  %v643_v29 = vshrl.u32 %v2518_v6, 16 }
  0x22   : > { %956 = vrot.lane.b32.xlu0 %v2524_v9, %s2405_s30  ;;  %v2532_v15 = vsel %vm2450_vm2, 0, %v454_v4  ;;  %v878_v16 = vrot.slane %v2524_v9, 1  ;;  %v633_v19 = vshll.u32 %v2524_v9, 16  ;;  %v631_v32 = vshrl.u32 %v2524_v9, 16 }
  0x23   : > { %v647_v30 = vrot.slane %v645_v18, 1  ;;  %v657_v31 = vshll.u32 %v2532_v15, 16  ;;  %v603_v35 = vsel %vm2450_vm2, %v451_v60, 0  ;;  %v883_v36 = vsel %vm874_vm3, %v881_v23, %v882_v24  ;;  %v2285_v23 = vld [vmem:[%s2479_s25 + $0x30] sm:$0xff]  }
  0x24   : > { %v880_v28 = vsel %vm874_vm3, %v878_v16, %v879_v17  ;;  %v635_v33 = vrot.slane %v633_v19, 1  ;;  %v652_v37 = vrot.slane %v650_v25, 1  ;;  %v655_v40 = vshrl.u32 %v2532_v15, 16 }
  0x25   : > { %1070 = vrot.lane.b32.xlu1 %v2532_v15, %s2406_s6  ;;  %v648_v39 = vor.u32 %v647_v30, %v643_v29  ;;  %v659_v41 = vrot.slane %v657_v31, 1  ;;  %v662_v42 = vshll.u32 %v603_v35, 16  ;;  %v640_v44 = vrot.slane %v638_v34, 1 }
  0x26   : > { %1068 = vrot.lane.b32.xlu0 %v2518_v6, %s2406_s6  ;;  %v636_v43 = vor.u32 %v635_v33, %v631_v32  ;;  %v456_v45 = vshrl.u32 %v414_v27, 16  ;;  %v356_v46 = vadd.f32 %v2489_v21, %v317_v22  ;;  %v459_v50 = vshll.u32 %v414_v27, 16  ;;  %v2387_v22 = vld [vmem:[%s3331_s3 + $0x20] ss:$0 sps:$4 sm:$0xff]  }
  0x27   : > { %v653_v47 = vsel %vm617_vm4, %v648_v39, %v652_v37  ;;  %v660_v48 = vor.u32 %v659_v41, %v655_v40  ;;  %v664_v49 = vrot.slane %v662_v42, 1  ;;  %v387_v53 = vmax.f32 %v355_v38, 0.0  ;;  %2368 = vmatprep.subr.msk.bf16.mxu0 %vm1497_vm5, %v2387_v22  ;;  %2369 = vmatprep.subr.msk.bf16.mxu1 %vm1497_vm5, %v2387_v22  ;;  %v2389_v38 = vld [vmem:[%s3331_s3 + $0x10] sm:$0xff]  }
  0x28   : > { %v641_v51 = vsel %vm617_vm4, %v636_v43, %v640_v44  ;;  %v458_v52 = vrot.slane %v456_v45, 7  ;;  %v388_v54 = vmax.f32 %v356_v46, 0.0  ;;  %v884_v59 = vrot.slane %v2532_v15, 1 }
  0x29   : > { %925 = vrot.lane.b32.xlu1 %v880_v28, %s2403_s26  ;;  %v665_v55 = vsel %vm617_vm4, %v660_v48, %v664_v49  ;;  %v885_v60 = vrot.slane %v603_v35, 1  ;;  %v2238_v61 = vunpack.c.l.bf16 %v2284_v58  ;;  %v2239_v0 = vunpack.c.h.bf16 %v2284_v58 }
  0x2a   : > { %1036 = vrot.lane.b32.xlu0 %v880_v28, %s2407_s7  ;;  %v461_v56 = vor.u32 %v459_v50, %v458_v52  ;;  %v415_v57 = vpack.c.bf16 %v388_v54, %v387_v53  ;;  %v604_v7 = vsel %vm2450_vm2, %v458_v52, 0  ;;  %v2388_v28 = vld [vmem:[%s3331_s3 + $0x18] sm:$0xff]   ;;  %v2242_v31 = vunpack.c.l.bf16 %v2285_v23  ;;  %v2391_v53 = vld [vmem:[%s3331_s3] sm:$0xff]  }
  0x2b   : > { %v886_v1 = vsel %vm874_vm3, %v884_v59, %v885_v60  ;;  %v318_v5 = vmul.f32 %v2238_v61, %v2469_v10  ;;  %v319_v13 = vmul.f32 %v2239_v0, %v2469_v10  ;;  %v674_v17 = vshll.u32 %v604_v7, 16  ;;  %v2286_v61 = vld [vmem:[%s2479_s25 + $0x38] sm:$0xff]  }
  0x2c   : > { %v2569_v62 = vsel %vm2450_vm2, 0, %v461_v56  ;;  %v463_v63 = vshrl.u32 %v415_v57, 16  ;;  %v466_v12 = vshll.u32 %v415_v57, 16  ;;  %v2243_v32 = vunpack.c.h.bf16 %v2285_v23 }
  0x2d   : > { %1038 = vrot.lane.b32.xlu1 %v883_v36, %s2407_s7  ;;  %v669_v4 = vshll.u32 %v2569_v62, 16  ;;  %v667_v14 = vshrl.u32 %v2569_v62, 16  ;;  %v357_v18 = vadd.f32 %v2489_v21, %v318_v5  ;;  %v358_v20 = vadd.f32 %v2489_v21, %v319_v13 }
  0x2e   : > { %1132 = vrot.lane.b32.xlu0 %v883_v36, %s2408_s8  ;;  %v465_v8 = vrot.slane %v463_v63, 7  ;;  %v676_v25 = vrot.slane %v674_v17, 1  ;;  %v1499_v33 = vsel %vm1497_vm5, %v2387_v22, 0  ;;  %v887_v35 = vrot.slane %v2569_v62, 1 }
  0x2f   : > { %v671_v16 = vrot.slane %v669_v4, 1  ;;  %v389_v27 = vmax.f32 %v357_v18, 0.0  ;;  %v390_v30 = vmax.f32 %v358_v20, 0.0  ;;  %2317 = vmatpush3.bf16.msra.mxu0 %v1499_v33  ;;  %v320_v41 = vmul.f32 %v2242_v31, %v2469_v10  ;;  %2363 = vmatpush3.bf16.msra.mxu1 %v1499_v33 }
  0x30   : > { %v468_v19 = vor.u32 %v466_v12, %v465_v8  ;;  %2318 = vmatprep.subr.bf16.mxu0 %v2388_v28  ;;  %v605_v39 = vsel %vm2450_vm2, %v465_v8, 0  ;;  %v321_v42 = vmul.f32 %v2243_v32, %v2469_v10  ;;  %2359 = vmatprep.subr.bf16.mxu1 %v2388_v28  ;;  %v2246_v63 = vunpack.c.l.bf16 %v2286_v61 }
  0x31   : > { %1002 = vrot.lane.b32.xlu1 %v653_v47, %s2409_s9  ;;  %v672_v24 = vor.u32 %v671_v16, %v667_v14  ;;  %v416_v40 = vpack.c.bf16 %v390_v30, %v389_v27  ;;  %v686_v46 = vshll.u32 %v605_v39, 16  ;;  %v359_v49 = vadd.f32 %v2489_v21, %v320_v41  ;;  %v2287_v27 = vld [vmem:[%s2479_s25 + $0x40] sm:$0xff]  }
  0x32   : > { %812 = vrot.lane.b32.xlu0 %v641_v51, %s2404_s29  ;;  %v2595_v29 = vsel %vm2450_vm2, 0, %v468_v19  ;;  %v360_v50 = vadd.f32 %v2489_v21, %v321_v42  ;;  %v2247_v0 = vunpack.c.h.bf16 %v2286_v61  ;;  %v891_v4 = vrot.slane %v605_v39, 1 }
  0x33   : > { %v677_v34 = vsel %vm617_vm4, %v672_v24, %v676_v25  ;;  %v681_v37 = vshll.u32 %v2595_v29, 16  ;;  %2319 = vmatpush3.bf16.msra.mxu0 %v2388_v28  ;;  %v679_v44 = vshrl.u32 %v2595_v29, 16  ;;  %v470_v48 = vshrl.u32 %v416_v40, 16  ;;  %2364 = vmatpush3.bf16.msra.mxu1 %v2388_v28 }
  0x34   : > { %2320 = vmatprep.subr.bf16.mxu0 %v2389_v38  ;;  %2360 = vmatprep.subr.bf16.mxu1 %v2389_v38  ;;  %v688_v52 = vrot.slane %v686_v46, 1  ;;  %v391_v56 = vmax.f32 %v359_v49, 0.0  ;;  %v392_v57 = vmax.f32 %v360_v50, 0.0  ;;  %v322_v12 = vmul.f32 %v2246_v63, %v2469_v10 }
  0x35   : > { %1102 = vrot.lane.b32.xlu1 %v665_v55, %s2410_s10  ;;  %v683_v45 = vrot.slane %v681_v37, 1  ;;  %v472_v54 = vrot.slane %v470_v48, 7  ;;  %v323_v13 = vmul.f32 %v2247_v0, %v2469_v10  ;;  %v2250_v31 = vunpack.c.l.bf16 %v2287_v27 }
  0x36   : > { %1000 = vrot.lane.b32.xlu0 %v641_v51, %s2409_s9  ;;  %v417_v60 = vpack.c.bf16 %v392_v57, %v391_v56  ;;  %v361_v24 = vadd.f32 %v2489_v21, %v322_v12  ;;  %vm1395_vm12 = vcmask 523264   ;;  %vm1362_vm13 = vcmask 457728  }
  0x37   : > { %2321 = vmatpush3.bf16.msra.mxu0 %v2389_v38  ;;  %v684_v51 = vor.u32 %v683_v45, %v679_v44  ;;  %2365 = vmatpush3.bf16.msra.mxu1 %v2389_v38  ;;  %v606_v16 = vsel %vm2450_vm2, %v472_v54, 0  ;;  %v362_v25 = vadd.f32 %v2489_v21, %v323_v13  ;;  %v324_v42 = vmul.f32 %v2250_v31, %v2469_v10 }
  0x38   : > { %v480_v18 = vshll.u32 %v417_v60, 16  ;;  %v698_v22 = vshll.u32 %v606_v16, 16  ;;  %v393_v33 = vmax.f32 %v361_v24, 0.0  ;;  %v894_v38 = vrot.slane %v606_v16, 1 }
  0x39   : > { %814 = vrot.lane.b32.xlu1 %v653_v47, %s2404_s29  ;;  %v689_v58 = vsel %vm617_vm4, %v684_v51, %v688_v52  ;;  %v363_v49 = vadd.f32 %v2489_v21, %v324_v42  ;;  %vm1464_vm14 = vcmask 588800   ;;  %vm1790_vm15 = vcmask 60416  }
  0x3a   : > { %1100 = vrot.lane.b32.xlu0 %v653_v47, %s2410_s10  ;;  %v2390_v47 = vld [vmem:[%s3331_s3 + $0x8] sm:$0xff]   ;;  %v700_v30 = vrot.slane %v698_v22, 1  ;;  %vm2027_vm1 = vcmask 58368  }
  0x3b   : > { %2322 = vmatprep.subr.bf16.mxu0 %v2390_v47  ;;  %2361 = vmatprep.subr.bf16.mxu1 %v2390_v47 }
  0x3c   : > { %2323 = vmatpush3.bf16.msra.mxu0 %v2390_v47  ;;  %2366 = vmatpush3.bf16.msra.mxu1 %v2390_v47 }
  0x3d   : > { %816 = vrot.lane.b32.xlu1 %v665_v55, %s2404_s29  ;;  %2324 = vmatprep.subr.bf16.mxu0 %v2391_v53 }
  0x3e   : > { %1134 = vrot.lane.b32.xlu0 %v886_v1, %s2408_s8  ;;  %2362 = vmatprep.subr.bf16.mxu1 %v2391_v53 }
  0x40   : > { %2325 = vmatpush3.bf16.msra.mxu0 %v2391_v53  ;;  %2367 = vmatpush3.bf16.msra.mxu1 %v2391_v53 }
  0x41   : > { %929 = vrot.lane.b32.xlu1 %v886_v1, %s2403_s26 }
  0x42   : > { %927 = vrot.lane.b32.xlu0 %v883_v36, %s2403_s26  ;;  %v888_v36 = vrot.slane %v604_v7, 1  ;;  %v477_v7 = vshrl.u32 %v417_v60, 16  ;;  %v2288_v60 = vld [vmem:[%s2479_s25 + $0x48] sm:$0xff]  }
  0x43   : > { %v2254_v63 = vunpack.c.l.bf16 %v2288_v60 }
  0x44   : > { %v889_v43 = vsel %vm874_vm3, %v887_v35, %v888_v36  ;;  %v479_v17 = vrot.slane %v477_v7, 7  ;;  %v2251_v35 = vunpack.c.h.bf16 %v2287_v27  ;;  %v2255_v7 = vunpack.c.h.bf16 %v2288_v60  ;;  %v2289_v27 = vld [vmem:[%s2479_s25 + $0x50] sm:$0xff]  }
  0x45   : > { %962 = vrot.lane.b32.xlu1 %v2569_v62, %s2405_s30  ;;  %v326_v13 = vmul.f32 %v2254_v63, %v2469_v10 }
  0x46   : > { %960 = vrot.lane.b32.xlu0 %v2532_v15, %s2405_s30  ;;  %v482_v23 = vor.u32 %v480_v18, %v479_v17  ;;  %v327_v18 = vmul.f32 %v2255_v7, %v2469_v10 }
  0x48   : > { %v2656_v32 = vsel %vm2450_vm2, 0, %v482_v23  ;;  %v365_v23 = vadd.f32 %v2489_v21, %v326_v13 }
  0x49   : > { %1006 = vrot.lane.b32.xlu1 %v677_v34, %s2409_s9  ;;  %v705_v39 = vshll.u32 %v2656_v32, 16  ;;  %v703_v45 = vshrl.u32 %v2656_v32, 16  ;;  %v896_v0 = vrot.slane %v2656_v32, 1 }
  0x4a   : > { %1004 = vrot.lane.b32.xlu0 %v665_v55, %s2409_s9  ;;  %v473_v55 = vshll.u32 %v416_v40, 16  ;;  %v607_v40 = vsel %vm2450_vm2, %v479_v17, 0  ;;  %v397_v31 = vmax.f32 %v365_v23, 0.0 }
  0x4b   : > { %v707_v46 = vrot.slane %v705_v39, 1  ;;  %v710_v47 = vshll.u32 %v607_v40, 16  ;;  %v897_v61 = vrot.slane %v607_v40, 1 }
  0x4c   : > { %v475_v59 = vor.u32 %v473_v55, %v472_v54  ;;  %v395_v55 = vmax.f32 %v363_v49, 0.0 }
  0x4d   : > { %1042 = vrot.lane.b32.xlu1 %v889_v43, %s2407_s7  ;;  %v708_v51 = vor.u32 %v707_v46, %v703_v45  ;;  %v712_v52 = vrot.slane %v710_v47, 1 }
  0x4e   : > { %1040 = vrot.lane.b32.xlu0 %v886_v1, %s2407_s7  ;;  %v890_v1 = vrot.slane %v2595_v29, 1  ;;  %v2636_v5 = vsel %vm2450_vm2, 0, %v475_v59 }
  0x4f   : > { %v693_v8 = vshll.u32 %v2636_v5, 16  ;;  %v691_v19 = vshrl.u32 %v2636_v5, 16  ;;  %v893_v37 = vrot.slane %v2636_v5, 1  ;;  %v713_v57 = vsel %vm617_vm4, %v708_v51, %v712_v52 }
  0x50   : > { %v892_v14 = vsel %vm874_vm3, %v890_v1, %v891_v4 }
  0x51   : > { %1074 = vrot.lane.b32.xlu1 %v2595_v29, %s2406_s6  ;;  %v695_v20 = vrot.slane %v693_v8, 1  ;;  %v895_v44 = vsel %vm874_vm3, %v893_v37, %v894_v38 }
  0x52   : > { %1072 = vrot.lane.b32.xlu0 %v2569_v62, %s2406_s6 }
  0x53   : > { %v696_v28 = vor.u32 %v695_v20, %v691_v19 }
  0x55   : > { %1106 = vrot.lane.b32.xlu1 %v689_v58, %s2410_s10  ;;  %v701_v36 = vsel %vm617_vm4, %v696_v28, %v700_v30 }
  0x56   : > { %1104 = vrot.lane.b32.xlu0 %v677_v34, %s2410_s10 }
  0x59   : > { %818 = vrot.lane.b32.xlu1 %v677_v34, %s2404_s29  ;;  %v394_v34 = vmax.f32 %v362_v25, 0.0  ;;  %v366_v25 = vadd.f32 %v2489_v21, %v327_v18 }
  0x5a   : > { %1136 = vrot.lane.b32.xlu0 %v889_v43, %s2408_s8 }
  0x5b   : > { %v418_v41 = vpack.c.bf16 %v394_v34, %v393_v33  ;;  %v398_v34 = vmax.f32 %v366_v25, 0.0 }
  0x5d   : > { %820 = vrot.lane.b32.xlu1 %v689_v58, %s2404_s29  ;;  %v484_v48 = vshrl.u32 %v418_v41, 16  ;;  %v487_v54 = vshll.u32 %v418_v41, 16  ;;  %v420_v42 = vpack.c.bf16 %v398_v34, %v397_v31 }
  0x5e   : > { %1138 = vrot.lane.b32.xlu0 %v892_v14, %s2408_s8 }
  0x5f   : > { %v486_v53 = vrot.slane %v484_v48, 7  ;;  %v498_v49 = vshrl.u32 %v420_v42, 16 }
  0x61   : > { %933 = vrot.lane.b32.xlu1 %v892_v14, %s2403_s26  ;;  %v608_v8 = vsel %vm2450_vm2, %v486_v53, 0 }
  0x62   : > { %931 = vrot.lane.b32.xlu0 %v889_v43, %s2403_s26  ;;  %v325_v43 = vmul.f32 %v2251_v35, %v2469_v10  ;;  %v722_v22 = vshll.u32 %v608_v8, 16  ;;  %v2258_v35 = vunpack.c.l.bf16 %v2289_v27  ;;  %v900_v39 = vrot.slane %v608_v8, 1 }
  0x64   : > { %v364_v50 = vadd.f32 %v2489_v21, %v325_v43  ;;  %v724_v30 = vrot.slane %v722_v22, 1  ;;  %v328_v43 = vmul.f32 %v2258_v35, %v2469_v10 }
  0x65   : > { %966 = vrot.lane.b32.xlu1 %v2636_v5, %s2405_s30 }
  0x66   : > { %964 = vrot.lane.b32.xlu0 %v2595_v29, %s2405_s30  ;;  %v396_v56 = vmax.f32 %v364_v50, 0.0  ;;  %v367_v50 = vadd.f32 %v2489_v21, %v328_v43 }
  0x68   : > { %v419_v59 = vpack.c.bf16 %v396_v56, %v395_v55  ;;  %v500_v56 = vrot.slane %v498_v49, 7 }
  0x69   : > { %1010 = vrot.lane.b32.xlu1 %v701_v36, %s2409_s9 }
  0x6a   : > { %1008 = vrot.lane.b32.xlu0 %v689_v58, %s2409_s9  ;;  %v489_v58 = vor.u32 %v487_v54, %v486_v53  ;;  %v491_v4 = vshrl.u32 %v419_v59, 16  ;;  %v494_v17 = vshll.u32 %v419_v59, 16  ;;  %v610_v25 = vsel %vm2450_vm2, %v500_v56, 0 }
  0x6c   : > { %v2688_v1 = vsel %vm2450_vm2, 0, %v489_v58  ;;  %v493_v16 = vrot.slane %v491_v4, 7  ;;  %v399_v58 = vmax.f32 %v367_v50, 0.0  ;;  %v2290_v4 = vld [vmem:[%s2479_s25 + $0x58] sm:$0xff]  }
  0x6d   : > { %1046 = vrot.lane.b32.xlu1 %v895_v44, %s2407_s7  ;;  %v717_v12 = vshll.u32 %v2688_v1, 16  ;;  %v715_v19 = vshrl.u32 %v2688_v1, 16  ;;  %v899_v38 = vrot.slane %v2688_v1, 1  ;;  %v2262_v13 = vunpack.c.l.bf16 %v2290_v4 }
  0x6e   : > { %1044 = vrot.lane.b32.xlu0 %v892_v14, %s2407_s7  ;;  %v898_v14 = vsel %vm874_vm3, %v896_v0, %v897_v61  ;;  %v496_v24 = vor.u32 %v494_v17, %v493_v16  ;;  %v609_v41 = vsel %vm2450_vm2, %v493_v16, 0  ;;  %v2263_v18 = vunpack.c.h.bf16 %v2290_v4 }
  0x6f   : > { %v719_v20 = vrot.slane %v717_v12, 1  ;;  %v901_v45 = vsel %vm874_vm3, %v899_v38, %v900_v39  ;;  %v734_v48 = vshll.u32 %v609_v41, 16  ;;  %v903_v12 = vrot.slane %v609_v41, 1 }
  0x70   : > { %v2708_v33 = vsel %vm2450_vm2, 0, %v496_v24  ;;  %v330_v23 = vmul.f32 %v2262_v13, %v2469_v10 }
  0x71   : > { %1078 = vrot.lane.b32.xlu1 %v2656_v32, %s2406_s6  ;;  %v720_v28 = vor.u32 %v719_v20, %v715_v19  ;;  %v729_v40 = vshll.u32 %v2708_v33, 16  ;;  %v727_v46 = vshrl.u32 %v2708_v33, 16  ;;  %v736_v55 = vrot.slane %v734_v48, 1 }
  0x72   : > { %1076 = vrot.lane.b32.xlu0 %v2636_v5, %s2406_s6  ;;  %v902_v8 = vrot.slane %v2708_v33, 1 }
  0x73   : > { %v725_v37 = vsel %vm617_vm4, %v720_v28, %v724_v30  ;;  %v731_v47 = vrot.slane %v729_v40, 1  ;;  %v331_v30 = vmul.f32 %v2263_v18, %v2469_v10  ;;  %v369_v40 = vadd.f32 %v2489_v21, %v330_v23 }
  0x74   : > { %v2758_v20 = vsel %vm874_vm3, %v902_v8, %v903_v12 }
  0x75   : > { %1110 = vrot.lane.b32.xlu1 %v713_v57, %s2410_s10  ;;  %v732_v54 = vor.u32 %v731_v47, %v727_v46  ;;  %v370_v41 = vadd.f32 %v2489_v21, %v331_v30  ;;  %v401_v49 = vmax.f32 %v369_v40, 0.0 }
  0x76   : > { %1108 = vrot.lane.b32.xlu0 %v701_v36, %s2410_s10 }
  0x77   : > { %v2736_v60 = vsel %vm617_vm4, %v732_v54, %v736_v55  ;;  %v402_v50 = vmax.f32 %v370_v41, 0.0 }
  0x79   : > { %822 = vrot.lane.b32.xlu1 %v701_v36, %s2404_s29  ;;  %v2259_v36 = vunpack.c.h.bf16 %v2289_v27  ;;  %v422_v12 = vpack.c.bf16 %v402_v50, %v401_v49 }
  0x7a   : > { %1140 = vrot.lane.b32.xlu0 %v895_v44, %s2408_s8 }
  0x7d   : > { %824 = vrot.lane.b32.xlu1 %v713_v57, %s2404_s29 }
  0x7e   : > { %1142 = vrot.lane.b32.xlu0 %v898_v14, %s2408_s8 }
  0x81   : > { %937 = vrot.lane.b32.xlu1 %v898_v14, %s2403_s26 }
  0x82   : > { %935 = vrot.lane.b32.xlu0 %v895_v44, %s2403_s26  ;;  %v329_v44 = vmul.f32 %v2259_v36, %v2469_v10  ;;  %v746_v36 = vshll.u32 %v610_v25, 16 }
  0x84   : > { %v368_v51 = vadd.f32 %v2489_v21, %v329_v44  ;;  %v2728_v52 = vpop.permute.xlu1 %923  ;;  %v748_v46 = vrot.slane %v746_v36, 1 }
  0x85   : > { %970 = vrot.lane.b32.xlu1 %v2688_v1, %s2405_s30 }
  0x86   : > { %968 = vrot.lane.b32.xlu0 %v2656_v32, %s2405_s30  ;;  %v400_v59 = vmax.f32 %v368_v51, 0.0 }
  0x88   : > { %v811_v53 = vpop.permute.xlu0 %810  ;;  %v421_v0 = vpack.c.bf16 %v400_v59, %v399_v58 }
  0x89   : > { %1014 = vrot.lane.b32.xlu1 %v725_v37, %s2409_s9  ;;  %v1166_v54 = vsel %vm1164_vm6, %v2456_v3, %v811_v53 }
  0x8a   : > { %1012 = vrot.lane.b32.xlu0 %v713_v57, %s2409_s9  ;;  %v501_v57 = vshll.u32 %v420_v42, 16  ;;  %v505_v17 = vshrl.u32 %v421_v0, 16  ;;  %v508_v28 = vshll.u32 %v421_v0, 16  ;;  %v1199_v0 = vsel %vm1197_vm7, %v1166_v54, %v2728_v52  ;;  %v2292_v54 = vld [vmem:[%s2479_s25 + $0x68] sm:$0xff]  }
  0x8c   : > { %v503_v63 = vor.u32 %v501_v57, %v500_v56  ;;  %v507_v27 = vrot.slane %v505_v17, 7  ;;  %v906_v57 = vrot.slane %v610_v25, 1 }
  0x8d   : > { %1050 = vrot.lane.b32.xlu1 %v901_v45, %s2407_s7 }
  0x8e   : > { %1048 = vrot.lane.b32.xlu0 %v898_v14, %s2407_s7  ;;  %v2751_v16 = vsel %vm2450_vm2, 0, %v503_v63  ;;  %v510_v39 = vor.u32 %v508_v28, %v507_v27  ;;  %v2796_v63 = vsel %vm2450_vm2, %v507_v27, 0 }
  0x8f   : > { %v741_v22 = vshll.u32 %v2751_v16, 16  ;;  %v739_v34 = vshrl.u32 %v2751_v16, 16  ;;  %v905_v56 = vrot.slane %v2751_v16, 1 }
  0x90   : > { %v2778_v48 = vsel %vm2450_vm2, 0, %v510_v39 }
  0x91   : > { %1082 = vrot.lane.b32.xlu1 %v2708_v33, %s2406_s6  ;;  %v743_v35 = vrot.slane %v741_v22, 1  ;;  %v2811_v52 = vsel %vm874_vm3, %v905_v56, %v906_v57  ;;  %v2271_v56 = vunpack.c.h.bf16 %v2292_v54 }
  0x92   : > { %1080 = vrot.lane.b32.xlu0 %v2688_v1, %s2406_s6 }
  0x93   : > { %v2738_v61 = vpop.permute.xlu1 %958  ;;  %v744_v44 = vor.u32 %v743_v35, %v739_v34  ;;  %v512_v34 = vshrl.u32 %v422_v12, 16 }
  0x94   : > { %v2741_v7 = vpop.permute.xlu0 %956 }
  0x95   : > { %1114 = vrot.lane.b32.xlu1 %v2736_v60, %s2410_s10  ;;  %v2792_v53 = vsel %vm617_vm4, %v744_v44, %v748_v46  ;;  %v1232_v17 = vsel %vm1230_vm8, %v1199_v0, %v2741_v7  ;;  %v751_v7 = vshrl.u32 %v2778_v48, 16  ;;  %v514_v41 = vrot.slane %v512_v34, 7 }
  0x96   : > { %1112 = vrot.lane.b32.xlu0 %v725_v37, %s2410_s10 }
  0x97   : > { %v2747_v14 = vpop.permute.xlu1 %1070 }
  0x98   : > { %v2753_v19 = vpop.permute.xlu0 %1068 }
  0x99   : > { %826 = vrot.lane.b32.xlu1 %v725_v37, %s2404_s29  ;;  %v2291_v37 = vld [vmem:[%s2479_s25 + $0x60] sm:$0xff]  }
  0x9a   : > { %1144 = vrot.lane.b32.xlu0 %v901_v45, %s2408_s8  ;;  %v2266_v43 = vunpack.c.l.bf16 %v2291_v37  ;;  %v2267_v51 = vunpack.c.h.bf16 %v2291_v37 }
  0x9b   : > { %v926_v24 = vpop.permute.xlu1 %925 }
  0x9c   : > { %v1037_v31 = vpop.permute.xlu0 %1036  ;;  %v332_v58 = vmul.f32 %v2266_v43, %v2469_v10  ;;  %v333_v13 = vmul.f32 %v2267_v51, %v2469_v10  ;;  %v515_v43 = vshll.u32 %v422_v12, 16 }
  0x9d   : > { %828 = vrot.lane.b32.xlu1 %v2736_v60, %s2404_s29 }
  0x9e   : > { %1146 = vrot.lane.b32.xlu0 %v2758_v20, %s2408_s8  ;;  %v371_v35 = vadd.f32 %v2489_v21, %v332_v58  ;;  %v372_v36 = vadd.f32 %v2489_v21, %v333_v13  ;;  %v517_v50 = vor.u32 %v515_v43, %v514_v41  ;;  %v908_v58 = vrot.slane %v2778_v48, 1 }
  0x9f   : > { %v1039_v38 = vpop.permute.xlu1 %1038 }
  0xa0   : > { %v1133_v42 = vpop.permute.xlu0 %1132  ;;  %v404_v44 = vmax.f32 %v372_v36, 0.0 }
  0xa1   : > { %941 = vrot.lane.b32.xlu1 %v2758_v20, %s2403_s26 }
  0xa2   : > { %939 = vrot.lane.b32.xlu0 %v901_v45, %s2403_s26 }
  0xa3   : > { %v1003_v47 = vpop.permute.xlu1 %1002 }
  0xa4   : > { %v813_v55 = vpop.permute.xlu0 %812 }
  0xa5   : > { %v1168_v45 = vsel %vm1164_vm6, %v2524_v9, %v813_v55  ;;  %974 = vrot.lane.b32.xlu1 %v2751_v16, %s2405_s30  ;;  %v753_v9 = vshll.u32 %v2778_v48, 16 }
  0xa6   : > { %v1201_v59 = vsel %vm1197_vm7, %v1168_v45, %v926_v24  ;;  %972 = vrot.lane.b32.xlu0 %v2708_v33, %s2405_s30  ;;  %v2270_v45 = vunpack.c.l.bf16 %v2292_v54 }
  0xa7   : > { %v1234_v4 = vsel %vm1230_vm8, %v1201_v59, %v2738_v61  ;;  %v1103_v8 = vpop.permute.xlu1 %1102  ;;  %v758_v61 = vshll.u32 %v2796_v63, 16  ;;  %v755_v27 = vrot.slane %v753_v9, 1  ;;  %v909_v59 = vrot.slane %v2796_v63, 1 }
  0xa8   : > { %v1267_v18 = vsel %vm1263_vm9, %v1234_v4, %v1003_v47  ;;  %v1001_v22 = vpop.permute.xlu0 %1000  ;;  %v2859_v9 = vsel %vm2450_vm2, 0, %v517_v50  ;;  %v334_v63 = vmul.f32 %v2270_v45, %v2469_v10 }
  0xa9   : > { %v1265_v23 = vsel %vm1263_vm9, %v1232_v17, %v1001_v22  ;;  %1018 = vrot.lane.b32.xlu1 %v2792_v53, %s2409_s9  ;;  %v1300_v24 = vsel %vm1296_vm10, %v1267_v18, %v1039_v38  ;;  %v756_v38 = vor.u32 %v755_v27, %v751_v7  ;;  %v760_v39 = vrot.slane %v758_v61, 1  ;;  %v2293_v7 = vld [vmem:[%s2479_s25 + $0x70] sm:$0xff]  }
  0xaa   : > { %v1298_v25 = vsel %vm1296_vm10, %v1265_v23, %v1037_v31  ;;  %1016 = vrot.lane.b32.xlu0 %v2736_v60, %s2409_s9  ;;  %v1333_v31 = vsel %vm1329_vm11, %v1300_v24, %v2747_v14  ;;  %v403_v14 = vmax.f32 %v371_v35, 0.0  ;;  %v765_v12 = vshll.u32 %v2859_v9, 16 }
  0xab   : > { %v2819_v28 = vpop.permute.xlu1 %814  ;;  %v1331_v30 = vsel %vm1329_vm11, %v1298_v25, %v2753_v19  ;;  %v1366_v46 = vsel %vm1362_vm13, %v1333_v31, %v1103_v8  ;;  %v612_v8 = vsel %vm2450_vm2, %v514_v41, 0  ;;  %v2872_v17 = vsel %vm874_vm3, %v908_v58, %v909_v59 }
  0xac   : > { %v1101_v37 = vpop.permute.xlu0 %1100  ;;  %v423_v51 = vpack.c.bf16 %v404_v44, %v403_v14  ;;  %v763_v61 = vshrl.u32 %v2859_v9, 16  ;;  %v767_v24 = vrot.slane %v765_v12, 1  ;;  %v770_v25 = vshll.u32 %v612_v8, 16 }
  0xad   : > { %v1364_v60 = vsel %vm1362_vm13, %v1331_v30, %v1101_v37  ;;  %1054 = vrot.lane.b32.xlu1 %v2811_v52, %s2407_s7  ;;  %v373_v34 = vadd.f32 %v2489_v21, %v334_v63  ;;  %v2275_v41 = vunpack.c.h.bf16 %v2293_v7  ;;  %v912_v14 = vrot.slane %v612_v8, 1 }
  0xae   : > { %1052 = vrot.lane.b32.xlu0 %v2758_v20, %s2407_s7  ;;  %v1397_v19 = vsel %vm1395_vm12, %v1364_v60, %v1133_v42  ;;  %v2844_v20 = vsel %vm617_vm4, %v756_v38, %v760_v39  ;;  %v519_v0 = vshrl.u32 %v423_v51, 16  ;;  %v522_v22 = vshll.u32 %v423_v51, 16 }
  0xaf   : > { %2326 = vmatprep.mubr.msk.bf16.mxu0 %vm1464_vm14, %v1397_v19  ;;  %v2834_v40 = vpop.permute.xlu1 %816  ;;  %v768_v37 = vor.u32 %v767_v24, %v763_v61  ;;  %v772_v31 = vrot.slane %v770_v25, 1  ;;  %v405_v38 = vmax.f32 %v373_v34, 0.0 }
  0xb0   : > { %v1135_v47 = vpop.permute.xlu0 %1134  ;;  %v521_v18 = vrot.slane %v519_v0, 7 }
  0xb1   : > { %v1399_v49 = vsel %vm1395_vm12, %v1366_v46, %v1135_v47  ;;  %1086 = vrot.lane.b32.xlu1 %v2778_v48, %s2406_s6  ;;  %v1170_v46 = vsel %vm1164_vm6, %v2518_v6, %v2819_v28  ;;  %v2906_v47 = vsel %vm617_vm4, %v768_v37, %v772_v31 }
  0xb2   : > { %1084 = vrot.lane.b32.xlu0 %v2751_v16, %s2406_s6  ;;  %2327 = vmatmul.mubr.msk.bf16.vlgmr.msra.gmra.mxu0 %vm1464_vm14, %v1399_v49  ;;  %v524_v30 = vor.u32 %v522_v22, %v521_v18  ;;  %v2910_v49 = vsel %vm2450_vm2, %v521_v18, 0 }
  0xb3   : > { %v2846_v42 = vpop.permute.xlu1 %929  ;;  %v782_v0 = vshll.u32 %v2910_v49, 16 }
  0xb4   : > { %v928_v55 = vpop.permute.xlu0 %927  ;;  %v2889_v19 = vsel %vm2450_vm2, 0, %v524_v30 }
  0xb5   : > { %1118 = vrot.lane.b32.xlu1 %v2844_v20, %s2410_s10  ;;  %v777_v50 = vshll.u32 %v2889_v19, 16  ;;  %v1203_v51 = vsel %vm1197_vm7, %v1170_v46, %v928_v55  ;;  %v2926_v55 = vld [vmem:[%s3330_s2] ss:$0 sm:$0xff]  ;;  %v775_v63 = vshrl.u32 %v2889_v19, 16 }
  0xb6   : > { %1116 = vrot.lane.b32.xlu0 %v2792_v53, %s2410_s10 }
  0xb7   : > { %v2853_v57 = vpop.permute.xlu1 %962  ;;  %v779_v18 = vrot.slane %v777_v50, 1 }
  0xb8   : > { %v961_v4 = vpop.permute.xlu0 %960 }
  0xb9   : > { %830 = vrot.lane.b32.xlu1 %v2792_v53, %s2404_s29  ;;  %v335_v53 = vmul.f32 %v2271_v56, %v2469_v10  ;;  %v2274_v10 = vunpack.c.l.bf16 %v2293_v7  ;;  %v1236_v6 = vsel %vm1230_vm8, %v1203_v51, %v961_v4  ;;  %v1172_v4 = vsel %vm1164_vm6, %v2532_v15, %v2834_v40 }
  0xba   : > { %1148 = vrot.lane.b32.xlu0 %v2811_v52, %s2408_s8  ;;  %v1205_v22 = vsel %vm1197_vm7, %v1172_v4, %v2846_v42  ;;  %v780_v30 = vor.u32 %v779_v18, %v775_v63 }
  0xbb   : > { %v2869_v13 = vpop.permute.xlu1 %1006  ;;  %v374_v35 = vadd.f32 %v2489_v21, %v335_v53  ;;  %v911_v21 = vrot.slane %v2859_v9, 1  ;;  %v1238_v15 = vsel %vm1230_vm8, %v1205_v22, %v2853_v57  ;;  %v784_v57 = vrot.slane %v782_v0, 1 }
  0xbc   : > { %v1005_v23 = vpop.permute.xlu0 %1004 }
  0xbd   : > { %832 = vrot.lane.b32.xlu1 %v2844_v20, %s2404_s29  ;;  %v406_v39 = vmax.f32 %v374_v35, 0.0  ;;  %v1269_v58 = vsel %vm1263_vm9, %v1236_v6, %v1005_v23  ;;  %v2920_v59 = vsel %vm874_vm3, %v911_v21, %v912_v14  ;;  %v2294_v21 = vld [vmem:[%s2479_s25 + $0x78] sm:$0xff]   ;;  %v914_v14 = vrot.slane %v2889_v19, 1 }
  0xbe   : > { %1150 = vrot.lane.b32.xlu0 %v2872_v17, %s2408_s8 }
  0xbf   : > { %v1043_v27 = vpop.permute.xlu1 %1042  ;;  %v424_v45 = vpack.c.bf16 %v406_v39, %v405_v38 }
  0xc0   : > { %v1041_v36 = vpop.permute.xlu0 %1040 }
  0xc1   : > { %945 = vrot.lane.b32.xlu1 %v2872_v17, %s2403_s26  ;;  %v1302_v12 = vsel %vm1296_vm10, %v1269_v58, %v1041_v36  ;;  %v526_v61 = vshrl.u32 %v424_v45, 16  ;;  %v529_v34 = vshll.u32 %v424_v45, 16  ;;  %v2279_v45 = vunpack.c.h.bf16 %v2294_v21 }
  0xc2   : > { %943 = vrot.lane.b32.xlu0 %v2811_v52, %s2403_s26  ;;  %v2897_v52 = vld [vmem:[%s3329_s1] ss:$0 sm:$0xff] }
  0xc3   : > { %v1075_v60 = vpop.permute.xlu1 %1074  ;;  %v336_v44 = vmul.f32 %v2897_v52, %v2274_v10  ;;  %v337_v56 = vmul.f32 %v2897_v52, %v2275_v41 }
  0xc4   : > { %v1073_v43 = vpop.permute.xlu0 %1072 }
  0xc5   : > { %978 = vrot.lane.b32.xlu1 %v2859_v9, %s2405_s30  ;;  %v375_v8 = vadd.f32 %v2926_v55, %v336_v44  ;;  %v1335_v53 = vsel %vm1329_vm11, %v1302_v12, %v1073_v43  ;;  %v376_v24 = vadd.f32 %v2926_v55, %v337_v56  ;;  %v915_v44 = vrot.slane %v2910_v49, 1 }
  0xc6   : > { %976 = vrot.lane.b32.xlu0 %v2778_v48, %s2405_s30  ;;  %v339_v12 = vmul.f32 %v2897_v52, %v2279_v45 }
  0xc7   : > { %v1107_v54 = vpop.permute.xlu1 %1106  ;;  %v407_v10 = vmax.f32 %v375_v8, 0.0  ;;  %v408_v37 = vmax.f32 %v376_v24, 0.0  ;;  %v916_v6 = vsel %vm874_vm3, %v914_v14, %v915_v44 }
  0xc8   : > { %v1105_v28 = vpop.permute.xlu0 %1104 }
  0xc9   : > { %1022 = vrot.lane.b32.xlu1 %v2906_v47, %s2409_s9  ;;  %v1368_v40 = vsel %vm1362_vm13, %v1335_v53, %v1105_v28  ;;  %v425_v41 = vpack.c.bf16 %v408_v37, %v407_v10 }
  0xca   : > { %1020 = vrot.lane.b32.xlu0 %v2844_v20, %s2409_s9  ;;  %v1271_v20 = vsel %vm1263_vm9, %v1238_v15, %v2869_v13  ;;  %v528_v13 = vrot.slane %v526_v61, 7  ;;  %v378_v15 = vadd.f32 %v2926_v55, %v339_v12 }
  0xcb   : > { %v2939_v23 = vpop.permute.xlu1 %818  ;;  %v1304_v42 = vsel %vm1296_vm10, %v1271_v20, %v1043_v27  ;;  %v533_v51 = vshrl.u32 %v425_v41, 16  ;;  %v536_v8 = vshll.u32 %v425_v41, 16 }
  0xcc   : > { %v1137_v25 = vpop.permute.xlu0 %1136  ;;  %v1337_v35 = vsel %vm1329_vm11, %v1304_v42, %v1075_v60  ;;  %v531_v39 = vor.u32 %v529_v34, %v528_v13  ;;  %v614_v49 = vsel %vm2450_vm2, %v528_v13, 0 }
  0xcd   : > { %v1401_v7 = vsel %vm1395_vm12, %v1368_v40, %v1137_v25  ;;  %1058 = vrot.lane.b32.xlu1 %v2920_v59, %s2407_s7  ;;  %v1370_v31 = vsel %vm1362_vm13, %v1337_v35, %v1107_v54  ;;  %v2278_v54 = vunpack.c.l.bf16 %v2294_v21  ;;  %v535_v0 = vrot.slane %v533_v51, 7 }
  0xce   : > { %1056 = vrot.lane.b32.xlu0 %v2872_v17, %s2407_s7  ;;  %2330 = vmatprep.mubr.msk.bf16.mxu0 %vm1464_vm14, %v1401_v7  ;;  %v2965_v17 = vsel %vm617_vm4, %v780_v30, %v784_v57  ;;  %v2980_v50 = vsel %vm2450_vm2, 0, %v531_v39  ;;  %v794_v22 = vshll.u32 %v614_v49, 16  ;;  %v410_v30 = vmax.f32 %v378_v15, 0.0 }
  0xcf   : > { %v2955_v36 = vpop.permute.xlu1 %820  ;;  %v789_v28 = vshll.u32 %v2980_v50, 16  ;;  %v338_v4 = vmul.f32 %v2897_v52, %v2278_v54  ;;  %v538_v61 = vor.u32 %v536_v8, %v535_v0  ;;  %v918_v34 = vrot.slane %v614_v49, 1 }
  0xd0   : > { %v1139_v38 = vpop.permute.xlu0 %1138  ;;  %v796_v25 = vrot.slane %v794_v22, 1  ;;  %v615_v13 = vsel %vm2450_vm2, %v535_v0, 0  ;;  %v1176_v21 = vsel %vm1164_vm6, %v2595_v29, %v2955_v36 }
  0xd1   : > { %v1403_v27 = vsel %vm1395_vm12, %v1370_v31, %v1139_v38  ;;  %1090 = vrot.lane.b32.xlu1 %v2889_v19, %s2406_s6  ;;  %v791_v18 = vrot.slane %v789_v28, 1  ;;  %v377_v24 = vadd.f32 %v2926_v55, %v338_v4  ;;  %v3003_v7 = vsel %vm2450_vm2, 0, %v538_v61 }
  0xd2   : > { %1088 = vrot.lane.b32.xlu0 %v2859_v9, %s2406_s6  ;;  %2331 = vmatmul.mubr.msk.bf16.gmra.mxu0 %vm1464_vm14, %v1403_v27  ;;  %v917_v55 = vrot.slane %v2980_v50, 1  ;;  %v801_v10 = vshll.u32 %v3003_v7, 16  ;;  %v920_v15 = vrot.slane %v3003_v7, 1 }
  0xd3   : > { %v2967_v60 = vpop.permute.xlu1 %933  ;;  %v409_v42 = vmax.f32 %v377_v24, 0.0 }
  0xd4   : > { %v932_v43 = vpop.permute.xlu0 %931  ;;  %v803_v44 = vrot.slane %v801_v10, 1  ;;  %v1209_v51 = vsel %vm1197_vm7, %v1176_v21, %v2967_v60 }
  0xd5   : > { %1122 = vrot.lane.b32.xlu1 %v2965_v17, %s2410_s10  ;;  %v426_v38 = vpack.c.bf16 %v410_v30, %v409_v42 }
  0xd6   : > { %1120 = vrot.lane.b32.xlu0 %v2906_v47, %s2410_s10 }
  0xd7   : > { %v2976_v46 = vpop.permute.xlu1 %966 }
  0xd8   : > { %v965_v56 = vpop.permute.xlu0 %964  ;;  %v1242_v49 = vsel %vm1230_vm8, %v1209_v51, %v2976_v46 }
  0xd9   : > { %834 = vrot.lane.b32.xlu1 %v2906_v47, %s2404_s29  ;;  %v787_v47 = vshrl.u32 %v2980_v50, 16 }
  0xda   : > { %1152 = vrot.lane.b32.xlu0 %v2920_v59, %s2408_s8 }
  0xdb   : > { %v1011_v58 = vpop.permute.xlu1 %1010  ;;  %v792_v52 = vor.u32 %v791_v18, %v787_v47 }
  0xdc   : > { %v1009_v63 = vpop.permute.xlu0 %1008  ;;  %v1275_v28 = vsel %vm1263_vm9, %v1242_v49, %v1011_v58 }
  0xdd   : > { %836 = vrot.lane.b32.xlu1 %v2965_v17, %s2404_s29  ;;  %v797_v35 = vsel %vm617_vm4, %v792_v52, %v796_v25 }
  0xde   : > { %1154 = vrot.lane.b32.xlu0 %v916_v6, %s2408_s8 }
  0xdf   : > { %v1047_v53 = vpop.permute.xlu1 %1046 }
  0xe0   : > { %v1045_v40 = vpop.permute.xlu0 %1044  ;;  %v1308_v0 = vsel %vm1296_vm10, %v1275_v28, %v1047_v53 }
  0xe1   : > { %949 = vrot.lane.b32.xlu1 %v916_v6, %s2403_s26 }
  0xe2   : > { %947 = vrot.lane.b32.xlu0 %v2920_v59, %s2403_s26  ;;  %v1174_v59 = vsel %vm1164_vm6, %v2569_v62, %v2939_v23  ;;  %v919_v62 = vsel %vm874_vm3, %v917_v55, %v918_v34  ;;  %v806_v23 = vshll.u32 %v615_v13, 16 }
  0xe3   : > { %v1079_v20 = vpop.permute.xlu1 %1078  ;;  %v1207_v37 = vsel %vm1197_vm7, %v1174_v59, %v932_v43  ;;  %v799_v43 = vshrl.u32 %v3003_v7, 16 }
  0xe4   : > { %v1077_v57 = vpop.permute.xlu0 %1076  ;;  %v1240_v27 = vsel %vm1230_vm8, %v1207_v37, %v965_v56  ;;  %v540_v56 = vshrl.u32 %v426_v38, 16  ;;  %v808_v8 = vrot.slane %v806_v23, 1  ;;  %v1341_v4 = vsel %vm1329_vm11, %v1308_v0, %v1079_v20 }
  0xe5   : > { %982 = vrot.lane.b32.xlu1 %v2980_v50, %s2405_s30  ;;  %v1273_v41 = vsel %vm1263_vm9, %v1240_v27, %v1009_v63  ;;  %v804_v60 = vor.u32 %v803_v44, %v799_v43  ;;  %v543_v63 = vshll.u32 %v426_v38, 16 }
  0xe6   : > { %980 = vrot.lane.b32.xlu0 %v2889_v19, %s2405_s30  ;;  %v1306_v14 = vsel %vm1296_vm10, %v1273_v41, %v1045_v40  ;;  %v542_v12 = vrot.slane %v540_v56, 7  ;;  %v921_v40 = vrot.slane %v615_v13, 1 }
  0xe7   : > { %v1111_v31 = vpop.permute.xlu1 %1110  ;;  %v1339_v54 = vsel %vm1329_vm11, %v1306_v14, %v1077_v57 }
  0xe8   : > { %v1109_v39 = vpop.permute.xlu0 %1108  ;;  %v1374_v47 = vsel %vm1362_vm13, %v1341_v4, %v1111_v31  ;;  %v545_v53 = vor.u32 %v543_v63, %v542_v12  ;;  %v922_v30 = vsel %vm874_vm3, %v920_v15, %v921_v40  ;;  %v616_v57 = vsel %vm2450_vm2, %v542_v12, 0 }
  0xe9   : > { %1026 = vrot.lane.b32.xlu1 %v797_v35, %s2409_s9  ;;  %v1372_v29 = vsel %vm1362_vm13, %v1339_v54, %v1109_v39  ;;  %v996_v13 = vshll.u32 %v616_v57, 16  ;;  %v1034_v23 = vrot.slane %v616_v57, 1 }
  0xea   : > { %1024 = vrot.lane.b32.xlu0 %v2965_v17, %s2409_s9  ;;  %v599_v52 = vsel %vm2450_vm2, 0, %v545_v53 }
  0xeb   : > { %v823_v45 = vpop.permute.xlu1 %822  ;;  %v991_v20 = vshll.u32 %v599_v52, 16  ;;  %v989_v34 = vshrl.u32 %v599_v52, 16  ;;  %v998_v31 = vrot.slane %v996_v13, 1  ;;  %v1033_v41 = vrot.slane %v599_v52, 1 }
  0xec   : > { %v1141_v36 = vpop.permute.xlu0 %1140  ;;  %v1178_v2 = vsel %vm1164_vm6, %v2636_v5, %v823_v45 }
  0xed   : > { %v1405_v17 = vsel %vm1395_vm12, %v1372_v29, %v1141_v36  ;;  %1062 = vrot.lane.b32.xlu1 %v919_v62, %s2407_s7  ;;  %v993_v59 = vrot.slane %v991_v20, 1  ;;  %v1035_v54 = vsel %vm874_vm3, %v1033_v41, %v1034_v23 }
  0xee   : > { %1060 = vrot.lane.b32.xlu0 %v916_v6, %s2407_s7  ;;  %2334 = vmatprep.mubr.msk.bf16.mxu0 %vm1464_vm14, %v1405_v17  ;;  %v809_v6 = vsel %vm617_vm4, %v804_v60, %v808_v8 }
  0xef   : > { %v825_v46 = vpop.permute.xlu1 %824 }
  0xf0   : > { %v1143_v58 = vpop.permute.xlu0 %1142  ;;  %v1180_v5 = vsel %vm1164_vm6, %v2656_v32, %v825_v46 }
  0xf1   : > { %v1407_v18 = vsel %vm1395_vm12, %v1374_v47, %v1143_v58  ;;  %1094 = vrot.lane.b32.xlu1 %v3003_v7, %s2406_s6 }
  0xf2   : > { %1092 = vrot.lane.b32.xlu0 %v2980_v50, %s2406_s6  ;;  %2335 = vmatmul.mubr.msk.bf16.gmra.mxu0 %vm1464_vm14, %v1407_v18 }
  0xf3   : > { %v938_v22 = vpop.permute.xlu1 %937 }
  0xf4   : > { %v936_v61 = vpop.permute.xlu0 %935  ;;  %v1213_v45 = vsel %vm1197_vm7, %v1180_v5, %v938_v22 }
  0xf5   : > { %1126 = vrot.lane.b32.xlu1 %v809_v6, %s2410_s10  ;;  %v1211_v21 = vsel %vm1197_vm7, %v1178_v2, %v936_v61 }
  0xf6   : > { %1124 = vrot.lane.b32.xlu0 %v797_v35, %s2410_s10 }
  0xf7   : > { %v971_v24 = vpop.permute.xlu1 %970 }
  0xf8   : > { %v969_v25 = vpop.permute.xlu0 %968  ;;  %v1246_v29 = vsel %vm1230_vm8, %v1213_v45, %v971_v24 }
  0xf9   : > { %838 = vrot.lane.b32.xlu1 %v797_v35, %s2404_s29  ;;  %v994_v35 = vor.u32 %v993_v59, %v989_v34 }
  0xfa   : > { %1156 = vrot.lane.b32.xlu0 %v919_v62, %s2408_s8 }
  0xfb   : > { %v1015_v42 = vpop.permute.xlu1 %1014  ;;  %v999_v39 = vsel %vm617_vm4, %v994_v35, %v998_v31 }
  0xfc   : > { %v1013_v55 = vpop.permute.xlu0 %1012  ;;  %v1279_v17 = vsel %vm1263_vm9, %v1246_v29, %v1015_v42 }
  0xfd   : > { %840 = vrot.lane.b32.xlu1 %v809_v6, %s2404_s29  ;;  %s3168_s29 = scalar_lea.vmem %s3332_s4, %s2182_s20  ;;  %s2124_s20 = sshll.u32 %s3337_s19, 1 }
  0xfe   : > { %1158 = vrot.lane.b32.xlu0 %v922_v30, %s2408_s8 }
  0xff   : > { %v1051_v10 = vpop.permute.xlu1 %1050 }
 0x100   : > { %v1049_v37 = vpop.permute.xlu0 %1048  ;;  %v1312_v0 = vsel %vm1296_vm10, %v1279_v17, %v1051_v10 }
 0x101   : > { %953 = vrot.lane.b32.xlu1 %v922_v30, %s2403_s26 }
 0x102   : > { %951 = vrot.lane.b32.xlu0 %v919_v62, %s2403_s26  ;;  %v1244_v62 = vsel %vm1230_vm8, %v1211_v21, %v969_v25 }
 0x103   : > { %v1083_v38 = vpop.permute.xlu1 %1082  ;;  %v1277_v44 = vsel %vm1263_vm9, %v1244_v62, %v1013_v55 }
 0x104   : > { %v1081_v27 = vpop.permute.xlu0 %1080  ;;  %v1310_v51 = vsel %vm1296_vm10, %v1277_v44, %v1049_v37  ;;  %v1345_v60 = vsel %vm1329_vm11, %v1312_v0, %v1083_v38 }
 0x105   : > { %986 = vrot.lane.b32.xlu1 %v599_v52, %s2405_s30  ;;  %v1343_v56 = vsel %vm1329_vm11, %v1310_v51, %v1081_v27 }
 0x106   : > { %984 = vrot.lane.b32.xlu0 %v3003_v7, %s2405_s30 }
 0x107   : > { %v1115_v14 = vpop.permute.xlu1 %1114 }
 0x108   : > { %v1113_v43 = vpop.permute.xlu0 %1112  ;;  %v1378_v4 = vsel %vm1362_vm13, %v1345_v60, %v1115_v14 }
 0x109   : > { %1030 = vrot.lane.b32.xlu1 %v999_v39, %s2409_s9  ;;  %v1376_v36 = vsel %vm1362_vm13, %v1343_v56, %v1113_v43 }
 0x10a   : > { %1028 = vrot.lane.b32.xlu0 %v809_v6, %s2409_s9 }
 0x10b   : > { %v827_v49 = vpop.permute.xlu1 %826 }
 0x10c   : > { %v1145_v28 = vpop.permute.xlu0 %1144  ;;  %v1182_v15 = vsel %vm1164_vm6, %v2688_v1, %v827_v49 }
 0x10d   : > { %v1409_v32 = vsel %vm1395_vm12, %v1376_v36, %v1145_v28  ;;  %1066 = vrot.lane.b32.xlu1 %v1035_v54, %s2407_s7 }
 0x10e   : > { %1064 = vrot.lane.b32.xlu0 %v922_v30, %s2407_s7  ;;  %2338 = vmatprep.mubr.msk.bf16.mxu0 %vm1464_vm14, %v1409_v32  ;;  %s235_s7 = scalar_lea.vmem %s3333_s5, %s2124_s20 }
 0x10f   : > { %v829_v8 = vpop.permute.xlu1 %828 }
 0x110   : > { %v1147_v46 = vpop.permute.xlu0 %1146 }
 0x111   : > { %v1411_v12 = vsel %vm1395_vm12, %v1378_v4, %v1147_v46  ;;  %1098 = vrot.lane.b32.xlu1 %v2456_v3, %s2406_s6 }
 0x112   : > { %1096 = vrot.lane.b32.xlu0 %v599_v52, %s2406_s6  ;;  %2339 = vmatmul.mubr.msk.bf16.gmra.mxu0 %vm1464_vm14, %v1411_v12 }
 0x113   : > { %v942_v63 = vpop.permute.xlu1 %941 }
 0x114   : > { %v940_v47 = vpop.permute.xlu0 %939 }
 0x115   : > { %1130 = vrot.lane.b32.xlu1 %v2493_v26, %s2410_s10  ;;  %v1215_v26 = vsel %vm1197_vm7, %v1182_v15, %v940_v47 }
 0x116   : > { %1128 = vrot.lane.b32.xlu0 %v999_v39, %s2410_s10 }
 0x117   : > { %v975_v58 = vpop.permute.xlu1 %974 }
 0x118   : > { %v973_v18 = vpop.permute.xlu0 %972 }
 0x119   : > { %1162 = vrot.lane.b32.xlu1 %v2472_v11, %s2408_s8  ;;  %v1248_v52 = vsel %vm1230_vm8, %v1215_v26, %v973_v18  ;;  %v1184_v11 = vsel %vm1164_vm6, %v2708_v33, %v829_v8 }
 0x11a   : > { %1160 = vrot.lane.b32.xlu0 %v1035_v54, %s2408_s8  ;;  %v1217_v30 = vsel %vm1197_vm7, %v1184_v11, %v942_v63 }
 0x11b   : > { %v1019_v6 = vpop.permute.xlu1 %1018  ;;  %v1250_v1 = vsel %vm1230_vm8, %v1217_v30, %v975_v58 }
 0x11c   : > { %v1017_v3 = vpop.permute.xlu0 %1016  ;;  %v1283_v13 = vsel %vm1263_vm9, %v1250_v1, %v1019_v6 }
 0x11d   : > { %v1281_v20 = vsel %vm1263_vm9, %v1248_v52, %v1017_v3 }
 0x11f   : > { %v1055_v22 = vpop.permute.xlu1 %1054 }
 0x120   : > { %v1053_v53 = vpop.permute.xlu0 %1052  ;;  %v1316_v37 = vsel %vm1296_vm10, %v1283_v13, %v1055_v22 }
 0x121   : > { %v1314_v42 = vsel %vm1296_vm10, %v1281_v20, %v1053_v53 }
 0x123   : > { %v1087_v61 = vpop.permute.xlu1 %1086 }
 0x124   : > { %v1085_v24 = vpop.permute.xlu0 %1084  ;;  %v1349_v33 = vsel %vm1329_vm11, %v1316_v37, %v1087_v61 }
 0x125   : > { %v1347_v57 = vsel %vm1329_vm11, %v1314_v42, %v1085_v24 }
 0x127   : > { %v1119_v40 = vpop.permute.xlu1 %1118 }
 0x128   : > { %v1117_v25 = vpop.permute.xlu0 %1116  ;;  %v1382_v31 = vsel %vm1362_vm13, %v1349_v33, %v1119_v40 }
 0x129   : > { %v1380_v34 = vsel %vm1362_vm13, %v1347_v57, %v1117_v25 }
 0x12b   : > { %v831_v55 = vpop.permute.xlu1 %830 }
 0x12c   : > { %v1149_v59 = vpop.permute.xlu0 %1148  ;;  %v1186_v51 = vsel %vm1164_vm6, %v2751_v16, %v831_v55 }
 0x12d   : > { %v1413_v10 = vsel %vm1395_vm12, %v1380_v34, %v1149_v59 }
 0x12e   : > { %2342 = vmatprep.mubr.msk.bf16.mxu1 %vm1464_vm14, %v1413_v10 }
 0x12f   : > { %v833_v35 = vpop.permute.xlu1 %832 }
 0x130   : > { %v1151_v38 = vpop.permute.xlu0 %1150  ;;  %v1188_v36 = vsel %vm1164_vm6, %v2778_v48, %v833_v35 }
 0x131   : > { %v1415_v27 = vsel %vm1395_vm12, %v1382_v31, %v1151_v38 }
 0x132   : > { %2343 = vmatmul.mubr.msk.bf16.vlgmr.msra.gmra.mxu1 %vm1464_vm14, %v1415_v27 }
 0x133   : > { %v946_v2 = vpop.permute.xlu1 %945 }
 0x134   : > { %v944_v39 = vpop.permute.xlu0 %943  ;;  %v1221_v17 = vsel %vm1197_vm7, %v1188_v36, %v946_v2 }
 0x135   : > { %v1219_v54 = vsel %vm1197_vm7, %v1186_v51, %v944_v39 }
 0x137   : > { %v979_v41 = vpop.permute.xlu1 %978 }
 0x138   : > { %v977_v23 = vpop.permute.xlu0 %976  ;;  %v1254_v16 = vsel %vm1230_vm8, %v1221_v17, %v979_v41 }
 0x139   : > { %v1252_v56 = vsel %vm1230_vm8, %v1219_v54, %v977_v23 }
 0x13b   : > { %v1023_v21 = vpop.permute.xlu1 %1022 }
 0x13c   : > { %v1021_v14 = vpop.permute.xlu0 %1020  ;;  %v1287_v4 = vsel %vm1263_vm9, %v1254_v16, %v1023_v21 }
 0x13d   : > { %v1285_v29 = vsel %vm1263_vm9, %v1252_v56, %v1021_v14 }
 0x13f   : > { %v1059_v62 = vpop.permute.xlu1 %1058 }
 0x140   : > { %v1057_v43 = vpop.permute.xlu0 %1056  ;;  %v1320_v12 = vsel %vm1296_vm10, %v1287_v4, %v1059_v62 }
 0x141   : > { %v1318_v28 = vsel %vm1296_vm10, %v1285_v29, %v1057_v43 }
 0x143   : > { %v1091_v44 = vpop.permute.xlu1 %1090 }
 0x144   : > { %v1089_v5 = vpop.permute.xlu0 %1088  ;;  %v1353_v48 = vsel %vm1329_vm11, %v1320_v12, %v1091_v44 }
 0x145   : > { %v1351_v32 = vsel %vm1329_vm11, %v1318_v28, %v1089_v5 }
 0x147   : > { %v1123_v45 = vpop.permute.xlu1 %1122 }
 0x148   : > { %v1121_v49 = vpop.permute.xlu0 %1120  ;;  %v1386_v47 = vsel %vm1362_vm13, %v1353_v48, %v1123_v45 }
 0x149   : > { %v1384_v60 = vsel %vm1362_vm13, %v1351_v32, %v1121_v49 }
 0x14b   : > { %v835_v0 = vpop.permute.xlu1 %834 }
 0x14c   : > { %v1153_v8 = vpop.permute.xlu0 %1152  ;;  %v1190_v25 = vsel %vm1164_vm6, %v2859_v9, %v835_v0 }
 0x14d   : > { %v1417_v46 = vsel %vm1395_vm12, %v1384_v60, %v1153_v8 }
 0x14e   : > { %2346 = vmatprep.mubr.msk.bf16.mxu1 %vm1464_vm14, %v1417_v46 }
 0x14f   : > { %v837_v63 = vpop.permute.xlu1 %836 }
 0x150   : > { %v1155_v58 = vpop.permute.xlu0 %1154  ;;  %v1192_v55 = vsel %vm1164_vm6, %v2889_v19, %v837_v63 }
 0x151   : > { %v1419_v18 = vsel %vm1395_vm12, %v1386_v47, %v1155_v58 }
 0x152   : > { %2347 = vmatmul.mubr.msk.bf16.gmra.mxu1 %vm1464_vm14, %v1419_v18 }
 0x153   : > { %v950_v6 = vpop.permute.xlu1 %949 }
 0x154   : > { %v948_v3 = vpop.permute.xlu0 %947  ;;  %v1225_v34 = vsel %vm1197_vm7, %v1192_v55, %v950_v6 }
 0x155   : > { %v1223_v20 = vsel %vm1197_vm7, %v1190_v25, %v948_v3 }
 0x157   : > { %v983_v22 = vpop.permute.xlu1 %982 }
 0x158   : > { %v981_v53 = vpop.permute.xlu0 %980  ;;  %v1258_v9 = vsel %vm1230_vm8, %v1225_v34, %v983_v22 }
 0x159   : > { %v1256_v42 = vsel %vm1230_vm8, %v1223_v20, %v981_v53 }
 0x15b   : > { %v1027_v61 = vpop.permute.xlu1 %1026 }
 0x15c   : > { %v1025_v24 = vpop.permute.xlu0 %1024  ;;  %v1291_v33 = vsel %vm1263_vm9, %v1258_v9, %v1027_v61 }
 0x15d   : > { %v1289_v57 = vsel %vm1263_vm9, %v1256_v42, %v1025_v24 }
 0x15f   : > { %v1063_v15 = vpop.permute.xlu1 %1062 }
 0x160   : > { %v1061_v26 = vpop.permute.xlu0 %1060  ;;  %v1324_v19 = vsel %vm1296_vm10, %v1291_v33, %v1063_v15 }
 0x161   : > { %v1322_v1 = vsel %vm1296_vm10, %v1289_v57, %v1061_v26 }
 0x163   : > { %v1095_v40 = vpop.permute.xlu1 %1094 }
 0x164   : > { %v1093_v52 = vpop.permute.xlu0 %1092  ;;  %v1357_v31 = vsel %vm1329_vm11, %v1324_v19, %v1095_v40 }
 0x165   : > { %v1355_v59 = vsel %vm1329_vm11, %v1322_v1, %v1093_v52 }
 0x167   : > { %v1127_v11 = vpop.permute.xlu1 %1126 }
 0x168   : > { %v1125_v30 = vpop.permute.xlu0 %1124  ;;  %v1390_v27 = vsel %vm1362_vm13, %v1357_v31, %v1127_v11 }
 0x169   : > { %v1388_v10 = vsel %vm1362_vm13, %v1355_v59, %v1125_v30 }
 0x16b   : > { %v3152_v13 = vpop.permute.xlu1 %838 }
 0x16c   : > { %v1157_v37 = vpop.permute.xlu0 %1156  ;;  %v1194_v42 = vsel %vm1164_vm6, %v2980_v50, %v3152_v13 }
 0x16d   : > { %v1421_v35 = vsel %vm1395_vm12, %v1388_v10, %v1157_v37 }
 0x16e   : > { %2350 = vmatprep.mubr.msk.bf16.mxu1 %vm1464_vm14, %v1421_v35 }
 0x16f   : > { %v841_v38 = vpop.permute.xlu1 %840 }
 0x170   : > { %v1159_v2 = vpop.permute.xlu0 %1158  ;;  %v1196_v20 = vsel %vm1164_vm6, %v3003_v7, %v841_v38 }
 0x171   : > { %v1423_v39 = vsel %vm1395_vm12, %v1390_v27, %v1159_v2 }
 0x172   : > { %v2328_v41 = vpop.f32.mrf.mxu0  ;;  %2351 = vmatmul.mubr.msk.bf16.gmra.mxu1 %vm1464_vm14, %v1423_v39 }
 0x173   : > { %v2186_v23 = vpack.c.bf16 %v2328_v41, %v2328_v41  ;;  %v954_v21 = vpop.permute.xlu1 %953 }
 0x174   : > { %v1535_v14 = vpop.f32.mrf.mxu0  ;;  %v952_v62 = vpop.permute.xlu0 %951  ;;  %v1229_v30 = vsel %vm1197_vm7, %v1196_v20, %v954_v21 }
 0x175   : > { %1793 = vst.msk [vmem:[%s3168_s29 + $0x8] sm:$0xf] %vm1790_vm15, %v2186_v23  ;;  %v2184_v43 = vpack.c.bf16 %v1535_v14, %v1535_v14  ;;  %v1227_v57 = vsel %vm1197_vm7, %v1194_v42, %v952_v62 }
 0x176   : > { %v2329_v44 = vpop.f32.mrf.mxu0 }
 0x177   : > { %1791 = vst.msk [vmem:[%s3168_s29] sm:$0xf] %vm1790_vm15, %v2184_v43  ;;  %v1663_v5 = vpack.c.bf16 %v2329_v44, %v2328_v41  ;;  %v2187_v51 = vpack.c.bf16 %v2329_v44, %v2329_v44  ;;  %v987_v54 = vpop.permute.xlu1 %986 }
 0x178   : > { %v1538_v45 = vpop.f32.mrf.mxu0  ;;  %v985_v56 = vpop.permute.xlu0 %984  ;;  %v1262_v55 = vsel %vm1230_vm8, %v1229_v30, %v987_v54 }
 0x179   : > { %1794 = vst.msk [vmem:[%s3168_s29 + $0xc] sm:$0xf] %vm1790_vm15, %v2187_v51  ;;  %v1825_v49 = vunpack.c.l.bf16 %v1663_v5  ;;  %v1662_v29 = vpack.c.bf16 %v1538_v45, %v1535_v14  ;;  %v2185_v36 = vpack.c.bf16 %v1538_v45, %v1538_v45  ;;  %v1826_v17 = vunpack.c.h.bf16 %v1663_v5 }
 0x17a   : > { %v1260_v34 = vsel %vm1230_vm8, %v1227_v57, %v985_v56 }
 0x17b   : > { %1792 = vst.msk [vmem:[%s3168_s29 + $0x4] sm:$0xf] %vm1790_vm15, %v2185_v36  ;;  %v1031_v28 = vpop.permute.xlu1 %1030  ;;  %v1823_v32 = vunpack.c.l.bf16 %v1662_v29  ;;  %v1824_v0 = vunpack.c.h.bf16 %v1662_v29  ;;  %v1926_v60 = vmul.f32 %v1825_v49, %v1825_v49  ;;  %v1858_v47 = vsel %vm1164_vm6, %v1825_v49, 0.0 }
 0x17c   : > { %v1029_v16 = vpop.permute.xlu0 %1028  ;;  %v1927_v58 = vmul.f32 %v1826_v17, %v1826_v17  ;;  %v1860_v61 = vsel %vm1164_vm6, %v1826_v17, 0.0  ;;  %v1295_v59 = vsel %vm1263_vm9, %v1262_v55, %v1031_v28 }
 0x17d   : > { %v1855_v8 = vsel %vm1164_vm6, %v1823_v32, 0.0  ;;  %v1856_v4 = vsel %vm1164_vm6, %v1824_v0, 0.0  ;;  %v1924_v46 = vmul.f32 %v1823_v32, %v1823_v32  ;;  %v1925_v12 = vmul.f32 %v1824_v0, %v1824_v0 }
 0x17e   : > { %v1857_v48 = vadd.f32 %v1856_v4, %v1855_v8  ;;  %v1959_v24 = vsel %vm1164_vm6, %v1926_v60, 0.0  ;;  %v1961_v52 = vsel %vm1164_vm6, %v1927_v58, 0.0  ;;  %v1293_v10 = vsel %vm1263_vm9, %v1260_v34, %v1029_v16 }
 0x17f   : > { %v1067_v63 = vpop.permute.xlu1 %1066  ;;  %v1956_v18 = vsel %vm1164_vm6, %v1924_v46, 0.0  ;;  %v1957_v6 = vsel %vm1164_vm6, %v1925_v12, 0.0 }
 0x180   : > { %v1065_v3 = vpop.permute.xlu0 %1064  ;;  %v1859_v22 = vadd.f32 %v1858_v47, %v1857_v48  ;;  %v1958_v53 = vadd.f32 %v1957_v6, %v1956_v18  ;;  %v1328_v7 = vsel %vm1296_vm10, %v1295_v59, %v1067_v63 }
 0x181   : > { %v1326_v37 = vsel %vm1296_vm10, %v1293_v10, %v1065_v3 }
 0x182   : > { %v1960_v15 = vadd.f32 %v1959_v24, %v1958_v53  ;;  %v1861_v40 = vadd.f32 %v1860_v61, %v1859_v22 }
 0x183   : > { %v1099_v26 = vpop.permute.xlu1 %1098 }
 0x184   : > { %v1097_v25 = vpop.permute.xlu0 %1096  ;;  %v1962_v11 = vadd.f32 %v1961_v52, %v1960_v15  ;;  %v1361_v50 = vsel %vm1329_vm11, %v1328_v7, %v1099_v26 }
 0x185   : > { %v1359_v13 = vsel %vm1329_vm11, %v1326_v37, %v1097_v25 }
 0x187   : > { %v1131_v1 = vpop.permute.xlu1 %1130 }
 0x188   : > { %v1129_v9 = vpop.permute.xlu0 %1128  ;;  %v1394_v33 = vsel %vm1362_vm13, %v1361_v50, %v1131_v1 }
 0x189   : > { %v1392_v19 = vsel %vm1362_vm13, %v1359_v13, %v1129_v9 }
 0x18b   : > { %v1163_v35 = vpop.permute.xlu1 %1162 }
 0x18c   : > { %v1427_v31 = vsel %vm1395_vm12, %v1394_v33, %v1163_v35  ;;  %v1161_v38 = vpop.permute.xlu0 %1160 }
 0x18d   : > { %v1425_v27 = vsel %vm1395_vm12, %v1392_v19, %v1161_v38 }
 0x18e   : > { %2354 = vmatprep.mubr.msk.bf16.mxu1 %vm1464_vm14, %v1425_v27 }
 0x18f   : > { %2355 = vmatmul.mubr.msk.bf16.gmra.mxu1 %vm1464_vm14, %v1427_v31 }
 0x192   : > { %v2332_v2 = vpop.f32.mrf.mxu0 }
 0x193   : > { %v2190_v39 = vpack.c.bf16 %v2332_v2, %v2332_v2 }
 0x194   : > { %v1551_v41 = vpop.f32.mrf.mxu0 }
 0x195   : > { %1797 = vst.msk [vmem:[%s3168_s29 + $0x18] sm:$0xf] %vm1790_vm15, %v2190_v39  ;;  %v2188_v23 = vpack.c.bf16 %v1551_v41, %v1551_v41 }
 0x196   : > { %v2333_v21 = vpop.f32.mrf.mxu0 }
 0x197   : > { %1795 = vst.msk [vmem:[%s3168_s29 + $0x10] sm:$0xf] %vm1790_vm15, %v2188_v23  ;;  %v1665_v14 = vpack.c.bf16 %v2333_v21, %v2332_v2  ;;  %v2191_v62 = vpack.c.bf16 %v2333_v21, %v2333_v21 }
 0x198   : > { %v1554_v43 = vpop.f32.mrf.mxu0 }
 0x199   : > { %1798 = vst.msk [vmem:[%s3168_s29 + $0x1c] sm:$0xf] %vm1790_vm15, %v2191_v62  ;;  %v1664_v44 = vpack.c.bf16 %v1554_v43, %v1551_v41  ;;  %v2189_v5 = vpack.c.bf16 %v1554_v43, %v1554_v43  ;;  %v1829_v51 = vunpack.c.l.bf16 %v1665_v14  ;;  %v1830_v56 = vunpack.c.h.bf16 %v1665_v14 }
 0x19b   : > { %1796 = vst.msk [vmem:[%s3168_s29 + $0x14] sm:$0xf] %vm1790_vm15, %v2189_v5  ;;  %v1827_v54 = vunpack.c.l.bf16 %v1664_v44  ;;  %v1828_v45 = vunpack.c.h.bf16 %v1664_v44  ;;  %v1930_v17 = vmul.f32 %v1829_v51, %v1829_v51  ;;  %v1866_v8 = vsel %vm1164_vm6, %v1829_v51, 0.0 }
 0x19c   : > { %v1931_v4 = vmul.f32 %v1830_v56, %v1830_v56  ;;  %v1868_v63 = vsel %vm1164_vm6, %v1830_v56, 0.0 }
 0x19d   : > { %v1862_v49 = vsel %vm1164_vm6, %v1827_v54, 0.0  ;;  %v1928_v29 = vmul.f32 %v1827_v54, %v1827_v54  ;;  %v1929_v36 = vmul.f32 %v1828_v45, %v1828_v45  ;;  %v1864_v32 = vsel %vm1164_vm6, %v1828_v45, 0.0 }
 0x19e   : > { %v1863_v28 = vadd.f32 %v1862_v49, %v1861_v40  ;;  %v1967_v47 = vsel %vm1164_vm6, %v1930_v17, 0.0  ;;  %v1969_v6 = vsel %vm1164_vm6, %v1931_v4, 0.0 }
 0x19f   : > { %v1963_v0 = vsel %vm1164_vm6, %v1928_v29, 0.0  ;;  %v1965_v46 = vsel %vm1164_vm6, %v1929_v36, 0.0 }
 0x1a0   : > { %v1865_v16 = vadd.f32 %v1864_v32, %v1863_v28  ;;  %v1964_v60 = vadd.f32 %v1963_v0, %v1962_v11 }
 0x1a2   : > { %v1867_v12 = vadd.f32 %v1866_v8, %v1865_v16  ;;  %v1966_v48 = vadd.f32 %v1965_v46, %v1964_v60 }
 0x1a4   : > { %v1968_v58 = vadd.f32 %v1967_v47, %v1966_v48  ;;  %v1869_v18 = vadd.f32 %v1868_v63, %v1867_v12 }
 0x1a6   : > { %v1970_v3 = vadd.f32 %v1969_v6, %v1968_v58 }
 0x1b2   : > { %v2336_v22 = vpop.f32.mrf.mxu0 }
 0x1b3   : > { %v2194_v53 = vpack.c.bf16 %v2336_v22, %v2336_v22 }
 0x1b4   : > { %v1567_v61 = vpop.f32.mrf.mxu0 }
 0x1b5   : > { %1801 = vst.msk [vmem:[%s3168_s29 + $0x28] sm:$0xf] %vm1790_vm15, %v2194_v53  ;;  %v2192_v24 = vpack.c.bf16 %v1567_v61, %v1567_v61 }
 0x1b6   : > { %v2337_v15 = vpop.f32.mrf.mxu0 }
 0x1b7   : > { %1799 = vst.msk [vmem:[%s3168_s29 + $0x20] sm:$0xf] %vm1790_vm15, %v2192_v24  ;;  %v1667_v26 = vpack.c.bf16 %v2337_v15, %v2336_v22  ;;  %v2195_v40 = vpack.c.bf16 %v2337_v15, %v2337_v15 }
 0x1b8   : > { %v1570_v52 = vpop.f32.mrf.mxu0 }
 0x1b9   : > { %1802 = vst.msk [vmem:[%s3168_s29 + $0x2c] sm:$0xf] %vm1790_vm15, %v2195_v40  ;;  %v1666_v25 = vpack.c.bf16 %v1570_v52, %v1567_v61  ;;  %v2193_v20 = vpack.c.bf16 %v1570_v52, %v1570_v52  ;;  %v1833_v11 = vunpack.c.l.bf16 %v1667_v26  ;;  %v1834_v57 = vunpack.c.h.bf16 %v1667_v26 }
 0x1bb   : > { %1800 = vst.msk [vmem:[%s3168_s29 + $0x24] sm:$0xf] %vm1790_vm15, %v2193_v20  ;;  %v1831_v42 = vunpack.c.l.bf16 %v1666_v25  ;;  %v1832_v30 = vunpack.c.h.bf16 %v1666_v25  ;;  %v1934_v9 = vmul.f32 %v1833_v11, %v1833_v11  ;;  %v1874_v13 = vsel %vm1164_vm6, %v1833_v11, 0.0 }
 0x1bc   : > { %v1935_v33 = vmul.f32 %v1834_v57, %v1834_v57  ;;  %v1876_v38 = vsel %vm1164_vm6, %v1834_v57, 0.0 }
 0x1bd   : > { %v1870_v55 = vsel %vm1164_vm6, %v1831_v42, 0.0  ;;  %v1932_v1 = vmul.f32 %v1831_v42, %v1831_v42  ;;  %v1933_v34 = vmul.f32 %v1832_v30, %v1832_v30  ;;  %v1872_v10 = vsel %vm1164_vm6, %v1832_v30, 0.0 }
 0x1be   : > { %v1871_v59 = vadd.f32 %v1870_v55, %v1869_v18  ;;  %v1975_v27 = vsel %vm1164_vm6, %v1934_v9, 0.0  ;;  %v1977_v41 = vsel %vm1164_vm6, %v1935_v33, 0.0 }
 0x1bf   : > { %v1971_v7 = vsel %vm1164_vm6, %v1932_v1, 0.0  ;;  %v1973_v35 = vsel %vm1164_vm6, %v1933_v34, 0.0 }
 0x1c0   : > { %v1873_v37 = vadd.f32 %v1872_v10, %v1871_v59  ;;  %v1972_v50 = vadd.f32 %v1971_v7, %v1970_v3 }
 0x1c2   : > { %v1875_v19 = vadd.f32 %v1874_v13, %v1873_v37  ;;  %v1974_v31 = vadd.f32 %v1973_v35, %v1972_v50 }
 0x1c4   : > { %v1976_v2 = vadd.f32 %v1975_v27, %v1974_v31  ;;  %v1877_v39 = vadd.f32 %v1876_v38, %v1875_v19 }
 0x1c6   : > { %v1978_v23 = vadd.f32 %v1977_v41, %v1976_v2 }
 0x1d2   : > { %v2340_v21 = vpop.f32.mrf.mxu0 }
 0x1d3   : > { %v2198_v14 = vpack.c.bf16 %v2340_v21, %v2340_v21 }
 0x1d4   : > { %v1583_v62 = vpop.f32.mrf.mxu0 }
 0x1d5   : > { %1805 = vst.msk [vmem:[%s3168_s29 + $0x38] sm:$0xf] %vm1790_vm15, %v2198_v14  ;;  %v2196_v43 = vpack.c.bf16 %v1583_v62, %v1583_v62 }
 0x1d6   : > { %v2341_v44 = vpop.f32.mrf.mxu0 }
 0x1d7   : > { %1803 = vst.msk [vmem:[%s3168_s29 + $0x30] sm:$0xf] %vm1790_vm15, %v2196_v43  ;;  %v1669_v5 = vpack.c.bf16 %v2341_v44, %v2340_v21  ;;  %v2199_v51 = vpack.c.bf16 %v2341_v44, %v2341_v44 }
 0x1d8   : > { %v1586_v54 = vpop.f32.mrf.mxu0 }
 0x1d9   : > { %1806 = vst.msk [vmem:[%s3168_s29 + $0x3c] sm:$0xf] %vm1790_vm15, %v2199_v51  ;;  %v1668_v45 = vpack.c.bf16 %v1586_v54, %v1583_v62  ;;  %v2197_v56 = vpack.c.bf16 %v1586_v54, %v1586_v54  ;;  %v1837_v49 = vunpack.c.l.bf16 %v1669_v5  ;;  %v1838_v28 = vunpack.c.h.bf16 %v1669_v5 }
 0x1db   : > { %1804 = vst.msk [vmem:[%s3168_s29 + $0x34] sm:$0xf] %vm1790_vm15, %v2197_v56  ;;  %v1835_v29 = vunpack.c.l.bf16 %v1668_v45  ;;  %v1836_v36 = vunpack.c.h.bf16 %v1668_v45  ;;  %v1938_v60 = vmul.f32 %v1837_v49, %v1837_v49  ;;  %v1882_v48 = vsel %vm1164_vm6, %v1837_v49, 0.0 }
 0x1dc   : > { %v1939_v63 = vmul.f32 %v1838_v28, %v1838_v28  ;;  %v1884_v6 = vsel %vm1164_vm6, %v1838_v28, 0.0 }
 0x1dd   : > { %v1878_v17 = vsel %vm1164_vm6, %v1835_v29, 0.0  ;;  %v1936_v32 = vmul.f32 %v1835_v29, %v1835_v29  ;;  %v1937_v0 = vmul.f32 %v1836_v36, %v1836_v36  ;;  %v1880_v8 = vsel %vm1164_vm6, %v1836_v36, 0.0 }
 0x1de   : > { %v1879_v16 = vadd.f32 %v1878_v17, %v1877_v39  ;;  %v1983_v3 = vsel %vm1164_vm6, %v1938_v60, 0.0  ;;  %v1985_v61 = vsel %vm1164_vm6, %v1939_v63, 0.0 }
 0x1df   : > { %v1979_v4 = vsel %vm1164_vm6, %v1936_v32, 0.0  ;;  %v1981_v47 = vsel %vm1164_vm6, %v1937_v0, 0.0 }
 0x1e0   : > { %v1881_v46 = vadd.f32 %v1880_v8, %v1879_v16  ;;  %v1980_v12 = vadd.f32 %v1979_v4, %v1978_v23 }
 0x1e2   : > { %v1883_v58 = vadd.f32 %v1882_v48, %v1881_v46  ;;  %v1982_v18 = vadd.f32 %v1981_v47, %v1980_v12 }
 0x1e4   : > { %v1984_v22 = vadd.f32 %v1983_v3, %v1982_v18  ;;  %v1885_v53 = vadd.f32 %v1884_v6, %v1883_v58 }
 0x1e6   : > { %v1986_v24 = vadd.f32 %v1985_v61, %v1984_v22 }
 0x1f2   : > { %v2344_v15 = vpop.f32.mrf.mxu1 }
 0x1f3   : > { %v2202_v26 = vpack.c.bf16 %v2344_v15, %v2344_v15 }
 0x1f4   : > { %v1599_v40 = vpop.f32.mrf.mxu1 }
 0x1f5   : > { %1809 = vst.msk [vmem:[%s3168_s29 + $0x48] sm:$0xf] %vm1790_vm15, %v2202_v26  ;;  %v2200_v52 = vpack.c.bf16 %v1599_v40, %v1599_v40 }
 0x1f6   : > { %v2345_v25 = vpop.f32.mrf.mxu1 }
 0x1f7   : > { %1807 = vst.msk [vmem:[%s3168_s29 + $0x40] sm:$0xf] %vm1790_vm15, %v2200_v52  ;;  %v1671_v20 = vpack.c.bf16 %v2345_v25, %v2344_v15  ;;  %v2203_v11 = vpack.c.bf16 %v2345_v25, %v2345_v25 }
 0x1f8   : > { %v1602_v42 = vpop.f32.mrf.mxu1 }
 0x1f9   : > { %1810 = vst.msk [vmem:[%s3168_s29 + $0x4c] sm:$0xf] %vm1790_vm15, %v2203_v11  ;;  %v1670_v30 = vpack.c.bf16 %v1602_v42, %v1599_v40  ;;  %v2201_v57 = vpack.c.bf16 %v1602_v42, %v1602_v42  ;;  %v1841_v55 = vunpack.c.l.bf16 %v1671_v20  ;;  %v1842_v59 = vunpack.c.h.bf16 %v1671_v20 }
 0x1fb   : > { %1808 = vst.msk [vmem:[%s3168_s29 + $0x44] sm:$0xf] %vm1790_vm15, %v2201_v57  ;;  %v1839_v1 = vunpack.c.l.bf16 %v1670_v30  ;;  %v1840_v34 = vunpack.c.h.bf16 %v1670_v30  ;;  %v1942_v50 = vmul.f32 %v1841_v55, %v1841_v55  ;;  %v1890_v31 = vsel %vm1164_vm6, %v1841_v55, 0.0 }
 0x1fc   : > { %v1943_v38 = vmul.f32 %v1842_v59, %v1842_v59  ;;  %v1892_v41 = vsel %vm1164_vm6, %v1842_v59, 0.0 }
 0x1fd   : > { %v1886_v9 = vsel %vm1164_vm6, %v1839_v1, 0.0  ;;  %v1940_v10 = vmul.f32 %v1839_v1, %v1839_v1  ;;  %v1941_v7 = vmul.f32 %v1840_v34, %v1840_v34  ;;  %v1888_v13 = vsel %vm1164_vm6, %v1840_v34, 0.0 }
 0x1fe   : > { %v1887_v37 = vadd.f32 %v1886_v9, %v1885_v53  ;;  %v1991_v23 = vsel %vm1164_vm6, %v1942_v50, 0.0  ;;  %v1993_v62 = vsel %vm1164_vm6, %v1943_v38, 0.0 }
 0x1ff   : > { %v1987_v33 = vsel %vm1164_vm6, %v1940_v10, 0.0  ;;  %v1989_v27 = vsel %vm1164_vm6, %v1941_v7, 0.0 }
 0x200   : > { %v1889_v35 = vadd.f32 %v1888_v13, %v1887_v37  ;;  %v1988_v19 = vadd.f32 %v1987_v33, %v1986_v24 }
 0x202   : > { %v1891_v2 = vadd.f32 %v1890_v31, %v1889_v35  ;;  %v1990_v39 = vadd.f32 %v1989_v27, %v1988_v19 }
 0x204   : > { %v1992_v21 = vadd.f32 %v1991_v23, %v1990_v39  ;;  %v1893_v14 = vadd.f32 %v1892_v41, %v1891_v2 }
 0x206   : > { %v1994_v43 = vadd.f32 %v1993_v62, %v1992_v21 }
 0x212   : > { %v2348_v44 = vpop.f32.mrf.mxu1 }
 0x213   : > { %v2206_v5 = vpack.c.bf16 %v2348_v44, %v2348_v44 }
 0x214   : > { %v1615_v51 = vpop.f32.mrf.mxu1 }
 0x215   : > { %1813 = vst.msk [vmem:[%s3168_s29 + $0x58] sm:$0xf] %vm1790_vm15, %v2206_v5  ;;  %v2204_v54 = vpack.c.bf16 %v1615_v51, %v1615_v51 }
 0x216   : > { %v2349_v45 = vpop.f32.mrf.mxu1 }
 0x217   : > { %1811 = vst.msk [vmem:[%s3168_s29 + $0x50] sm:$0xf] %vm1790_vm15, %v2204_v54  ;;  %v2207_v56 = vpack.c.bf16 %v2349_v45, %v2349_v45  ;;  %v1673_v48 = vpack.c.bf16 %v2349_v45, %v2348_v44 }
 0x218   : > { %v1618_v49 = vpop.f32.mrf.mxu1 }
 0x219   : > { %1814 = vst.msk [vmem:[%s3168_s29 + $0x5c] sm:$0xf] %vm1790_vm15, %v2207_v56  ;;  %v2205_v29 = vpack.c.bf16 %v1618_v49, %v1618_v49  ;;  %v1672_v28 = vpack.c.bf16 %v1618_v49, %v1615_v51  ;;  %v1845_v6 = vunpack.c.l.bf16 %v1673_v48  ;;  %v1846_v15 = vunpack.c.h.bf16 %v1673_v48 }
 0x21b   : > { %1812 = vst.msk [vmem:[%s3168_s29 + $0x54] sm:$0xf] %vm1790_vm15, %v2205_v29  ;;  %v1843_v60 = vunpack.c.l.bf16 %v1672_v28  ;;  %v1844_v63 = vunpack.c.h.bf16 %v1672_v28  ;;  %v1946_v26 = vmul.f32 %v1845_v6, %v1845_v6  ;;  %v1898_v20 = vsel %vm1164_vm6, %v1845_v6, 0.0 }
 0x21c   : > { %v1947_v42 = vmul.f32 %v1846_v15, %v1846_v15  ;;  %v1900_v1 = vsel %vm1164_vm6, %v1846_v15, 0.0 }
 0x21d   : > { %v1944_v12 = vmul.f32 %v1843_v60, %v1843_v60  ;;  %v1894_v47 = vsel %vm1164_vm6, %v1843_v60, 0.0  ;;  %v1945_v3 = vmul.f32 %v1844_v63, %v1844_v63  ;;  %v1896_v61 = vsel %vm1164_vm6, %v1844_v63, 0.0 }
 0x21e   : > { %v1895_v18 = vadd.f32 %v1894_v47, %v1893_v14  ;;  %v1999_v30 = vsel %vm1164_vm6, %v1946_v26, 0.0  ;;  %v2001_v7 = vsel %vm1164_vm6, %v1947_v42, 0.0 }
 0x21f   : > { %v1995_v58 = vsel %vm1164_vm6, %v1944_v12, 0.0  ;;  %v1997_v40 = vsel %vm1164_vm6, %v1945_v3, 0.0 }
 0x220   : > { %v1996_v53 = vadd.f32 %v1995_v58, %v1994_v43  ;;  %v1897_v24 = vadd.f32 %v1896_v61, %v1895_v18 }
 0x222   : > { %v1998_v25 = vadd.f32 %v1997_v40, %v1996_v53  ;;  %v1899_v11 = vadd.f32 %v1898_v20, %v1897_v24 }
 0x224   : > { %v2000_v55 = vadd.f32 %v1999_v30, %v1998_v25  ;;  %v1901_v10 = vadd.f32 %v1900_v1, %v1899_v11 }
 0x226   : > { %v2002_v13 = vadd.f32 %v2001_v7, %v2000_v55 }
 0x232   : > { %v2352_v36 = vpop.f32.mrf.mxu1 }
 0x233   : > { %v2210_v17 = vpack.c.bf16 %v2352_v36, %v2352_v36 }
 0x234   : > { %v1631_v32 = vpop.f32.mrf.mxu1 }
 0x235   : > { %1817 = vst.msk [vmem:[%s3168_s29 + $0x68] sm:$0xf] %vm1790_vm15, %v2210_v17  ;;  %v2208_v0 = vpack.c.bf16 %v1631_v32, %v1631_v32 }
 0x236   : > { %v2353_v16 = vpop.f32.mrf.mxu1 }
 0x237   : > { %1815 = vst.msk [vmem:[%s3168_s29 + $0x60] sm:$0xf] %vm1790_vm15, %v2208_v0  ;;  %v2211_v8 = vpack.c.bf16 %v2353_v16, %v2353_v16  ;;  %v1675_v34 = vpack.c.bf16 %v2353_v16, %v2352_v36 }
 0x238   : > { %v1634_v4 = vpop.f32.mrf.mxu1 }
 0x239   : > { %1818 = vst.msk [vmem:[%s3168_s29 + $0x6c] sm:$0xf] %vm1790_vm15, %v2211_v8  ;;  %v2209_v46 = vpack.c.bf16 %v1634_v4, %v1634_v4  ;;  %v1674_v22 = vpack.c.bf16 %v1634_v4, %v1631_v32  ;;  %v1849_v33 = vunpack.c.l.bf16 %v1675_v34  ;;  %v1850_v39 = vunpack.c.h.bf16 %v1675_v34 }
 0x23b   : > { %1816 = vst.msk [vmem:[%s3168_s29 + $0x64] sm:$0xf] %vm1790_vm15, %v2209_v46  ;;  %v1847_v52 = vunpack.c.l.bf16 %v1674_v22  ;;  %v1848_v59 = vunpack.c.h.bf16 %v1674_v22  ;;  %v1950_v21 = vmul.f32 %v1849_v33, %v1849_v33  ;;  %v1906_v5 = vsel %vm1164_vm6, %v1849_v33, 0.0 }
 0x23c   : > { %v1951_v45 = vmul.f32 %v1850_v39, %v1850_v39  ;;  %v1908_v17 = vsel %vm1164_vm6, %v1850_v39, 0.0 }
 0x23d   : > { %v1948_v57 = vmul.f32 %v1847_v52, %v1847_v52  ;;  %v1902_v9 = vsel %vm1164_vm6, %v1847_v52, 0.0  ;;  %v1949_v35 = vmul.f32 %v1848_v59, %v1848_v59  ;;  %v1904_v27 = vsel %vm1164_vm6, %v1848_v59, 0.0 }
 0x23e   : > { %v1903_v50 = vadd.f32 %v1902_v9, %v1901_v10  ;;  %v2007_v36 = vsel %vm1164_vm6, %v1950_v21, 0.0  ;;  %v2009_v60 = vsel %vm1164_vm6, %v1951_v45, 0.0 }
 0x23f   : > { %v2003_v37 = vsel %vm1164_vm6, %v1948_v57, 0.0  ;;  %v2005_v14 = vsel %vm1164_vm6, %v1949_v35, 0.0 }
 0x240   : > { %v2004_v31 = vadd.f32 %v2003_v37, %v2002_v13  ;;  %v1905_v41 = vadd.f32 %v1904_v27, %v1903_v50 }
 0x242   : > { %v2006_v43 = vadd.f32 %v2005_v14, %v2004_v31  ;;  %v1907_v56 = vadd.f32 %v1906_v5, %v1905_v41 }
 0x244   : > { %v2008_v28 = vadd.f32 %v2007_v36, %v2006_v43  ;;  %v1909_v8 = vadd.f32 %v1908_v17, %v1907_v56 }
 0x246   : > { %v2010_v47 = vadd.f32 %v2009_v60, %v2008_v28 }
 0x24f   : > { %v2356_v19 = vpop.f32.mrf.mxu1 }
 0x250   : > { %v2214_v38 = vpack.c.bf16 %v2356_v19, %v2356_v19 }
 0x251   : > { %v1647_v2 = vpop.f32.mrf.mxu1 }
 0x252   : > { %1821 = vst.msk [vmem:[%s3168_s29 + $0x78] sm:$0xf] %vm1790_vm15, %v2214_v38  ;;  %v2212_v23 = vpack.c.bf16 %v1647_v2, %v1647_v2 }
 0x253   : > { %v2357_v62 = vpop.f32.mrf.mxu1 }
 0x254   : > { %1819 = vst.msk [vmem:[%s3168_s29 + $0x70] sm:$0xf] %vm1790_vm15, %v2212_v23  ;;  %v2215_v44 = vpack.c.bf16 %v2357_v62, %v2357_v62  ;;  %v1677_v51 = vpack.c.bf16 %v2357_v62, %v2356_v19 }
 0x255   : > { %v1650_v54 = vpop.f32.mrf.mxu1 }
 0x256   : > { %1822 = vst.msk [vmem:[%s3168_s29 + $0x7c] sm:$0xf] %vm1790_vm15, %v2215_v44  ;;  %v1676_v49 = vpack.c.bf16 %v1650_v54, %v1647_v2  ;;  %v2213_v29 = vpack.c.bf16 %v1650_v54, %v1650_v54  ;;  %v1853_v32 = vunpack.c.l.bf16 %v1677_v51  ;;  %v1854_v4 = vunpack.c.h.bf16 %v1677_v51 }
 0x258   : > { %1820 = vst.msk [vmem:[%s3168_s29 + $0x74] sm:$0xf] %vm1790_vm15, %v2213_v29  ;;  %v1851_v0 = vunpack.c.l.bf16 %v1676_v49  ;;  %v1852_v16 = vunpack.c.h.bf16 %v1676_v49  ;;  %v1954_v58 = vmul.f32 %v1853_v32, %v1853_v32  ;;  %v1914_v53 = vsel %vm1164_vm6, %v1853_v32, 0.0 }
 0x259   : > { %v1955_v61 = vmul.f32 %v1854_v4, %v1854_v4  ;;  %v1916_v40 = vsel %vm1164_vm6, %v1854_v4, 0.0 }
 0x25a   : > { %v1910_v46 = vsel %vm1164_vm6, %v1851_v0, 0.0  ;;  %v1952_v12 = vmul.f32 %v1851_v0, %v1851_v0  ;;  %v1953_v48 = vmul.f32 %v1852_v16, %v1852_v16  ;;  %v1912_v18 = vsel %vm1164_vm6, %v1852_v16, 0.0 }
 0x25b   : > { %v1911_v63 = vadd.f32 %v1910_v46, %v1909_v8  ;;  %v2015_v52 = vsel %vm1164_vm6, %v1954_v58, 0.0  ;;  %v2017_v11 = vsel %vm1164_vm6, %v1955_v61, 0.0 }
 0x25c   : > { %v2011_v6 = vsel %vm1164_vm6, %v1952_v12, 0.0  ;;  %v2013_v24 = vsel %vm1164_vm6, %v1953_v48, 0.0 }
 0x25d   : > { %v1913_v3 = vadd.f32 %v1912_v18, %v1911_v63  ;;  %v2012_v22 = vadd.f32 %v2011_v6, %v2010_v47 }
 0x25f   : > { %v1915_v15 = vadd.f32 %v1914_v53, %v1913_v3  ;;  %v2014_v26 = vadd.f32 %v2013_v24, %v2012_v22 }
 0x261   : > { %v1917_v25 = vadd.f32 %v1916_v40, %v1915_v15  ;;  %v2016_v20 = vadd.f32 %v2015_v52, %v2014_v26 }
 0x263   : > { %v1918_v42 = vrot.slane %v1917_v25, 4  ;;  %v2018_v30 = vadd.f32 %v2017_v11, %v2016_v20 }
 0x265   : > { %v1919_v57 = vadd.f32 %v1918_v42, %v1917_v25  ;;  %v2019_v55 = vrot.slane %v2018_v30, 4 }
 0x267   : > { %v1920_v1 = vrot.slane %v1919_v57, 2  ;;  %v2020_v34 = vadd.f32 %v2019_v55, %v2018_v30 }
 0x269   : > { %v1921_v59 = vadd.f32 %v1920_v1, %v1919_v57  ;;  %v2021_v9 = vrot.slane %v2020_v34, 2 }
 0x26b   : > { %v1922_v10 = vrot.slane %v1921_v59, 1  ;;  %v2022_v7 = vadd.f32 %v2021_v9, %v2020_v34 }
 0x26d   : > { %v2023_v37 = vrot.slane %v2022_v7, 1  ;;  %v1923_v50 = vadd.f32 %v1922_v10, %v1921_v59 }
 0x26f   : > { %v2024_v13 = vadd.f32 %v2023_v37, %v2022_v7 }
 0x271   : > { %v2026_v33 = vsel %vm580_vm0, %v1923_v50, %v2024_v13 }
 0x272   : > { %2028 = vst.msk [vmem:[%s235_s7] sm:$0x3] %vm2027_vm1, %v2026_v33 }
 0x273 PF: > { %s16_s18 = sadd.s32 1, %s2400_s18  }
 0x274   : > { %p13_p4 = scmp.ge.s32.totalorder %s16_s18, 4  }
 0x276   :  { %15 = sbr.rel (!%p13_p4) target bundleno = 1 (0x1), region = 78 }

// kernel: double_conv_pallas.3
= control target key start
LH: loop header
LB: loop body
LE: loop exit
PB: predicated region body
PF: predicated region fallthrough
CT: control target
= control target key end

     0   :  { %s2218_s12 = smov 0   ;;  %s2942_s0 = inlined_call_operand.vmem [shape: bf16[2,16,16,4], index: 0, kind: input, shape index: {}]   ;;  %s2943_s1 = inlined_call_operand.vmem [shape: bf16[36,8], index: 1, kind: input, shape index: {}]   ;;  %s2944_s2 = inlined_call_operand.vmem [shape: bf16[2,16,16,8], index: 2, kind: output, shape index: {0}]   ;;  %s2945_s3 = inlined_call_operand.vmem [shape: f32[2,2,8], index: 3, kind: output, shape index: {1}]  }
   0x1 LB: > { %s1967_s13 = sadd.s32 4294967295, %s2187_s12   ;;  %p1971_p0 = scmp.ge.s32.totalorder %s2187_s12, 1  ;;  %s2187_s12 = sphi %s2218_s12, %s14_s12  }
   0x2   : > { %p140_p1 = scmp.lt.s32.totalorder %s2187_s12, 3 }
   0x4   : > { %p141_p2 = pnand %p1971_p0, %p140_p1 }
   0x5   : > { %p168_p3 = scmp.lt.s32.totalorder (!%p141_p2), %s1967_s13, 1  ;;  %s2190_s18 = smov (!%p141_p2), 8  }
   0x6   : > { %144 = sbr.rel (%p141_p2) target bundleno = 619 (0x26b), region = 28  ;;  %s2191_s19 = smov (!%p141_p2), 4  }
   0x7   : > { %s2192_s20 = smov (!%p141_p2), 12   ;;  %s2193_s21 = smov (!%p141_p2), 24  }
   0x8   : > { %s2194_s22 = smov (!%p141_p2), 20   ;;  %s2195_s23 = smov (!%p141_p2), 16  }
   0x9   : > { %s2196_s24 = smov (!%p141_p2), 28   ;;  %s2197_s27 = smov (!%p141_p2), 32  }
   0xb   : > { %vm448_vm0 = vcmask 1040384   ;;  %vm449_vm1 = vsmask.f32 256  ;;  %v2189_v0 = vmov 0   ;;  %vm742_vm3 = vcmask 1046528   ;;  %s2949_s13 = smov (!%p168_p3, %s1967_s13), 1 }
   0xc   : > { %v298_v1 = vrot.slane %v2189_v0, 7  ;;  %vm2227_vm2 = vmand %vm448_vm0, %vm449_vm1  ;;  %vm485_vm4 = vsmask.f32 7424  ;;  %s2046_s14 = sshll.u32 %s2949_s13, 7  ;;  %vm1349_vm5 = vcmask 1041408   ;;  %vm1032_vm6 = vcmask 31744  }
   0xd   : > { %s2251_s17 = scalar_lea.vmem %s2942_s0, %s2046_s14  ;;  %vm1065_vm7 = vcmask 64512   ;;  %vm1098_vm8 = vcmask 97280   ;;  %vm1131_vm9 = vcmask 130048   ;;  %vm1164_vm10 = vcmask 162816   ;;  %s2782_s7 = scalar_lea.vmem %s2944_s2, %s2046_s14 }
   0xe   : > { %v2233_v3 = vsel %vm2227_vm2, 0, %v298_v1  ;;  %v468_v4 = vsel %vm2227_vm2, %v298_v1, 0  ;;  %v2162_v13 = vld [vmem:[%s2251_s17 + $0x8] sm:$0xff]   ;;  %v2163_v15 = vld [vmem:[%s2251_s17] sm:$0xff]   ;;  %v2164_v21 = vld [vmem:[%s2251_s17 + $0x10] sm:$0xff]   ;;  %vm1197_vm11 = vcmask 195584  }
   0xf   : > { %v743_v5 = vrot.slane %v2233_v3, 1  ;;  %v744_v6 = vrot.slane %v468_v4, 1  ;;  %v487_v7 = vshrl.u32 %v2233_v3, 16  ;;  %v489_v8 = vshll.u32 %v2233_v3, 16  ;;  %v2165_v52 = vld [vmem:[%s2251_s17 + $0x18] sm:$0xff]   ;;  %s1976_s8 = sshll.u32 %s2949_s13, 1 }
  0x10   : > { %v494_v9 = vshll.u32 %v468_v4, 16  ;;  %v310_v16 = vshrl.u32 %v2162_v13, 16  ;;  %v313_v17 = vshll.u32 %v2162_v13, 16  ;;  %v303_v19 = vshrl.u32 %v2163_v15, 16  ;;  %s181_s11 = scalar_lea.vmem %s2945_s3, %s1976_s8 }
  0x11   : > { %v2244_v10 = vsel %vm742_vm3, %v743_v5, %v744_v6  ;;  %v491_v11 = vrot.slane %v489_v8, 1  ;;  %v306_v20 = vshll.u32 %v2163_v15, 16  ;;  %v317_v24 = vshrl.u32 %v2164_v21, 16  ;;  %v2166_v6 = vld [vmem:[%s2251_s17 + $0x20] sm:$0xff]  }
  0x12   : > { %791 = vrot.lane.b32.xlu1 %v2244_v10, %s2190_s18  ;;  %v496_v12 = vrot.slane %v494_v9, 1  ;;  %v312_v22 = vrot.slane %v310_v16, 7  ;;  %v305_v23 = vrot.slane %v303_v19, 7  ;;  %v320_v25 = vshll.u32 %v2164_v21, 16  ;;  %v2173_v19 = vld [vmem:[%s2943_s1 + $0x8] sm:$0xff]  }
  0x13   : > { %v492_v14 = vor.u32 %v491_v11, %v487_v7  ;;  %v319_v28 = vrot.slane %v317_v24, 7  ;;  %v324_v60 = vshrl.u32 %v2165_v52, 16  ;;  %v327_v1 = vshll.u32 %v2165_v52, 16 }
  0x14   : > { %v315_v26 = vor.u32 %v313_v17, %v312_v22  ;;  %v308_v27 = vor.u32 %v306_v20, %v305_v23  ;;  %v469_v29 = vsel %vm2227_vm2, %v305_v23, 0  ;;  %v470_v35 = vsel %vm2227_vm2, %v312_v22, 0 }
  0x15   : > { %v2258_v18 = vsel %vm485_vm4, %v492_v14, %v496_v12  ;;  %v322_v32 = vor.u32 %v320_v25, %v319_v28  ;;  %v747_v34 = vrot.slane %v469_v29, 1  ;;  %v506_v39 = vshll.u32 %v469_v29, 16  ;;  %v2171_v12 = vld [vmem:[%s2943_s1 + $0x10] ss:$0 sps:$4 sm:$0x33]   ;;  %v2174_v25 = vld [vmem:[%s2943_s1] sm:$0xff]  }
  0x16   : > { %678 = vrot.lane.b32.xlu0 %v2258_v18, %s2191_s19  ;;  %v2267_v30 = vsel %vm2227_vm2, 0, %v315_v26  ;;  %v2273_v31 = vsel %vm2227_vm2, 0, %v308_v27  ;;  %v750_v43 = vrot.slane %v470_v35, 1  ;;  %v518_v44 = vshll.u32 %v470_v35, 16  ;;  %2143 = vmatprep.subr.msk.bf16.mxu0 %vm1349_vm5, %v2171_v12 }
  0x17   : > { %826 = vrot.lane.b32.xlu1 %v2267_v30, %s2192_s20  ;;  %v746_v33 = vrot.slane %v2273_v31, 1  ;;  %v501_v36 = vshll.u32 %v2273_v31, 16  ;;  %v2283_v37 = vsel %vm2227_vm2, 0, %v322_v32  ;;  %v499_v38 = vshrl.u32 %v2273_v31, 16  ;;  %2144 = vmatprep.subr.msk.bf16.mxu1 %vm1349_vm5, %v2171_v12 }
  0x18   : > { %v513_v40 = vshll.u32 %v2267_v30, 16  ;;  %v749_v42 = vrot.slane %v2267_v30, 1  ;;  %v511_v46 = vshrl.u32 %v2267_v30, 16  ;;  %v525_v48 = vshll.u32 %v2283_v37, 16 }
  0x19   : > { %v503_v41 = vrot.slane %v501_v36, 1  ;;  %v748_v45 = vsel %vm742_vm3, %v746_v33, %v747_v34  ;;  %v508_v50 = vrot.slane %v506_v39, 1  ;;  %v471_v51 = vsel %vm2227_vm2, %v319_v28, 0  ;;  %v2167_v36 = vld [vmem:[%s2251_s17 + $0x28] sm:$0xff]  }
  0x1a   : > { %824 = vrot.lane.b32.xlu0 %v2273_v31, %s2192_s20  ;;  %v515_v47 = vrot.slane %v513_v40, 1  ;;  %v751_v53 = vsel %vm742_vm3, %v749_v42, %v750_v43  ;;  %v520_v54 = vrot.slane %v518_v44, 1  ;;  %v523_v56 = vshrl.u32 %v2283_v37, 16 }
  0x1b   : > { %938 = vrot.lane.b32.xlu1 %v2283_v37, %s2193_s21  ;;  %v504_v49 = vor.u32 %v503_v41, %v499_v38  ;;  %v527_v57 = vrot.slane %v525_v48, 1  ;;  %v530_v58 = vshll.u32 %v471_v51, 16  ;;  %v326_v0 = vrot.slane %v324_v60, 7 }
  0x1c   : > { %v516_v55 = vor.u32 %v515_v47, %v511_v46  ;;  %v752_v7 = vrot.slane %v2283_v37, 1  ;;  %v753_v8 = vrot.slane %v471_v51, 1  ;;  %v331_v11 = vshrl.u32 %v2166_v6, 16 }
  0x1d   : > { %v509_v59 = vsel %vm485_vm4, %v504_v49, %v508_v50  ;;  %v528_v62 = vor.u32 %v527_v57, %v523_v56  ;;  %v532_v63 = vrot.slane %v530_v58, 1  ;;  %v329_v5 = vor.u32 %v327_v1, %v326_v0  ;;  %v2168_v49 = vld [vmem:[%s2251_s17 + $0x30] sm:$0xff]  }
  0x1e   : > { %936 = vrot.lane.b32.xlu0 %v2267_v30, %s2193_s21  ;;  %v521_v61 = vsel %vm485_vm4, %v516_v55, %v520_v54  ;;  %v754_v14 = vsel %vm742_vm3, %v752_v7, %v753_v8  ;;  %v472_v15 = vsel %vm2227_vm2, %v326_v0, 0  ;;  %v333_v16 = vrot.slane %v331_v11, 7  ;;  %v2169_v11 = vld [vmem:[%s2251_s17 + $0x38] sm:$0xff]  }
  0x1f   : > { %793 = vrot.lane.b32.xlu1 %v748_v45, %s2190_s18  ;;  %v533_v4 = vsel %vm485_vm4, %v528_v62, %v532_v63  ;;  %v2315_v9 = vsel %vm2227_vm2, 0, %v329_v5  ;;  %v334_v17 = vshll.u32 %v2166_v6, 16  ;;  %v1351_v20 = vsel %vm1349_vm5, %v2171_v12, 0 }
  0x20   : > { %v537_v13 = vshll.u32 %v2315_v9, 16  ;;  %v535_v21 = vshrl.u32 %v2315_v9, 16  ;;  %v542_v23 = vshll.u32 %v472_v15, 16  ;;  %2100 = vmatpush3.bf16.msra.mxu0 %v1351_v20  ;;  %2140 = vmatpush3.bf16.msra.mxu1 %v1351_v20  ;;  %v755_v32 = vrot.slane %v2315_v9, 1 }
  0x21   : > { %v336_v24 = vor.u32 %v334_v17, %v333_v16  ;;  %2101 = vmatprep.subr.bf16.mxu0 %v2173_v19  ;;  %2138 = vmatprep.subr.bf16.mxu1 %v2173_v19  ;;  %v756_v33 = vrot.slane %v472_v15, 1  ;;  %v473_v35 = vsel %vm2227_vm2, %v333_v16, 0  ;;  %v338_v42 = vshrl.u32 %v2167_v36, 16 }
  0x22   : > { %904 = vrot.lane.b32.xlu0 %v748_v45, %s2194_s22  ;;  %v539_v22 = vrot.slane %v537_v13, 1  ;;  %v544_v27 = vrot.slane %v542_v23, 1  ;;  %v554_v41 = vshll.u32 %v473_v35, 16  ;;  %v341_v46 = vshll.u32 %v2167_v36, 16 }
  0x23   : > { %906 = vrot.lane.b32.xlu1 %v751_v53, %s2194_s22  ;;  %v2339_v28 = vsel %vm2227_vm2, 0, %v336_v24  ;;  %v757_v38 = vsel %vm742_vm3, %v755_v32, %v756_v33  ;;  %v340_v45 = vrot.slane %v338_v42, 7  ;;  %v759_v51 = vrot.slane %v473_v35, 1  ;;  %v2170_v24 = vld [vmem:[%s2251_s17 + $0x40] sm:$0xff]  }
  0x24   : > { %v540_v26 = vor.u32 %v539_v22, %v535_v21  ;;  %2102 = vmatpush3.bf16.msra.mxu0 %v2173_v19  ;;  %2141 = vmatpush3.bf16.msra.mxu1 %v2173_v19  ;;  %v549_v34 = vshll.u32 %v2339_v28, 16  ;;  %v547_v39 = vshrl.u32 %v2339_v28, 16  ;;  %v556_v44 = vrot.slane %v554_v41, 1 }
  0x25   : > { %2103 = vmatprep.subr.bf16.mxu0 %v2174_v25  ;;  %2139 = vmatprep.subr.bf16.mxu1 %v2174_v25  ;;  %v343_v48 = vor.u32 %v341_v46, %v340_v45  ;;  %v758_v50 = vrot.slane %v2339_v28, 1  ;;  %v474_v56 = vsel %vm2227_vm2, %v340_v45, 0  ;;  %v348_v58 = vshll.u32 %v2168_v49, 16 }
  0x26   : > { %680 = vrot.lane.b32.xlu0 %v509_v59, %s2191_s19  ;;  %v545_v29 = vsel %vm485_vm4, %v540_v26, %v544_v27  ;;  %v551_v40 = vrot.slane %v549_v34, 1  ;;  %v762_v6 = vrot.slane %v474_v56, 1  ;;  %v352_v16 = vshrl.u32 %v2169_v11, 16 }
  0x27   : > { %870 = vrot.lane.b32.xlu1 %v521_v61, %s2195_s23  ;;  %v2368_v52 = vsel %vm2227_vm2, 0, %v343_v48  ;;  %v760_v55 = vsel %vm742_vm3, %v758_v50, %v759_v51  ;;  %v355_v21 = vshll.u32 %v2169_v11, 16  ;;  %v362_v36 = vshll.u32 %v2170_v24, 16  ;;  %v2172_v50 = vld [vmem:[%s2251_s17 + $0x48] sm:$0xff]  }
  0x28   : > { %2104 = vmatpush3.bf16.msra.mxu0 %v2174_v25  ;;  %2142 = vmatpush3.bf16.msra.mxu1 %v2174_v25  ;;  %v552_v43 = vor.u32 %v551_v40, %v547_v39  ;;  %v561_v54 = vshll.u32 %v2368_v52, 16  ;;  %v761_v5 = vrot.slane %v2368_v52, 1  ;;  %v354_v20 = vrot.slane %v352_v16, 7 }
  0x29   : > { %vm1230_vm12 = vcmask 228352   ;;  %vm1263_vm13 = vcmask 261120   ;;  %vm1316_vm14 = vcmask 293888   ;;  %vm1642_vm15 = vcmask 60416  }
  0x2a   : > { %868 = vrot.lane.b32.xlu0 %v509_v59, %s2195_s23  ;;  %v557_v47 = vsel %vm485_vm4, %v552_v43, %v556_v44  ;;  %v559_v59 = vshrl.u32 %v2368_v52, 16  ;;  %v563_v60 = vrot.slane %v561_v54, 1  ;;  %v763_v12 = vsel %vm742_vm3, %v761_v5, %v762_v6  ;;  %v2175_v5 = vld [vmem:[%s2251_s17 + $0x50] sm:$0xff]  }
  0x2b   : > { %970 = vrot.lane.b32.xlu1 %v533_v4, %s2196_s24  ;;  %v357_v23 = vor.u32 %v355_v21, %v354_v20  ;;  %v476_v34 = vsel %vm2227_vm2, %v354_v20, 0  ;;  %v376_v21 = vshll.u32 %v2175_v5, 16  ;;  %vm1879_vm1 = vcmask 58368  }
  0x2c   : > { %v564_v63 = vor.u32 %v563_v60, %v559_v59  ;;  %v590_v40 = vshll.u32 %v476_v34, 16 }
  0x2d   : > { %v2412_v27 = vsel %vm2227_vm2, 0, %v357_v23 }
  0x2e   : > { %968 = vrot.lane.b32.xlu0 %v521_v61, %s2196_s24  ;;  %v585_v32 = vshll.u32 %v2412_v27, 16  ;;  %v592_v43 = vrot.slane %v590_v40, 1  ;;  %v767_v46 = vrot.slane %v2412_v27, 1 }
  0x2f   : > { %682 = vrot.lane.b32.xlu1 %v521_v61, %s2191_s19  ;;  %v566_v61 = vshll.u32 %v474_v56, 16  ;;  %v366_v56 = vshrl.u32 %v2172_v50, 16 }
  0x30   : > { %v587_v39 = vrot.slane %v585_v32, 1 }
  0x31   : > { %v568_v0 = vrot.slane %v566_v61, 1  ;;  %v368_v61 = vrot.slane %v366_v56, 7 }
  0x32   : > { %1000 = vrot.lane.b32.xlu0 %v751_v53, %s2197_s27 }
  0x33   : > { %684 = vrot.lane.b32.xlu1 %v533_v4, %s2191_s19 }
  0x36   : > { %1002 = vrot.lane.b32.xlu0 %v754_v14, %s2197_s27 }
  0x37   : > { %797 = vrot.lane.b32.xlu1 %v754_v14, %s2190_s18 }
  0x3a   : > { %795 = vrot.lane.b32.xlu0 %v751_v53, %s2190_s18  ;;  %v345_v53 = vshrl.u32 %v2168_v49, 16 }
  0x3b   : > { %830 = vrot.lane.b32.xlu1 %v2315_v9, %s2192_s20 }
  0x3c   : > { %v347_v57 = vrot.slane %v345_v53, 7 }
  0x3e   : > { %828 = vrot.lane.b32.xlu0 %v2283_v37, %s2192_s20  ;;  %v350_v62 = vor.u32 %v348_v58, %v347_v57  ;;  %v475_v8 = vsel %vm2227_vm2, %v347_v57, 0 }
  0x3f   : > { %874 = vrot.lane.b32.xlu1 %v545_v29, %s2195_s23  ;;  %v578_v15 = vshll.u32 %v475_v8, 16  ;;  %v765_v26 = vrot.slane %v475_v8, 1 }
  0x40   : > { %v2383_v1 = vsel %vm2227_vm2, 0, %v350_v62  ;;  %v369_v62 = vshll.u32 %v2172_v50, 16 }
  0x41   : > { %v573_v7 = vshll.u32 %v2383_v1, 16  ;;  %v571_v13 = vshrl.u32 %v2383_v1, 16  ;;  %v580_v19 = vrot.slane %v578_v15, 1  ;;  %v764_v25 = vrot.slane %v2383_v1, 1 }
  0x42   : > { %872 = vrot.lane.b32.xlu0 %v533_v4, %s2195_s23  ;;  %v569_v4 = vsel %vm485_vm4, %v564_v63, %v568_v0 }
  0x43   : > { %910 = vrot.lane.b32.xlu1 %v757_v38, %s2194_s22  ;;  %v766_v33 = vsel %vm742_vm3, %v764_v25, %v765_v26 }
  0x46   : > { %908 = vrot.lane.b32.xlu0 %v754_v14, %s2194_s22  ;;  %v575_v14 = vrot.slane %v573_v7, 1 }
  0x47   : > { %942 = vrot.lane.b32.xlu1 %v2339_v28, %s2193_s21 }
  0x48   : > { %v576_v17 = vor.u32 %v575_v14, %v571_v13  ;;  %v373_v13 = vshrl.u32 %v2175_v5, 16 }
  0x4a   : > { %940 = vrot.lane.b32.xlu0 %v2315_v9, %s2193_s21  ;;  %v581_v22 = vsel %vm485_vm4, %v576_v17, %v580_v19  ;;  %v478_v19 = vsel %vm2227_vm2, %v368_v61, 0  ;;  %v375_v20 = vrot.slane %v373_v13, 7 }
  0x4b   : > { %974 = vrot.lane.b32.xlu1 %v557_v47, %s2196_s24  ;;  %v614_v25 = vshll.u32 %v478_v19, 16 }
  0x4e   : > { %972 = vrot.lane.b32.xlu0 %v545_v29, %s2196_s24 }
  0x4f   : > { %686 = vrot.lane.b32.xlu1 %v545_v29, %s2191_s19  ;;  %v359_v29 = vshrl.u32 %v2170_v24, 16 }
  0x51   : > { %v361_v35 = vrot.slane %v359_v29, 7  ;;  %v378_v29 = vor.u32 %v376_v21, %v375_v20 }
  0x52   : > { %1004 = vrot.lane.b32.xlu0 %v757_v38, %s2197_s27 }
  0x53   : > { %688 = vrot.lane.b32.xlu1 %v557_v47, %s2191_s19  ;;  %v364_v41 = vor.u32 %v362_v36, %v361_v35  ;;  %v477_v49 = vsel %vm2227_vm2, %v361_v35, 0 }
  0x54   : > { %v771_v11 = vrot.slane %v477_v49, 1 }
  0x55   : > { %v2427_v44 = vsel %vm2227_vm2, 0, %v364_v41  ;;  %v2487_v41 = vsel %vm2227_vm2, 0, %v378_v29 }
  0x56   : > { %1006 = vrot.lane.b32.xlu0 %v760_v55, %s2197_s27  ;;  %v597_v48 = vshll.u32 %v2427_v44, 16  ;;  %v595_v53 = vshrl.u32 %v2427_v44, 16  ;;  %v770_v8 = vrot.slane %v2427_v44, 1  ;;  %v621_v50 = vshll.u32 %v2487_v41, 16 }
  0x57   : > { %801 = vrot.lane.b32.xlu1 %v760_v55, %s2190_s18 }
  0x58   : > { %v599_v54 = vrot.slane %v597_v48, 1  ;;  %v2467_v17 = vsel %vm742_vm3, %v770_v8, %v771_v11 }
  0x5a   : > { %799 = vrot.lane.b32.xlu0 %v757_v38, %s2190_s18  ;;  %v583_v38 = vshrl.u32 %v2412_v27, 16  ;;  %v600_v59 = vor.u32 %v599_v54, %v595_v53  ;;  %v479_v54 = vsel %vm2227_vm2, %v375_v20, 0 }
  0x5b   : > { %834 = vrot.lane.b32.xlu1 %v2368_v52, %s2192_s20  ;;  %v777_v29 = vrot.slane %v479_v54, 1 }
  0x5c   : > { %v588_v42 = vor.u32 %v587_v39, %v583_v38  ;;  %v616_v38 = vrot.slane %v614_v25, 1 }
  0x5e   : > { %832 = vrot.lane.b32.xlu0 %v2339_v28, %s2192_s20  ;;  %v593_v45 = vsel %vm485_vm4, %v588_v42, %v592_v43 }
  0x5f   : > { %878 = vrot.lane.b32.xlu1 %v569_v4, %s2195_s23 }
  0x62   : > { %876 = vrot.lane.b32.xlu0 %v557_v47, %s2195_s23  ;;  %v768_v47 = vrot.slane %v476_v34, 1 }
  0x63   : > { %914 = vrot.lane.b32.xlu1 %v763_v12, %s2194_s22 }
  0x64   : > { %v769_v51 = vsel %vm742_vm3, %v767_v46, %v768_v47  ;;  %v774_v47 = vrot.slane %v478_v19, 1 }
  0x66   : > { %912 = vrot.lane.b32.xlu0 %v760_v55, %s2194_s22  ;;  %v602_v55 = vshll.u32 %v477_v49, 16 }
  0x67   : > { %946 = vrot.lane.b32.xlu1 %v2383_v1, %s2193_s21 }
  0x68   : > { %v604_v60 = vrot.slane %v602_v55, 1  ;;  %v2176_v55 = vld [vmem:[%s2251_s17 + $0x58] sm:$0xff]  }
  0x6a   : > { %944 = vrot.lane.b32.xlu0 %v2368_v52, %s2193_s21  ;;  %v2450_v63 = vsel %vm485_vm4, %v600_v59, %v604_v60  ;;  %v619_v60 = vshrl.u32 %v2487_v41, 16 }
  0x6b   : > { %978 = vrot.lane.b32.xlu1 %v581_v22, %s2196_s24 }
  0x6e   : > { %976 = vrot.lane.b32.xlu0 %v569_v4, %s2196_s24 }
  0x6f   : > { %690 = vrot.lane.b32.xlu1 %v569_v4, %s2191_s19  ;;  %v371_v4 = vor.u32 %v369_v62, %v368_v61  ;;  %v623_v61 = vrot.slane %v621_v50, 1  ;;  %v626_v62 = vshll.u32 %v479_v54, 16 }
  0x71   : > { %v628_v13 = vrot.slane %v626_v62, 1 }
  0x72   : > { %1008 = vrot.lane.b32.xlu0 %v763_v12, %s2197_s27 }
  0x73   : > { %692 = vrot.lane.b32.xlu1 %v581_v22, %s2191_s19 }
  0x76   : > { %1010 = vrot.lane.b32.xlu0 %v766_v33, %s2197_s27 }
  0x77   : > { %805 = vrot.lane.b32.xlu1 %v766_v33, %s2190_s18 }
  0x7a   : > { %803 = vrot.lane.b32.xlu0 %v763_v12, %s2190_s18  ;;  %v2461_v12 = vsel %vm2227_vm2, 0, %v371_v4  ;;  %v380_v4 = vshrl.u32 %v2176_v55, 16 }
  0x7b   : > { %838 = vrot.lane.b32.xlu1 %v2412_v27, %s2192_s20  ;;  %v609_v15 = vshll.u32 %v2461_v12, 16  ;;  %v607_v23 = vshrl.u32 %v2461_v12, 16  ;;  %v773_v46 = vrot.slane %v2461_v12, 1 }
  0x7d   : > { %v611_v24 = vrot.slane %v609_v15, 1  ;;  %v382_v15 = vrot.slane %v380_v4, 7 }
  0x7e   : > { %836 = vrot.lane.b32.xlu0 %v2383_v1, %s2192_s20 }
  0x7f   : > { %882 = vrot.lane.b32.xlu1 %v593_v45, %s2195_s23  ;;  %v612_v36 = vor.u32 %v611_v24, %v607_v23  ;;  %v2177_v23 = vld [vmem:[%s2251_s17 + $0x60] sm:$0xff]  }
  0x81   : > { %v617_v49 = vsel %vm485_vm4, %v612_v36, %v616_v38 }
  0x82   : > { %880 = vrot.lane.b32.xlu0 %v581_v22, %s2195_s23 }
  0x83   : > { %918 = vrot.lane.b32.xlu1 %v769_v51, %s2194_s22 }
  0x84   : > { %v792_v57 = vpop.permute.xlu1 %791 }
  0x86   : > { %916 = vrot.lane.b32.xlu0 %v766_v33, %s2194_s22 }
  0x87   : > { %950 = vrot.lane.b32.xlu1 %v2427_v44, %s2193_s21 }
  0x88   : > { %v679_v58 = vpop.permute.xlu0 %678 }
  0x89   : > { %v827_v0 = vpop.permute.xlu1 %826  ;;  %v1034_v32 = vsel %vm1032_vm6, %v2233_v3, %v679_v58  ;;  %v775_v58 = vsel %vm742_vm3, %v773_v46, %v774_v47 }
  0x8a   : > { %948 = vrot.lane.b32.xlu0 %v2412_v27, %s2193_s21  ;;  %v1067_v39 = vsel %vm1065_vm7, %v1034_v32, %v792_v57 }
  0x8b   : > { %982 = vrot.lane.b32.xlu1 %v2450_v63, %s2196_s24 }
  0x8c   : > { %v825_v6 = vpop.permute.xlu0 %824 }
  0x8d   : > { %v2456_v7 = vpop.permute.xlu1 %938 }
  0x8e   : > { %980 = vrot.lane.b32.xlu0 %v593_v45, %s2196_s24 }
  0x8f   : > { %694 = vrot.lane.b32.xlu1 %v593_v45, %s2191_s19 }
  0x90   : > { %v937_v14 = vpop.permute.xlu0 %936 }
  0x91   : > { %v794_v16 = vpop.permute.xlu1 %793 }
  0x92   : > { %1012 = vrot.lane.b32.xlu0 %v769_v51, %s2197_s27 }
  0x93   : > { %696 = vrot.lane.b32.xlu1 %v2450_v63, %s2191_s19 }
  0x94   : > { %v905_v22 = vpop.permute.xlu0 %904 }
  0x95   : > { %v907_v26 = vpop.permute.xlu1 %906 }
  0x96   : > { %1014 = vrot.lane.b32.xlu0 %v2467_v17, %s2197_s27 }
  0x97   : > { %809 = vrot.lane.b32.xlu1 %v2467_v17, %s2190_s18 }
  0x98   : > { %v681_v33 = vpop.permute.xlu0 %680 }
  0x99   : > { %v1036_v34 = vsel %vm1032_vm6, %v2273_v31, %v681_v33  ;;  %v871_v40 = vpop.permute.xlu1 %870  ;;  %v1100_v31 = vsel %vm1098_vm8, %v1067_v39, %v825_v6  ;;  %v387_v33 = vshrl.u32 %v2177_v23, 16  ;;  %v480_v39 = vsel %vm2227_vm2, %v382_v15, 0 }
  0x9a   : > { %v1069_v35 = vsel %vm1065_vm7, %v1036_v34, %v794_v16  ;;  %807 = vrot.lane.b32.xlu0 %v769_v51, %s2190_s18  ;;  %v383_v16 = vshll.u32 %v2176_v55, 16  ;;  %v638_v46 = vshll.u32 %v480_v39, 16 }
  0x9b   : > { %v1102_v42 = vsel %vm1098_vm8, %v1069_v35, %v827_v0  ;;  %842 = vrot.lane.b32.xlu1 %v2461_v12, %s2192_s20 }
  0x9c   : > { %v869_v43 = vpop.permute.xlu0 %868  ;;  %v1135_v51 = vsel %vm1131_vm9, %v1102_v42, %v871_v40  ;;  %v389_v40 = vrot.slane %v387_v33, 7 }
  0x9d   : > { %v1133_v45 = vsel %vm1131_vm9, %v1100_v31, %v869_v43  ;;  %v971_v53 = vpop.permute.xlu1 %970  ;;  %v1168_v59 = vsel %vm1164_vm10, %v1135_v51, %v907_v26  ;;  %v776_v26 = vrot.slane %v2487_v41, 1  ;;  %v390_v31 = vshll.u32 %v2177_v23, 16 }
  0x9e   : > { %v1166_v48 = vsel %vm1164_vm10, %v1133_v45, %v905_v22  ;;  %840 = vrot.lane.b32.xlu0 %v2427_v44, %s2192_s20  ;;  %v1201_v8 = vsel %vm1197_vm11, %v1168_v59, %v2456_v7  ;;  %v385_v22 = vor.u32 %v383_v16, %v382_v15  ;;  %v640_v51 = vrot.slane %v638_v46, 1 }
  0x9f   : > { %v1199_v57 = vsel %vm1197_vm11, %v1166_v48, %v937_v14  ;;  %886 = vrot.lane.b32.xlu1 %v617_v49, %s2195_s23  ;;  %v1234_v19 = vsel %vm1230_vm12, %v1201_v8, %v971_v53  ;;  %v778_v38 = vsel %vm742_vm3, %v776_v26, %v777_v29  ;;  %v392_v48 = vor.u32 %v390_v31, %v389_v40 }
  0xa0   : > { %v969_v56 = vpop.permute.xlu0 %968  ;;  %v2535_v32 = vsel %vm2227_vm2, 0, %v385_v22  ;;  %v481_v4 = vsel %vm2227_vm2, %v389_v40, 0 }
  0xa1   : > { %v683_v0 = vpop.permute.xlu1 %682  ;;  %v1232_v5 = vsel %vm1230_vm12, %v1199_v57, %v969_v56  ;;  %v633_v35 = vshll.u32 %v2535_v32, 16  ;;  %v631_v43 = vshrl.u32 %v2535_v32, 16  ;;  %v2550_v54 = vsel %vm2227_vm2, 0, %v392_v48 }
  0xa2   : > { %884 = vrot.lane.b32.xlu0 %v2450_v63, %s2195_s23  ;;  %v624_v63 = vor.u32 %v623_v61, %v619_v60  ;;  %v779_v56 = vrot.slane %v2535_v32, 1  ;;  %v780_v57 = vrot.slane %v480_v39, 1  ;;  %v1038_v59 = vsel %vm1032_vm6, %v2267_v30, %v683_v0 }
  0xa3   : > { %922 = vrot.lane.b32.xlu1 %v775_v58, %s2194_s22  ;;  %v635_v45 = vrot.slane %v633_v35, 1  ;;  %v645_v60 = vshll.u32 %v2550_v54, 16  ;;  %v643_v0 = vshrl.u32 %v2550_v54, 16  ;;  %v650_v16 = vshll.u32 %v481_v4, 16 }
  0xa4   : > { %v1001_v6 = vpop.permute.xlu0 %1000  ;;  %v781_v30 = vsel %vm742_vm3, %v779_v56, %v780_v57  ;;  %v783_v48 = vrot.slane %v481_v4, 1 }
  0xa5   : > { %v1265_v11 = vsel %vm1263_vm13, %v1232_v5, %v1001_v6  ;;  %v2519_v14 = vpop.permute.xlu1 %684  ;;  %v636_v50 = vor.u32 %v635_v45, %v631_v43  ;;  %v2178_v5 = vld [vmem:[%s2251_s17 + $0x68] sm:$0xff]   ;;  %v647_v15 = vrot.slane %v645_v60, 1  ;;  %v652_v29 = vrot.slane %v650_v16, 1  ;;  %v2179_v43 = vld [vmem:[%s2251_s17 + $0x70] sm:$0xff]  }
  0xa6   : > { %920 = vrot.lane.b32.xlu0 %v2467_v17, %s2194_s22  ;;  %2105 = vmatprep.mubr.msk.bf16.mxu0 %vm1316_vm14, %v1265_v11  ;;  %v629_v17 = vsel %vm485_vm4, %v624_v63, %v628_v13  ;;  %v1040_v63 = vsel %vm1032_vm6, %v2283_v37, %v2519_v14  ;;  %v394_v22 = vshrl.u32 %v2178_v5, 16  ;;  %v397_v35 = vshll.u32 %v2178_v5, 16 }
  0xa7   : > { %954 = vrot.lane.b32.xlu1 %v2487_v41, %s2193_s21  ;;  %v404_v60 = vshll.u32 %v2179_v43, 16 }
  0xa8   : > { %v1003_v20 = vpop.permute.xlu0 %1002 }
  0xa9   : > { %v1267_v7 = vsel %vm1263_vm13, %v1234_v19, %v1003_v20  ;;  %v798_v21 = vpop.permute.xlu1 %797 }
  0xaa   : > { %952 = vrot.lane.b32.xlu0 %v2461_v12, %s2193_s21  ;;  %2106 = vmatmul.mubr.msk.bf16.vlgmr.msra.gmra.mxu0 %vm1316_vm14, %v1267_v7  ;;  %v1073_v19 = vsel %vm1065_vm7, %v1040_v63, %v798_v21  ;;  %v648_v21 = vor.u32 %v647_v15, %v643_v0 }
  0xab   : > { %986 = vrot.lane.b32.xlu1 %v629_v17, %s2196_s24 }
  0xac   : > { %v796_v24 = vpop.permute.xlu0 %795 }
  0xad   : > { %v831_v25 = vpop.permute.xlu1 %830  ;;  %v1071_v61 = vsel %vm1065_vm7, %v1038_v59, %v796_v24 }
  0xae   : > { %984 = vrot.lane.b32.xlu0 %v617_v49, %s2196_s24  ;;  %v1106_v23 = vsel %vm1098_vm8, %v1073_v19, %v831_v25 }
  0xaf   : > { %698 = vrot.lane.b32.xlu1 %v617_v49, %s2191_s19 }
  0xb0   : > { %v829_v34 = vpop.permute.xlu0 %828 }
  0xb1   : > { %v875_v36 = vpop.permute.xlu1 %874  ;;  %v1104_v6 = vsel %vm1098_vm8, %v1071_v61, %v829_v34  ;;  %v396_v34 = vrot.slane %v394_v22, 7 }
  0xb2   : > { %1016 = vrot.lane.b32.xlu0 %v775_v58, %s2197_s27  ;;  %v1139_v37 = vsel %vm1131_vm9, %v1106_v23, %v875_v36 }
  0xb3   : > { %700 = vrot.lane.b32.xlu1 %v629_v17, %s2191_s19  ;;  %v482_v57 = vsel %vm2227_vm2, %v396_v34, 0 }
  0xb4   : > { %v873_v42 = vpop.permute.xlu0 %872  ;;  %v662_v4 = vshll.u32 %v482_v57, 16  ;;  %v786_v19 = vrot.slane %v482_v57, 1 }
  0xb5   : > { %v911_v47 = vpop.permute.xlu1 %910  ;;  %v1137_v11 = vsel %vm1131_vm9, %v1104_v6, %v873_v42  ;;  %v399_v42 = vor.u32 %v397_v35, %v396_v34 }
  0xb6   : > { %1018 = vrot.lane.b32.xlu0 %v778_v38, %s2197_s27  ;;  %v664_v0 = vrot.slane %v662_v4, 1 }
  0xb7   : > { %813 = vrot.lane.b32.xlu1 %v778_v38, %s2190_s18 }
  0xb8   : > { %v909_v49 = vpop.permute.xlu0 %908 }
  0xb9   : > { %v943_v53 = vpop.permute.xlu1 %942  ;;  %v1170_v13 = vsel %vm1164_vm10, %v1137_v11, %v909_v49  ;;  %v2604_v49 = vsel %vm2227_vm2, 0, %v399_v42 }
  0xba   : > { %811 = vrot.lane.b32.xlu0 %v775_v58, %s2190_s18  ;;  %v641_v58 = vsel %vm485_vm4, %v636_v50, %v640_v51  ;;  %v401_v50 = vshrl.u32 %v2179_v43, 16  ;;  %v785_v16 = vrot.slane %v2604_v49, 1 }
  0xbb   : > { %846 = vrot.lane.b32.xlu1 %v2535_v32, %s2192_s20 }
  0xbc   : > { %v941_v55 = vpop.permute.xlu0 %940  ;;  %v403_v59 = vrot.slane %v401_v50, 7 }
  0xbd   : > { %v975_v62 = vpop.permute.xlu1 %974  ;;  %v1203_v20 = vsel %vm1197_vm11, %v1170_v13, %v941_v55 }
  0xbe   : > { %844 = vrot.lane.b32.xlu0 %v2487_v41, %s2192_s20  ;;  %v406_v6 = vor.u32 %v404_v60, %v403_v59 }
  0xbf   : > { %890 = vrot.lane.b32.xlu1 %v641_v58, %s2195_s23 }
  0xc0   : > { %v973_v8 = vpop.permute.xlu0 %972  ;;  %v2619_v13 = vsel %vm2227_vm2, 0, %v406_v6 }
  0xc1   : > { %v2577_v7 = vpop.permute.xlu1 %686  ;;  %v1236_v24 = vsel %vm1230_vm12, %v1203_v20, %v973_v8  ;;  %v669_v22 = vshll.u32 %v2619_v13, 16  ;;  %v788_v4 = vrot.slane %v2619_v13, 1 }
  0xc2   : > { %888 = vrot.lane.b32.xlu0 %v629_v17, %s2195_s23  ;;  %v1172_v17 = vsel %vm1164_vm10, %v1139_v37, %v911_v47  ;;  %v782_v47 = vrot.slane %v2550_v54, 1  ;;  %v1042_v20 = vsel %vm1032_vm6, %v2315_v9, %v2577_v7  ;;  %v2180_v37 = vld [vmem:[%s2251_s17 + $0x78] sm:$0xff]   ;;  %v787_v9 = vsel %vm742_vm3, %v785_v16, %v786_v19 }
  0xc3   : > { %926 = vrot.lane.b32.xlu1 %v781_v30, %s2194_s22  ;;  %v1205_v25 = vsel %vm1197_vm11, %v1172_v17, %v943_v53  ;;  %v657_v53 = vshll.u32 %v2604_v49, 16  ;;  %v667_v7 = vshrl.u32 %v2619_v13, 16  ;;  %v671_v34 = vrot.slane %v669_v22, 1 }
  0xc4   : > { %v1005_v26 = vpop.permute.xlu0 %1004  ;;  %v1238_v36 = vsel %vm1230_vm12, %v1205_v25, %v975_v62  ;;  %v784_v56 = vsel %vm742_vm3, %v782_v47, %v783_v48  ;;  %v655_v62 = vshrl.u32 %v2604_v49, 16  ;;  %v408_v42 = vshrl.u32 %v2180_v37, 16 }
  0xc5   : > { %v1269_v14 = vsel %vm1263_vm13, %v1236_v24, %v1005_v26  ;;  %v2588_v33 = vpop.permute.xlu1 %688  ;;  %v483_v26 = vsel %vm2227_vm2, %v403_v59, 0 }
  0xc6   : > { %924 = vrot.lane.b32.xlu0 %v778_v38, %s2194_s22  ;;  %2109 = vmatprep.mubr.msk.bf16.mxu0 %vm1316_vm14, %v1269_v14  ;;  %v653_v38 = vsel %vm485_vm4, %v648_v21, %v652_v29  ;;  %v1044_v29 = vsel %vm1032_vm6, %v2339_v28, %v2588_v33  ;;  %v674_v35 = vshll.u32 %v483_v26, 16 }
  0xc7   : > { %958 = vrot.lane.b32.xlu1 %v2550_v54, %s2193_s21 }
  0xc8   : > { %v1007_v39 = vpop.permute.xlu0 %1006 }
  0xc9   : > { %v1271_v40 = vsel %vm1263_vm13, %v1238_v36, %v1007_v39  ;;  %v802_v31 = vpop.permute.xlu1 %801 }
  0xca   : > { %956 = vrot.lane.b32.xlu0 %v2535_v32, %s2193_s21  ;;  %2110 = vmatmul.mubr.msk.bf16.gmra.mxu0 %vm1316_vm14, %v1271_v40  ;;  %v1077_v36 = vsel %vm1065_vm7, %v1044_v29, %v802_v31  ;;  %v676_v31 = vrot.slane %v674_v35, 1 }
  0xcb   : > { %990 = vrot.lane.b32.xlu1 %v653_v38, %s2196_s24 }
  0xcc   : > { %v800_v45 = vpop.permute.xlu0 %799 }
  0xcd   : > { %v835_v46 = vpop.permute.xlu1 %834  ;;  %v1075_v23 = vsel %vm1065_vm7, %v1042_v20, %v800_v45 }
  0xce   : > { %988 = vrot.lane.b32.xlu0 %v641_v58, %s2196_s24  ;;  %v1110_v43 = vsel %vm1098_vm8, %v1077_v36, %v835_v46 }
  0xcf   : > { %702 = vrot.lane.b32.xlu1 %v641_v58, %s2191_s19  ;;  %v659_v58 = vrot.slane %v657_v53, 1  ;;  %v411_v53 = vshll.u32 %v2180_v37, 16 }
  0xd0   : > { %v833_v51 = vpop.permute.xlu0 %832 }
  0xd1   : > { %v879_v55 = vpop.permute.xlu1 %878  ;;  %v660_v11 = vor.u32 %v659_v58, %v655_v62  ;;  %v1108_v14 = vsel %vm1098_vm8, %v1075_v23, %v833_v51  ;;  %v410_v51 = vrot.slane %v408_v42, 7 }
  0xd2   : > { %1020 = vrot.lane.b32.xlu0 %v781_v30, %s2197_s27  ;;  %v1143_v48 = vsel %vm1131_vm9, %v1110_v43, %v879_v55 }
  0xd3   : > { %704 = vrot.lane.b32.xlu1 %v653_v38, %s2191_s19 }
  0xd4   : > { %v877_v61 = vpop.permute.xlu0 %876 }
  0xd5   : > { %v915_v5 = vpop.permute.xlu1 %914  ;;  %v1141_v21 = vsel %vm1131_vm9, %v1108_v14, %v877_v61  ;;  %v413_v61 = vor.u32 %v411_v53, %v410_v51 }
  0xd6   : > { %1022 = vrot.lane.b32.xlu0 %v784_v56, %s2197_s27  ;;  %v1176_v33 = vsel %vm1164_vm10, %v1143_v48, %v915_v5  ;;  %v789_v5 = vrot.slane %v483_v26, 1 }
  0xd7   : > { %817 = vrot.lane.b32.xlu1 %v784_v56, %s2190_s18  ;;  %v467_v6 = vsel %vm2227_vm2, 0, %v413_v61 }
  0xd8   : > { %v913_v8 = vpop.permute.xlu0 %912  ;;  %v857_v19 = vshrl.u32 %v467_v6, 16 }
  0xd9   : > { %v947_v63 = vpop.permute.xlu1 %946  ;;  %v1174_v25 = vsel %vm1164_vm10, %v1141_v21, %v913_v8  ;;  %v901_v21 = vrot.slane %v467_v6, 1 }
  0xda   : > { %815 = vrot.lane.b32.xlu0 %v781_v30, %s2190_s18  ;;  %v665_v30 = vsel %vm485_vm4, %v660_v11, %v664_v0  ;;  %v1209_v50 = vsel %vm1197_vm11, %v1176_v33, %v947_v63  ;;  %v859_v11 = vshll.u32 %v467_v6, 16  ;;  %v790_v63 = vsel %vm742_vm3, %v788_v4, %v789_v5 }
  0xdb   : > { %850 = vrot.lane.b32.xlu1 %v2604_v49, %s2192_s20 }
  0xdc   : > { %v945_v15 = vpop.permute.xlu0 %944  ;;  %v861_v20 = vrot.slane %v859_v11, 1 }
  0xdd   : > { %v979_v24 = vpop.permute.xlu1 %978  ;;  %v1207_v39 = vsel %vm1197_vm11, %v1174_v25, %v945_v15  ;;  %v484_v15 = vsel %vm2227_vm2, %v410_v51, 0 }
  0xde   : > { %848 = vrot.lane.b32.xlu0 %v2550_v54, %s2192_s20  ;;  %v1242_v57 = vsel %vm1230_vm12, %v1209_v50, %v979_v24  ;;  %v864_v22 = vshll.u32 %v484_v15, 16 }
  0xdf   : > { %894 = vrot.lane.b32.xlu1 %v665_v30, %s2195_s23 }
  0xe0   : > { %v977_v17 = vpop.permute.xlu0 %976  ;;  %v866_v26 = vrot.slane %v864_v22, 1 }
  0xe1   : > { %v691_v40 = vpop.permute.xlu1 %690  ;;  %v1240_v45 = vsel %vm1230_vm12, %v1207_v39, %v977_v17 }
  0xe2   : > { %892 = vrot.lane.b32.xlu0 %v653_v38, %s2195_s23  ;;  %v672_v38 = vor.u32 %v671_v34, %v667_v7  ;;  %v1046_v2 = vsel %vm1032_vm6, %v2368_v52, %v691_v40  ;;  %v902_v7 = vrot.slane %v484_v15, 1 }
  0xe3   : > { %930 = vrot.lane.b32.xlu1 %v787_v9, %s2194_s22 }
  0xe4   : > { %v1009_v47 = vpop.permute.xlu0 %1008  ;;  %v903_v39 = vsel %vm742_vm3, %v901_v21, %v902_v7 }
  0xe5   : > { %v1273_v28 = vsel %vm1263_vm13, %v1240_v45, %v1009_v47  ;;  %v693_v46 = vpop.permute.xlu1 %692 }
  0xe6   : > { %928 = vrot.lane.b32.xlu0 %v784_v56, %s2194_s22  ;;  %2113 = vmatprep.mubr.msk.bf16.mxu0 %vm1316_vm14, %v1273_v28  ;;  %v677_v56 = vsel %vm485_vm4, %v672_v38, %v676_v31  ;;  %v1048_v52 = vsel %vm1032_vm6, %v2383_v1, %v693_v46 }
  0xe7   : > { %962 = vrot.lane.b32.xlu1 %v2619_v13, %s2193_s21 }
  0xe8   : > { %v1011_v55 = vpop.permute.xlu0 %1010 }
  0xe9   : > { %v1275_v59 = vsel %vm1263_vm13, %v1242_v57, %v1011_v55  ;;  %v806_v60 = vpop.permute.xlu1 %805 }
  0xea   : > { %960 = vrot.lane.b32.xlu0 %v2604_v49, %s2193_s21  ;;  %2114 = vmatmul.mubr.msk.bf16.gmra.mxu0 %vm1316_vm14, %v1275_v59  ;;  %v1081_v40 = vsel %vm1065_vm7, %v1048_v52, %v806_v60 }
  0xeb   : > { %994 = vrot.lane.b32.xlu1 %v677_v56, %s2196_s24 }
  0xec   : > { %v804_v62 = vpop.permute.xlu0 %803 }
  0xed   : > { %v839_v58 = vpop.permute.xlu1 %838  ;;  %v1079_v29 = vsel %vm1065_vm7, %v1046_v2, %v804_v62 }
  0xee   : > { %992 = vrot.lane.b32.xlu0 %v665_v30, %s2196_s24  ;;  %v1114_v45 = vsel %vm1098_vm8, %v1081_v40, %v839_v58 }
  0xef   : > { %706 = vrot.lane.b32.xlu1 %v665_v30, %s2191_s19  ;;  %v862_v30 = vor.u32 %v861_v20, %v857_v19 }
  0xf0   : > { %v837_v8 = vpop.permute.xlu0 %836 }
  0xf1   : > { %v883_v0 = vpop.permute.xlu1 %882  ;;  %v867_v17 = vsel %vm485_vm4, %v862_v30, %v866_v26 }
  0xf2   : > { %1024 = vrot.lane.b32.xlu0 %v787_v9, %s2197_s27  ;;  %v1147_v28 = vsel %vm1131_vm9, %v1114_v45, %v883_v0 }
  0xf3   : > { %708 = vrot.lane.b32.xlu1 %v677_v56, %s2191_s19 }
  0xf4   : > { %v881_v16 = vpop.permute.xlu0 %880 }
  0xf5   : > { %v919_v23 = vpop.permute.xlu1 %918 }
  0xf6   : > { %1026 = vrot.lane.b32.xlu0 %v790_v63, %s2197_s27  ;;  %v1180_v33 = vsel %vm1164_vm10, %v1147_v28, %v919_v23 }
  0xf7   : > { %821 = vrot.lane.b32.xlu1 %v790_v63, %s2190_s18 }
  0xf8   : > { %v917_v24 = vpop.permute.xlu0 %916 }
  0xf9   : > { %v951_v37 = vpop.permute.xlu1 %950 }
  0xfa   : > { %819 = vrot.lane.b32.xlu0 %v787_v9, %s2190_s18  ;;  %v1112_v9 = vsel %vm1098_vm8, %v1079_v29, %v837_v8  ;;  %v1213_v38 = vsel %vm1197_vm11, %v1180_v33, %v951_v37 }
  0xfb   : > { %854 = vrot.lane.b32.xlu1 %v467_v6, %s2192_s20  ;;  %v1145_v35 = vsel %vm1131_vm9, %v1112_v9, %v881_v16 }
  0xfc   : > { %v949_v14 = vpop.permute.xlu0 %948  ;;  %v1178_v36 = vsel %vm1164_vm10, %v1145_v35, %v917_v24 }
  0xfd   : > { %v983_v25 = vpop.permute.xlu1 %982  ;;  %v1211_v42 = vsel %vm1197_vm11, %v1178_v36, %v949_v14 }
  0xfe   : > { %852 = vrot.lane.b32.xlu0 %v2619_v13, %s2192_s20  ;;  %v1246_v50 = vsel %vm1230_vm12, %v1213_v38, %v983_v25 }
  0xff   : > { %898 = vrot.lane.b32.xlu1 %v867_v17, %s2195_s23 }
 0x100   : > { %v981_v34 = vpop.permute.xlu0 %980 }
 0x101   : > { %v695_v43 = vpop.permute.xlu1 %694  ;;  %v1244_v47 = vsel %vm1230_vm12, %v1211_v42, %v981_v34 }
 0x102   : > { %896 = vrot.lane.b32.xlu0 %v677_v56, %s2195_s23  ;;  %v1050_v4 = vsel %vm1032_vm6, %v2412_v27, %v695_v43 }
 0x103   : > { %934 = vrot.lane.b32.xlu1 %v903_v39, %s2194_s22 }
 0x104   : > { %v1013_v48 = vpop.permute.xlu0 %1012 }
 0x105   : > { %v1277_v1 = vsel %vm1263_vm13, %v1244_v47, %v1013_v48  ;;  %v697_v31 = vpop.permute.xlu1 %696 }
 0x106   : > { %932 = vrot.lane.b32.xlu0 %v790_v63, %s2194_s22  ;;  %2117 = vmatprep.mubr.msk.bf16.mxu0 %vm1316_vm14, %v1277_v1 }
 0x107   : > { %966 = vrot.lane.b32.xlu1 %v2233_v3, %s2193_s21 }
 0x108   : > { %v1015_v46 = vpop.permute.xlu0 %1014 }
 0x109   : > { %v1279_v51 = vsel %vm1263_vm13, %v1246_v50, %v1015_v46  ;;  %v810_v53 = vpop.permute.xlu1 %809 }
 0x10a   : > { %964 = vrot.lane.b32.xlu0 %v467_v6, %s2193_s21  ;;  %2118 = vmatmul.mubr.msk.bf16.gmra.mxu0 %vm1316_vm14, %v1279_v51 }
 0x10b   : > { %998 = vrot.lane.b32.xlu1 %v2258_v18, %s2196_s24 }
 0x10c   : > { %v808_v57 = vpop.permute.xlu0 %807 }
 0x10d   : > { %v843_v55 = vpop.permute.xlu1 %842  ;;  %v1083_v18 = vsel %vm1065_vm7, %v1050_v4, %v808_v57 }
 0x10e   : > { %996 = vrot.lane.b32.xlu0 %v867_v17, %s2196_s24 }
 0x10f   : > { %1030 = vrot.lane.b32.xlu1 %v2244_v10, %s2197_s27  ;;  %v1052_v10 = vsel %vm1032_vm6, %v2427_v44, %v697_v31 }
 0x110   : > { %v841_v59 = vpop.permute.xlu0 %840  ;;  %v1085_v63 = vsel %vm1065_vm7, %v1052_v10, %v810_v53 }
 0x111   : > { %v887_v56 = vpop.permute.xlu1 %886  ;;  %v1116_v6 = vsel %vm1098_vm8, %v1083_v18, %v841_v59  ;;  %v1118_v27 = vsel %vm1098_vm8, %v1085_v63, %v843_v55 }
 0x112   : > { %1028 = vrot.lane.b32.xlu0 %v903_v39, %s2197_s27  ;;  %v1151_v22 = vsel %vm1131_vm9, %v1118_v27, %v887_v56 }
 0x114   : > { %v885_v3 = vpop.permute.xlu0 %884 }
 0x115   : > { %v923_v60 = vpop.permute.xlu1 %922  ;;  %v1149_v11 = vsel %vm1131_vm9, %v1116_v6, %v885_v3 }
 0x116   : > { %v1184_v24 = vsel %vm1164_vm10, %v1151_v22, %v923_v60 }
 0x118   : > { %v921_v61 = vpop.permute.xlu0 %920 }
 0x119   : > { %v955_v62 = vpop.permute.xlu1 %954  ;;  %v1182_v0 = vsel %vm1164_vm10, %v1149_v11, %v921_v61 }
 0x11a   : > { %v1217_v44 = vsel %vm1197_vm11, %v1184_v24, %v955_v62 }
 0x11c   : > { %v953_v58 = vpop.permute.xlu0 %952 }
 0x11d   : > { %v987_v5 = vpop.permute.xlu1 %986  ;;  %v1215_v15 = vsel %vm1197_vm11, %v1182_v0, %v953_v58 }
 0x11e   : > { %v1250_v26 = vsel %vm1230_vm12, %v1217_v44, %v987_v5 }
 0x120   : > { %v985_v8 = vpop.permute.xlu0 %984 }
 0x121   : > { %v699_v16 = vpop.permute.xlu1 %698  ;;  %v1248_v19 = vsel %vm1230_vm12, %v1215_v15, %v985_v8 }
 0x122   : > { %v1054_v36 = vsel %vm1032_vm6, %v2461_v12, %v699_v16 }
 0x124   : > { %v1017_v20 = vpop.permute.xlu0 %1016 }
 0x125   : > { %v1281_v23 = vsel %vm1263_vm13, %v1248_v19, %v1017_v20  ;;  %v701_v30 = vpop.permute.xlu1 %700 }
 0x126   : > { %2121 = vmatprep.mubr.msk.bf16.mxu1 %vm1316_vm14, %v1281_v23  ;;  %v1056_v47 = vsel %vm1032_vm6, %v2487_v41, %v701_v30 }
 0x128   : > { %v1019_v37 = vpop.permute.xlu0 %1018 }
 0x129   : > { %v1283_v14 = vsel %vm1263_vm13, %v1250_v26, %v1019_v37  ;;  %v814_v2 = vpop.permute.xlu1 %813 }
 0x12a   : > { %2122 = vmatmul.mubr.msk.bf16.vlgmr.msra.gmra.mxu1 %vm1316_vm14, %v1283_v14  ;;  %v1089_v28 = vsel %vm1065_vm7, %v1056_v47, %v814_v2 }
 0x12c   : > { %v812_v17 = vpop.permute.xlu0 %811 }
 0x12d   : > { %v847_v21 = vpop.permute.xlu1 %846  ;;  %v1087_v39 = vsel %vm1065_vm7, %v1054_v36, %v812_v17 }
 0x12e   : > { %v1122_v12 = vsel %vm1098_vm8, %v1089_v28, %v847_v21 }
 0x130   : > { %v845_v7 = vpop.permute.xlu0 %844 }
 0x131   : > { %v891_v29 = vpop.permute.xlu1 %890  ;;  %v1120_v42 = vsel %vm1098_vm8, %v1087_v39, %v845_v7 }
 0x132   : > { %v1155_v50 = vsel %vm1131_vm9, %v1122_v12, %v891_v29 }
 0x134   : > { %v889_v25 = vpop.permute.xlu0 %888 }
 0x135   : > { %v927_v9 = vpop.permute.xlu1 %926  ;;  %v1153_v45 = vsel %vm1131_vm9, %v1120_v42, %v889_v25 }
 0x136   : > { %v1188_v51 = vsel %vm1164_vm10, %v1155_v50, %v927_v9 }
 0x138   : > { %v925_v34 = vpop.permute.xlu0 %924 }
 0x139   : > { %v959_v35 = vpop.permute.xlu1 %958  ;;  %v1186_v48 = vsel %vm1164_vm10, %v1153_v45, %v925_v34 }
 0x13a   : > { %v1221_v41 = vsel %vm1197_vm11, %v1188_v51, %v959_v35 }
 0x13c   : > { %v957_v52 = vpop.permute.xlu0 %956 }
 0x13d   : > { %v991_v40 = vpop.permute.xlu1 %990  ;;  %v1219_v1 = vsel %vm1197_vm11, %v1186_v48, %v957_v52 }
 0x13e   : > { %v1254_v57 = vsel %vm1230_vm12, %v1221_v41, %v991_v40 }
 0x140   : > { %v989_v43 = vpop.permute.xlu0 %988 }
 0x141   : > { %v703_v33 = vpop.permute.xlu1 %702  ;;  %v1252_v38 = vsel %vm1230_vm12, %v1219_v1, %v989_v43 }
 0x142   : > { %v1058_v8 = vsel %vm1032_vm6, %v2535_v32, %v703_v33 }
 0x144   : > { %v1021_v31 = vpop.permute.xlu0 %1020 }
 0x145   : > { %v1285_v46 = vsel %vm1263_vm13, %v1252_v38, %v1021_v31  ;;  %v705_v53 = vpop.permute.xlu1 %704 }
 0x146   : > { %2125 = vmatprep.mubr.msk.bf16.mxu1 %vm1316_vm14, %v1285_v46  ;;  %v1060_v16 = vsel %vm1032_vm6, %v2550_v54, %v705_v53 }
 0x148   : > { %v1023_v55 = vpop.permute.xlu0 %1022 }
 0x149   : > { %v1287_v59 = vsel %vm1263_vm13, %v1254_v57, %v1023_v55  ;;  %v818_v56 = vpop.permute.xlu1 %817 }
 0x14a   : > { %2126 = vmatmul.mubr.msk.bf16.gmra.mxu1 %vm1316_vm14, %v1287_v59  ;;  %v1093_v19 = vsel %vm1065_vm7, %v1060_v16, %v818_v56 }
 0x14c   : > { %v816_v3 = vpop.permute.xlu0 %815 }
 0x14d   : > { %v851_v60 = vpop.permute.xlu1 %850  ;;  %v1091_v11 = vsel %vm1065_vm7, %v1058_v8, %v816_v3 }
 0x14e   : > { %v1126_v32 = vsel %vm1098_vm8, %v1093_v19, %v851_v60 }
 0x150   : > { %v849_v61 = vpop.permute.xlu0 %848 }
 0x151   : > { %v895_v62 = vpop.permute.xlu1 %894  ;;  %v1124_v0 = vsel %vm1098_vm8, %v1091_v11, %v849_v61 }
 0x152   : > { %v1159_v44 = vsel %vm1131_vm9, %v1126_v32, %v895_v62 }
 0x154   : > { %v893_v58 = vpop.permute.xlu0 %892 }
 0x155   : > { %v931_v4 = vpop.permute.xlu1 %930  ;;  %v1157_v15 = vsel %vm1131_vm9, %v1124_v0, %v893_v58 }
 0x156   : > { %v1192_v54 = vsel %vm1164_vm10, %v1159_v44, %v931_v4 }
 0x158   : > { %v929_v18 = vpop.permute.xlu0 %928 }
 0x159   : > { %v963_v5 = vpop.permute.xlu1 %962  ;;  %v1190_v27 = vsel %vm1164_vm10, %v1157_v15, %v929_v18 }
 0x15a   : > { %v1225_v26 = vsel %vm1197_vm11, %v1192_v54, %v963_v5 }
 0x15c   : > { %v961_v6 = vpop.permute.xlu0 %960 }
 0x15d   : > { %v995_v10 = vpop.permute.xlu1 %994  ;;  %v1223_v20 = vsel %vm1197_vm11, %v1190_v27, %v961_v6 }
 0x15e   : > { %v1258_v14 = vsel %vm1230_vm12, %v1225_v26, %v995_v10 }
 0x160   : > { %v993_v63 = vpop.permute.xlu0 %992 }
 0x161   : > { %v2766_v22 = vpop.permute.xlu1 %706  ;;  %v1256_v23 = vsel %vm1230_vm12, %v1223_v20, %v993_v63 }
 0x162   : > { %v1062_v0 = vsel %vm1032_vm6, %v2604_v49, %v2766_v22 }
 0x164   : > { %v1025_v24 = vpop.permute.xlu0 %1024 }
 0x165   : > { %v1289_v30 = vsel %vm1263_vm13, %v1256_v23, %v1025_v24  ;;  %v709_v37 = vpop.permute.xlu1 %708 }
 0x166   : > { %2129 = vmatprep.mubr.msk.bf16.mxu1 %vm1316_vm14, %v1289_v30  ;;  %v1064_v11 = vsel %vm1032_vm6, %v2619_v13, %v709_v37 }
 0x168   : > { %v1027_v2 = vpop.permute.xlu0 %1026 }
 0x169   : > { %v1291_v17 = vsel %vm1263_vm13, %v1258_v14, %v1027_v2  ;;  %v822_v29 = vpop.permute.xlu1 %821 }
 0x16a   : > { %v2107_v21 = vpop.f32.mrf.mxu0  ;;  %2130 = vmatmul.mubr.msk.bf16.gmra.mxu1 %vm1316_vm14, %v1291_v17  ;;  %v1097_v63 = vsel %vm1065_vm7, %v1064_v11, %v822_v29 }
 0x16b   : > { %v2050_v7 = vpack.c.bf16 %v2107_v21, %v2107_v21 }
 0x16c   : > { %v1387_v25 = vpop.f32.mrf.mxu0  ;;  %v820_v9 = vpop.permute.xlu0 %819 }
 0x16d   : > { %1645 = vst.msk [vmem:[%s2782_s7 + $0x8] sm:$0xf] %vm1642_vm15, %v2050_v7  ;;  %v2048_v34 = vpack.c.bf16 %v1387_v25, %v1387_v25  ;;  %v855_v39 = vpop.permute.xlu1 %854  ;;  %v1095_v15 = vsel %vm1065_vm7, %v1062_v0, %v820_v9 }
 0x16e   : > { %v2108_v35 = vpop.f32.mrf.mxu0  ;;  %v1130_v16 = vsel %vm1098_vm8, %v1097_v63, %v855_v39 }
 0x16f   : > { %1643 = vst.msk [vmem:[%s2782_s7] sm:$0xf] %vm1642_vm15, %v2048_v34  ;;  %v1515_v52 = vpack.c.bf16 %v2108_v35, %v2107_v21  ;;  %v2051_v36 = vpack.c.bf16 %v2108_v35, %v2108_v35 }
 0x170   : > { %v1390_v40 = vpop.f32.mrf.mxu0  ;;  %v853_v42 = vpop.permute.xlu0 %852 }
 0x171   : > { %1646 = vst.msk [vmem:[%s2782_s7 + $0xc] sm:$0xf] %vm1642_vm15, %v2051_v36  ;;  %v1677_v43 = vunpack.c.l.bf16 %v1515_v52  ;;  %v1514_v45 = vpack.c.bf16 %v1390_v40, %v1387_v25  ;;  %v2049_v47 = vpack.c.bf16 %v1390_v40, %v1390_v40  ;;  %v899_v48 = vpop.permute.xlu1 %898  ;;  %v1678_v28 = vunpack.c.h.bf16 %v1515_v52 }
 0x172   : > { %v1128_v19 = vsel %vm1098_vm8, %v1095_v15, %v853_v42  ;;  %v1163_v20 = vsel %vm1131_vm9, %v1130_v16, %v899_v48 }
 0x173   : > { %1644 = vst.msk [vmem:[%s2782_s7 + $0x4] sm:$0xf] %vm1642_vm15, %v2049_v47  ;;  %v1675_v1 = vunpack.c.l.bf16 %v1514_v45  ;;  %v1676_v33 = vunpack.c.h.bf16 %v1514_v45  ;;  %v1778_v38 = vmul.f32 %v1677_v43, %v1677_v43  ;;  %v1710_v57 = vsel %vm1065_vm7, %v1677_v43, 0.0 }
 0x174   : > { %v897_v12 = vpop.permute.xlu0 %896  ;;  %v1779_v55 = vmul.f32 %v1678_v28, %v1678_v28  ;;  %v1712_v62 = vsel %vm1065_vm7, %v1678_v28, 0.0 }
 0x175   : > { %v1707_v31 = vsel %vm1065_vm7, %v1675_v1, 0.0  ;;  %v1708_v50 = vsel %vm1065_vm7, %v1676_v33, 0.0  ;;  %v1776_v46 = vmul.f32 %v1675_v1, %v1675_v1  ;;  %v1777_v51 = vmul.f32 %v1676_v33, %v1676_v33  ;;  %v935_v53 = vpop.permute.xlu1 %934 }
 0x176   : > { %v1709_v41 = vadd.f32 %v1708_v50, %v1707_v31  ;;  %v1811_v58 = vsel %vm1065_vm7, %v1778_v38, 0.0  ;;  %v1813_v6 = vsel %vm1065_vm7, %v1779_v55, 0.0  ;;  %v1161_v23 = vsel %vm1131_vm9, %v1128_v19, %v897_v12 }
 0x177   : > { %v1808_v59 = vsel %vm1065_vm7, %v1776_v46, 0.0  ;;  %v1809_v56 = vsel %vm1065_vm7, %v1777_v51, 0.0  ;;  %v1196_v13 = vsel %vm1164_vm10, %v1163_v20, %v935_v53 }
 0x178   : > { %v933_v3 = vpop.permute.xlu0 %932  ;;  %v1711_v60 = vadd.f32 %v1710_v57, %v1709_v41  ;;  %v1810_v61 = vadd.f32 %v1809_v56, %v1808_v59 }
 0x179   : > { %v967_v18 = vpop.permute.xlu1 %966  ;;  %v1194_v24 = vsel %vm1164_vm10, %v1161_v23, %v933_v3 }
 0x17a   : > { %v1812_v4 = vadd.f32 %v1811_v58, %v1810_v61  ;;  %v1713_v5 = vadd.f32 %v1712_v62, %v1711_v60  ;;  %v1229_v49 = vsel %vm1197_vm11, %v1196_v13, %v967_v18 }
 0x17c   : > { %v965_v8 = vpop.permute.xlu0 %964  ;;  %v1814_v10 = vadd.f32 %v1813_v6, %v1812_v4 }
 0x17d   : > { %v999_v27 = vpop.permute.xlu1 %998  ;;  %v1227_v22 = vsel %vm1197_vm11, %v1194_v24, %v965_v8 }
 0x17e   : > { %v1262_v44 = vsel %vm1230_vm12, %v1229_v49, %v999_v27 }
 0x180   : > { %v997_v32 = vpop.permute.xlu0 %996 }
 0x181   : > { %v1031_v30 = vpop.permute.xlu1 %1030  ;;  %v1260_v54 = vsel %vm1230_vm12, %v1227_v22, %v997_v32 }
 0x182   : > { %v1295_v26 = vsel %vm1263_vm13, %v1262_v44, %v1031_v30 }
 0x184   : > { %v1029_v37 = vpop.permute.xlu0 %1028 }
 0x185   : > { %v1293_v14 = vsel %vm1263_vm13, %v1260_v54, %v1029_v37 }
 0x186   : > { %2133 = vmatprep.mubr.msk.bf16.mxu1 %vm1316_vm14, %v1293_v14 }
 0x187   : > { %2134 = vmatmul.mubr.msk.bf16.gmra.mxu1 %vm1316_vm14, %v1295_v26 }
 0x18a   : > { %v2111_v2 = vpop.f32.mrf.mxu0 }
 0x18b   : > { %v2054_v17 = vpack.c.bf16 %v2111_v2, %v2111_v2 }
 0x18c   : > { %v1403_v21 = vpop.f32.mrf.mxu0 }
 0x18d   : > { %1649 = vst.msk [vmem:[%s2782_s7 + $0x18] sm:$0xf] %vm1642_vm15, %v2054_v17  ;;  %v2052_v7 = vpack.c.bf16 %v1403_v21, %v1403_v21 }
 0x18e   : > { %v2112_v29 = vpop.f32.mrf.mxu0 }
 0x18f   : > { %1647 = vst.msk [vmem:[%s2782_s7 + $0x10] sm:$0xf] %vm1642_vm15, %v2052_v7  ;;  %v1517_v25 = vpack.c.bf16 %v2112_v29, %v2111_v2  ;;  %v2055_v9 = vpack.c.bf16 %v2112_v29, %v2112_v29 }
 0x190   : > { %v1406_v34 = vpop.f32.mrf.mxu0 }
 0x191   : > { %1650 = vst.msk [vmem:[%s2782_s7 + $0x1c] sm:$0xf] %vm1642_vm15, %v2055_v9  ;;  %v1516_v35 = vpack.c.bf16 %v1406_v34, %v1403_v21  ;;  %v2053_v52 = vpack.c.bf16 %v1406_v34, %v1406_v34  ;;  %v1681_v36 = vunpack.c.l.bf16 %v1517_v25  ;;  %v1682_v42 = vunpack.c.h.bf16 %v1517_v25 }
 0x193   : > { %1648 = vst.msk [vmem:[%s2782_s7 + $0x14] sm:$0xf] %vm1642_vm15, %v2053_v52  ;;  %v1679_v39 = vunpack.c.l.bf16 %v1516_v35  ;;  %v1680_v40 = vunpack.c.h.bf16 %v1516_v35  ;;  %v1782_v28 = vmul.f32 %v1681_v36, %v1681_v36  ;;  %v1718_v31 = vsel %vm1065_vm7, %v1681_v36, 0.0 }
 0x194   : > { %v1783_v50 = vmul.f32 %v1682_v42, %v1682_v42  ;;  %v1720_v53 = vsel %vm1065_vm7, %v1682_v42, 0.0 }
 0x195   : > { %v1714_v43 = vsel %vm1065_vm7, %v1679_v39, 0.0  ;;  %v1780_v45 = vmul.f32 %v1679_v39, %v1679_v39  ;;  %v1781_v47 = vmul.f32 %v1680_v40, %v1680_v40  ;;  %v1716_v1 = vsel %vm1065_vm7, %v1680_v40, 0.0 }
 0x196   : > { %v1715_v48 = vadd.f32 %v1714_v43, %v1713_v5  ;;  %v1819_v57 = vsel %vm1065_vm7, %v1782_v28, 0.0  ;;  %v1821_v56 = vsel %vm1065_vm7, %v1783_v50, 0.0 }
 0x197   : > { %v1815_v33 = vsel %vm1065_vm7, %v1780_v45, 0.0  ;;  %v1817_v46 = vsel %vm1065_vm7, %v1781_v47, 0.0 }
 0x198   : > { %v1717_v12 = vadd.f32 %v1716_v1, %v1715_v48  ;;  %v1816_v38 = vadd.f32 %v1815_v33, %v1814_v10 }
 0x19a   : > { %v1719_v51 = vadd.f32 %v1718_v31, %v1717_v12  ;;  %v1818_v41 = vadd.f32 %v1817_v46, %v1816_v38 }
 0x19c   : > { %v1820_v55 = vadd.f32 %v1819_v57, %v1818_v41  ;;  %v1721_v59 = vadd.f32 %v1720_v53, %v1719_v51 }
 0x19e   : > { %v1822_v3 = vadd.f32 %v1821_v56, %v1820_v55 }
 0x1aa   : > { %v2115_v60 = vpop.f32.mrf.mxu0 }
 0x1ab   : > { %v2058_v61 = vpack.c.bf16 %v2115_v60, %v2115_v60 }
 0x1ac   : > { %v1419_v62 = vpop.f32.mrf.mxu0 }
 0x1ad   : > { %1653 = vst.msk [vmem:[%s2782_s7 + $0x28] sm:$0xf] %vm1642_vm15, %v2058_v61  ;;  %v2056_v58 = vpack.c.bf16 %v1419_v62, %v1419_v62 }
 0x1ae   : > { %v2116_v4 = vpop.f32.mrf.mxu0 }
 0x1af   : > { %1651 = vst.msk [vmem:[%s2782_s7 + $0x20] sm:$0xf] %vm1642_vm15, %v2056_v58  ;;  %v1519_v18 = vpack.c.bf16 %v2116_v4, %v2115_v60  ;;  %v2059_v5 = vpack.c.bf16 %v2116_v4, %v2116_v4 }
 0x1b0   : > { %v1422_v6 = vpop.f32.mrf.mxu0 }
 0x1b1   : > { %1654 = vst.msk [vmem:[%s2782_s7 + $0x2c] sm:$0xf] %vm1642_vm15, %v2059_v5  ;;  %v1518_v8 = vpack.c.bf16 %v1422_v6, %v1419_v62  ;;  %v2057_v11 = vpack.c.bf16 %v1422_v6, %v1422_v6  ;;  %v1685_v10 = vunpack.c.l.bf16 %v1519_v18  ;;  %v1686_v15 = vunpack.c.h.bf16 %v1519_v18 }
 0x1b3   : > { %1652 = vst.msk [vmem:[%s2782_s7 + $0x24] sm:$0xf] %vm1642_vm15, %v2057_v11  ;;  %v1683_v0 = vunpack.c.l.bf16 %v1518_v8  ;;  %v1684_v63 = vunpack.c.h.bf16 %v1518_v8  ;;  %v1786_v32 = vmul.f32 %v1685_v10, %v1685_v10  ;;  %v1726_v22 = vsel %vm1065_vm7, %v1685_v10, 0.0 }
 0x1b4   : > { %v1787_v44 = vmul.f32 %v1686_v15, %v1686_v15  ;;  %v1728_v37 = vsel %vm1065_vm7, %v1686_v15, 0.0 }
 0x1b5   : > { %v1722_v16 = vsel %vm1065_vm7, %v1683_v0, 0.0  ;;  %v1784_v27 = vmul.f32 %v1683_v0, %v1683_v0  ;;  %v1785_v19 = vmul.f32 %v1684_v63, %v1684_v63  ;;  %v1724_v23 = vsel %vm1065_vm7, %v1684_v63, 0.0 }
 0x1b6   : > { %v1723_v20 = vadd.f32 %v1722_v16, %v1721_v59  ;;  %v1827_v14 = vsel %vm1065_vm7, %v1786_v32, 0.0  ;;  %v1829_v21 = vsel %vm1065_vm7, %v1787_v44, 0.0 }
 0x1b7   : > { %v1823_v13 = vsel %vm1065_vm7, %v1784_v27, 0.0  ;;  %v1825_v30 = vsel %vm1065_vm7, %v1785_v19, 0.0 }
 0x1b8   : > { %v1725_v24 = vadd.f32 %v1724_v23, %v1723_v20  ;;  %v1824_v49 = vadd.f32 %v1823_v13, %v1822_v3 }
 0x1ba   : > { %v1727_v54 = vadd.f32 %v1726_v22, %v1725_v24  ;;  %v1826_v26 = vadd.f32 %v1825_v30, %v1824_v49 }
 0x1bc   : > { %v1828_v2 = vadd.f32 %v1827_v14, %v1826_v26  ;;  %v1729_v17 = vadd.f32 %v1728_v37, %v1727_v54 }
 0x1be   : > { %v1830_v7 = vadd.f32 %v1829_v21, %v1828_v2 }
 0x1ca   : > { %v2119_v29 = vpop.f32.mrf.mxu0 }
 0x1cb   : > { %v2062_v25 = vpack.c.bf16 %v2119_v29, %v2119_v29 }
 0x1cc   : > { %v1435_v9 = vpop.f32.mrf.mxu0 }
 0x1cd   : > { %1657 = vst.msk [vmem:[%s2782_s7 + $0x38] sm:$0xf] %vm1642_vm15, %v2062_v25  ;;  %v2060_v34 = vpack.c.bf16 %v1435_v9, %v1435_v9 }
 0x1ce   : > { %v2120_v35 = vpop.f32.mrf.mxu0 }
 0x1cf   : > { %1655 = vst.msk [vmem:[%s2782_s7 + $0x30] sm:$0xf] %vm1642_vm15, %v2060_v34  ;;  %v1521_v52 = vpack.c.bf16 %v2120_v35, %v2119_v29  ;;  %v2063_v36 = vpack.c.bf16 %v2120_v35, %v2120_v35 }
 0x1d0   : > { %v1438_v39 = vpop.f32.mrf.mxu0 }
 0x1d1   : > { %1658 = vst.msk [vmem:[%s2782_s7 + $0x3c] sm:$0xf] %vm1642_vm15, %v2063_v36  ;;  %v1520_v40 = vpack.c.bf16 %v1438_v39, %v1435_v9  ;;  %v2061_v42 = vpack.c.bf16 %v1438_v39, %v1438_v39  ;;  %v1689_v43 = vunpack.c.l.bf16 %v1521_v52  ;;  %v1690_v48 = vunpack.c.h.bf16 %v1521_v52 }
 0x1d3   : > { %1656 = vst.msk [vmem:[%s2782_s7 + $0x34] sm:$0xf] %vm1642_vm15, %v2061_v42  ;;  %v1687_v45 = vunpack.c.l.bf16 %v1520_v40  ;;  %v1688_v47 = vunpack.c.h.bf16 %v1520_v40  ;;  %v1790_v38 = vmul.f32 %v1689_v43, %v1689_v43  ;;  %v1734_v41 = vsel %vm1065_vm7, %v1689_v43, 0.0 }
 0x1d4   : > { %v1791_v53 = vmul.f32 %v1690_v48, %v1690_v48  ;;  %v1736_v56 = vsel %vm1065_vm7, %v1690_v48, 0.0 }
 0x1d5   : > { %v1730_v28 = vsel %vm1065_vm7, %v1687_v45, 0.0  ;;  %v1788_v1 = vmul.f32 %v1687_v45, %v1687_v45  ;;  %v1789_v33 = vmul.f32 %v1688_v47, %v1688_v47  ;;  %v1732_v31 = vsel %vm1065_vm7, %v1688_v47, 0.0 }
 0x1d6   : > { %v1731_v12 = vadd.f32 %v1730_v28, %v1729_v17  ;;  %v1835_v3 = vsel %vm1065_vm7, %v1790_v38, 0.0  ;;  %v1837_v62 = vsel %vm1065_vm7, %v1791_v53, 0.0 }
 0x1d7   : > { %v1831_v50 = vsel %vm1065_vm7, %v1788_v1, 0.0  ;;  %v1833_v57 = vsel %vm1065_vm7, %v1789_v33, 0.0 }
 0x1d8   : > { %v1733_v46 = vadd.f32 %v1732_v31, %v1731_v12  ;;  %v1832_v51 = vadd.f32 %v1831_v50, %v1830_v7 }
 0x1da   : > { %v1735_v55 = vadd.f32 %v1734_v41, %v1733_v46  ;;  %v1834_v59 = vadd.f32 %v1833_v57, %v1832_v51 }
 0x1dc   : > { %v1836_v60 = vadd.f32 %v1835_v3, %v1834_v59  ;;  %v1737_v61 = vadd.f32 %v1736_v56, %v1735_v55 }
 0x1de   : > { %v1838_v58 = vadd.f32 %v1837_v62, %v1836_v60 }
 0x1ea   : > { %v2123_v4 = vpop.f32.mrf.mxu1 }
 0x1eb   : > { %v2066_v18 = vpack.c.bf16 %v2123_v4, %v2123_v4 }
 0x1ec   : > { %v1451_v5 = vpop.f32.mrf.mxu1 }
 0x1ed   : > { %1661 = vst.msk [vmem:[%s2782_s7 + $0x48] sm:$0xf] %vm1642_vm15, %v2066_v18  ;;  %v2064_v6 = vpack.c.bf16 %v1451_v5, %v1451_v5 }
 0x1ee   : > { %v2124_v8 = vpop.f32.mrf.mxu1 }
 0x1ef   : > { %1659 = vst.msk [vmem:[%s2782_s7 + $0x40] sm:$0xf] %vm1642_vm15, %v2064_v6  ;;  %v1523_v11 = vpack.c.bf16 %v2124_v8, %v2123_v4  ;;  %v2067_v10 = vpack.c.bf16 %v2124_v8, %v2124_v8 }
 0x1f0   : > { %v1454_v0 = vpop.f32.mrf.mxu1 }
 0x1f1   : > { %1662 = vst.msk [vmem:[%s2782_s7 + $0x4c] sm:$0xf] %vm1642_vm15, %v2067_v10  ;;  %v1522_v63 = vpack.c.bf16 %v1454_v0, %v1451_v5  ;;  %v2065_v15 = vpack.c.bf16 %v1454_v0, %v1454_v0  ;;  %v1693_v16 = vunpack.c.l.bf16 %v1523_v11  ;;  %v1694_v20 = vunpack.c.h.bf16 %v1523_v11 }
 0x1f3   : > { %1660 = vst.msk [vmem:[%s2782_s7 + $0x44] sm:$0xf] %vm1642_vm15, %v2065_v15  ;;  %v1691_v27 = vunpack.c.l.bf16 %v1522_v63  ;;  %v1692_v19 = vunpack.c.h.bf16 %v1522_v63  ;;  %v1794_v49 = vmul.f32 %v1693_v16, %v1693_v16  ;;  %v1742_v26 = vsel %vm1065_vm7, %v1693_v16, 0.0 }
 0x1f4   : > { %v1795_v37 = vmul.f32 %v1694_v20, %v1694_v20  ;;  %v1744_v21 = vsel %vm1065_vm7, %v1694_v20, 0.0 }
 0x1f5   : > { %v1738_v32 = vsel %vm1065_vm7, %v1691_v27, 0.0  ;;  %v1792_v23 = vmul.f32 %v1691_v27, %v1691_v27  ;;  %v1793_v13 = vmul.f32 %v1692_v19, %v1692_v19  ;;  %v1740_v22 = vsel %vm1065_vm7, %v1692_v19, 0.0 }
 0x1f6   : > { %v1739_v24 = vadd.f32 %v1738_v32, %v1737_v61  ;;  %v1843_v7 = vsel %vm1065_vm7, %v1794_v49, 0.0  ;;  %v1845_v9 = vsel %vm1065_vm7, %v1795_v37, 0.0 }
 0x1f7   : > { %v1839_v44 = vsel %vm1065_vm7, %v1792_v23, 0.0  ;;  %v1841_v14 = vsel %vm1065_vm7, %v1793_v13, 0.0 }
 0x1f8   : > { %v1741_v30 = vadd.f32 %v1740_v22, %v1739_v24  ;;  %v1840_v54 = vadd.f32 %v1839_v44, %v1838_v58 }
 0x1fa   : > { %v1743_v2 = vadd.f32 %v1742_v26, %v1741_v30  ;;  %v1842_v17 = vadd.f32 %v1841_v14, %v1840_v54 }
 0x1fc   : > { %v1844_v29 = vadd.f32 %v1843_v7, %v1842_v17  ;;  %v1745_v25 = vadd.f32 %v1744_v21, %v1743_v2 }
 0x1fe   : > { %v1846_v34 = vadd.f32 %v1845_v9, %v1844_v29 }
 0x20a   : > { %v2127_v35 = vpop.f32.mrf.mxu1 }
 0x20b   : > { %v2070_v52 = vpack.c.bf16 %v2127_v35, %v2127_v35 }
 0x20c   : > { %v1467_v36 = vpop.f32.mrf.mxu1 }
 0x20d   : > { %1665 = vst.msk [vmem:[%s2782_s7 + $0x58] sm:$0xf] %vm1642_vm15, %v2070_v52  ;;  %v2068_v39 = vpack.c.bf16 %v1467_v36, %v1467_v36 }
 0x20e   : > { %v2128_v40 = vpop.f32.mrf.mxu1 }
 0x20f   : > { %1663 = vst.msk [vmem:[%s2782_s7 + $0x50] sm:$0xf] %vm1642_vm15, %v2068_v39  ;;  %v2071_v42 = vpack.c.bf16 %v2128_v40, %v2128_v40  ;;  %v1525_v41 = vpack.c.bf16 %v2128_v40, %v2127_v35 }
 0x210   : > { %v1470_v43 = vpop.f32.mrf.mxu1 }
 0x211   : > { %1666 = vst.msk [vmem:[%s2782_s7 + $0x5c] sm:$0xf] %vm1642_vm15, %v2071_v42  ;;  %v2069_v45 = vpack.c.bf16 %v1470_v43, %v1470_v43  ;;  %v1524_v48 = vpack.c.bf16 %v1470_v43, %v1467_v36  ;;  %v1697_v56 = vunpack.c.l.bf16 %v1525_v41  ;;  %v1698_v4 = vunpack.c.h.bf16 %v1525_v41 }
 0x213   : > { %1664 = vst.msk [vmem:[%s2782_s7 + $0x54] sm:$0xf] %vm1642_vm15, %v2069_v45  ;;  %v1695_v38 = vunpack.c.l.bf16 %v1524_v48  ;;  %v1696_v53 = vunpack.c.h.bf16 %v1524_v48  ;;  %v1798_v18 = vmul.f32 %v1697_v56, %v1697_v56  ;;  %v1750_v11 = vsel %vm1065_vm7, %v1697_v56, 0.0 }
 0x214   : > { %v1799_v0 = vmul.f32 %v1698_v4, %v1698_v4  ;;  %v1752_v27 = vsel %vm1065_vm7, %v1698_v4, 0.0 }
 0x215   : > { %v1796_v51 = vmul.f32 %v1695_v38, %v1695_v38  ;;  %v1746_v57 = vsel %vm1065_vm7, %v1695_v38, 0.0  ;;  %v1797_v3 = vmul.f32 %v1696_v53, %v1696_v53  ;;  %v1748_v62 = vsel %vm1065_vm7, %v1696_v53, 0.0 }
 0x216   : > { %v1747_v59 = vadd.f32 %v1746_v57, %v1745_v25  ;;  %v1851_v63 = vsel %vm1065_vm7, %v1798_v18, 0.0  ;;  %v1853_v13 = vsel %vm1065_vm7, %v1799_v0, 0.0 }
 0x217   : > { %v1847_v55 = vsel %vm1065_vm7, %v1796_v51, 0.0  ;;  %v1849_v5 = vsel %vm1065_vm7, %v1797_v3, 0.0 }
 0x218   : > { %v1848_v61 = vadd.f32 %v1847_v55, %v1846_v34  ;;  %v1749_v58 = vadd.f32 %v1748_v62, %v1747_v59 }
 0x21a   : > { %v1850_v8 = vadd.f32 %v1849_v5, %v1848_v61  ;;  %v1751_v10 = vadd.f32 %v1750_v11, %v1749_v58 }
 0x21c   : > { %v1852_v16 = vadd.f32 %v1851_v63, %v1850_v8  ;;  %v1753_v23 = vadd.f32 %v1752_v27, %v1751_v10 }
 0x21e   : > { %v1854_v22 = vadd.f32 %v1853_v13, %v1852_v16 }
 0x22a   : > { %v2131_v47 = vpop.f32.mrf.mxu1 }
 0x22b   : > { %v2074_v28 = vpack.c.bf16 %v2131_v47, %v2131_v47 }
 0x22c   : > { %v1483_v1 = vpop.f32.mrf.mxu1 }
 0x22d   : > { %1669 = vst.msk [vmem:[%s2782_s7 + $0x68] sm:$0xf] %vm1642_vm15, %v2074_v28  ;;  %v2072_v33 = vpack.c.bf16 %v1483_v1, %v1483_v1 }
 0x22e   : > { %v2132_v12 = vpop.f32.mrf.mxu1 }
 0x22f   : > { %1667 = vst.msk [vmem:[%s2782_s7 + $0x60] sm:$0xf] %vm1642_vm15, %v2072_v33  ;;  %v2075_v31 = vpack.c.bf16 %v2132_v12, %v2132_v12  ;;  %v1527_v19 = vpack.c.bf16 %v2132_v12, %v2131_v47 }
 0x230   : > { %v1486_v50 = vpop.f32.mrf.mxu1 }
 0x231   : > { %1670 = vst.msk [vmem:[%s2782_s7 + $0x6c] sm:$0xf] %vm1642_vm15, %v2075_v31  ;;  %v2073_v46 = vpack.c.bf16 %v1486_v50, %v1486_v50  ;;  %v1526_v60 = vpack.c.bf16 %v1486_v50, %v1483_v1  ;;  %v1701_v44 = vunpack.c.l.bf16 %v1527_v19  ;;  %v1702_v17 = vunpack.c.h.bf16 %v1527_v19 }
 0x233   : > { %1668 = vst.msk [vmem:[%s2782_s7 + $0x64] sm:$0xf] %vm1642_vm15, %v2073_v46  ;;  %v1699_v6 = vunpack.c.l.bf16 %v1526_v60  ;;  %v1700_v20 = vunpack.c.h.bf16 %v1526_v60  ;;  %v1802_v29 = vmul.f32 %v1701_v44, %v1701_v44  ;;  %v1758_v52 = vsel %vm1065_vm7, %v1701_v44, 0.0 }
 0x234   : > { %v1803_v40 = vmul.f32 %v1702_v17, %v1702_v17  ;;  %v1760_v28 = vsel %vm1065_vm7, %v1702_v17, 0.0 }
 0x235   : > { %v1800_v15 = vmul.f32 %v1699_v6, %v1699_v6  ;;  %v1754_v32 = vsel %vm1065_vm7, %v1699_v6, 0.0  ;;  %v1801_v30 = vmul.f32 %v1700_v20, %v1700_v20  ;;  %v1756_v14 = vsel %vm1065_vm7, %v1700_v20, 0.0 }
 0x236   : > { %v1755_v49 = vadd.f32 %v1754_v32, %v1753_v23  ;;  %v1859_v47 = vsel %vm1065_vm7, %v1802_v29, 0.0  ;;  %v1861_v38 = vsel %vm1065_vm7, %v1803_v40, 0.0 }
 0x237   : > { %v1855_v24 = vsel %vm1065_vm7, %v1800_v15, 0.0  ;;  %v1857_v25 = vsel %vm1065_vm7, %v1801_v30, 0.0 }
 0x238   : > { %v1856_v26 = vadd.f32 %v1855_v24, %v1854_v22  ;;  %v1757_v21 = vadd.f32 %v1756_v14, %v1755_v49 }
 0x23a   : > { %v1858_v34 = vadd.f32 %v1857_v25, %v1856_v26  ;;  %v1759_v42 = vadd.f32 %v1758_v52, %v1757_v21 }
 0x23c   : > { %v1860_v48 = vadd.f32 %v1859_v47, %v1858_v34  ;;  %v1761_v31 = vadd.f32 %v1760_v28, %v1759_v42 }
 0x23e   : > { %v1862_v57 = vadd.f32 %v1861_v38, %v1860_v48 }
 0x247   : > { %v2135_v54 = vpop.f32.mrf.mxu1 }
 0x248   : > { %v2078_v37 = vpack.c.bf16 %v2135_v54, %v2135_v54 }
 0x249   : > { %v1499_v2 = vpop.f32.mrf.mxu1 }
 0x24a   : > { %1673 = vst.msk [vmem:[%s2782_s7 + $0x78] sm:$0xf] %vm1642_vm15, %v2078_v37  ;;  %v2076_v7 = vpack.c.bf16 %v1499_v2, %v1499_v2 }
 0x24b   : > { %v2136_v9 = vpop.f32.mrf.mxu1 }
 0x24c   : > { %1671 = vst.msk [vmem:[%s2782_s7 + $0x70] sm:$0xf] %vm1642_vm15, %v2076_v7  ;;  %v2079_v35 = vpack.c.bf16 %v2136_v9, %v2136_v9  ;;  %v1529_v36 = vpack.c.bf16 %v2136_v9, %v2135_v54 }
 0x24d   : > { %v1502_v39 = vpop.f32.mrf.mxu1 }
 0x24e   : > { %1674 = vst.msk [vmem:[%s2782_s7 + $0x7c] sm:$0xf] %vm1642_vm15, %v2079_v35  ;;  %v1528_v43 = vpack.c.bf16 %v1502_v39, %v1499_v2  ;;  %v2077_v45 = vpack.c.bf16 %v1502_v39, %v1502_v39  ;;  %v1705_v1 = vunpack.c.l.bf16 %v1529_v36  ;;  %v1706_v50 = vunpack.c.h.bf16 %v1529_v36 }
 0x250   : > { %1672 = vst.msk [vmem:[%s2782_s7 + $0x74] sm:$0xf] %vm1642_vm15, %v2077_v45  ;;  %v1703_v33 = vunpack.c.l.bf16 %v1528_v43  ;;  %v1704_v12 = vunpack.c.h.bf16 %v1528_v43  ;;  %v1806_v55 = vmul.f32 %v1705_v1, %v1705_v1  ;;  %v1766_v61 = vsel %vm1065_vm7, %v1705_v1, 0.0 }
 0x251   : > { %v1807_v62 = vmul.f32 %v1706_v50, %v1706_v50  ;;  %v1768_v5 = vsel %vm1065_vm7, %v1706_v50, 0.0 }
 0x252   : > { %v1762_v46 = vsel %vm1065_vm7, %v1703_v33, 0.0  ;;  %v1804_v51 = vmul.f32 %v1703_v33, %v1703_v33  ;;  %v1805_v41 = vmul.f32 %v1704_v12, %v1704_v12  ;;  %v1764_v59 = vsel %vm1065_vm7, %v1704_v12, 0.0 }
 0x253   : > { %v1763_v53 = vadd.f32 %v1762_v46, %v1761_v31  ;;  %v1867_v6 = vsel %vm1065_vm7, %v1806_v55, 0.0  ;;  %v1869_v10 = vsel %vm1065_vm7, %v1807_v62, 0.0 }
 0x254   : > { %v1863_v56 = vsel %vm1065_vm7, %v1804_v51, 0.0  ;;  %v1865_v58 = vsel %vm1065_vm7, %v1805_v41, 0.0 }
 0x255   : > { %v1765_v3 = vadd.f32 %v1764_v59, %v1763_v53  ;;  %v1864_v60 = vadd.f32 %v1863_v56, %v1862_v57 }
 0x257   : > { %v1767_v4 = vadd.f32 %v1766_v61, %v1765_v3  ;;  %v1866_v18 = vadd.f32 %v1865_v58, %v1864_v60 }
 0x259   : > { %v1769_v8 = vadd.f32 %v1768_v5, %v1767_v4  ;;  %v1868_v11 = vadd.f32 %v1867_v6, %v1866_v18 }
 0x25b   : > { %v1770_v0 = vrot.slane %v1769_v8, 4  ;;  %v1870_v63 = vadd.f32 %v1869_v10, %v1868_v11 }
 0x25d   : > { %v1771_v15 = vadd.f32 %v1770_v0, %v1769_v8  ;;  %v1871_v16 = vrot.slane %v1870_v63, 4 }
 0x25f   : > { %v1772_v27 = vrot.slane %v1771_v15, 2  ;;  %v1872_v19 = vadd.f32 %v1871_v16, %v1870_v63 }
 0x261   : > { %v1773_v20 = vadd.f32 %v1772_v27, %v1771_v15  ;;  %v1873_v32 = vrot.slane %v1872_v19, 2 }
 0x263   : > { %v1774_v23 = vrot.slane %v1773_v20, 1  ;;  %v1874_v13 = vadd.f32 %v1873_v32, %v1872_v19 }
 0x265   : > { %v1875_v24 = vrot.slane %v1874_v13, 1  ;;  %v1775_v49 = vadd.f32 %v1774_v23, %v1773_v20 }
 0x267   : > { %v1876_v22 = vadd.f32 %v1875_v24, %v1874_v13 }
 0x269   : > { %v1878_v44 = vsel %vm448_vm0, %v1775_v49, %v1876_v22 }
 0x26a   : > { %1880 = vst.msk [vmem:[%s181_s11] sm:$0x3] %vm1879_vm1, %v1878_v44 }
 0x26b PF: > { %s14_s12 = sadd.s32 1, %s2187_s12  }
 0x26c   : > { %p11_p4 = scmp.ge.s32.totalorder %s14_s12, 4  }
 0x26e   :  { %13 = sbr.rel (!%p11_p4) target bundleno = 1 (0x1), region = 70 }

</bundles_post_ra>
